<compile_context>
chip_gen: v7x
topology: tpu7x:2x2x1
jax: 0.10.0
libtpu: 0.0.40
codegen_flags: <defaults>
</compile_context>

<pallas_src>
import jax
import jax.numpy as jnp
import numpy as np
from jax.experimental import pallas as pl
from jax.experimental.pallas import tpu as pltpu

# ---- model sizes (toy "threedim" RealNVP) -----------------------------------
D = 3           # data dimension ("threedim")
H = 32          # hidden width of each s / t MLP
L = 6           # number of coupling layers (len(mask))
H2 = 2 * H      # fused hidden width (s-net + t-net)
D2 = 2 * D      # fused output width (s | t)
NEG_SLOPE = 0.01    # torch.nn.LeakyReLU default

# ---- packed weight-buffer column layout  (lane axis of the (L, 2H, CW) buf) --
C_W1 = 0                 # cols [0, D)        : W1_fused^T        (2H, D)
C_W2 = C_W1 + D          # cols [D, D+2H)     : W2_fused^T        (2H, 2H)
C_W3 = C_W2 + H2         # cols [.., ..+2H)   : W3_fused^T        (2D, 2H)  rows 0:2D
C_B1 = C_W3 + H2         # 1 col              : b1_fused          (2H, 1)
C_B2 = C_B1 + 1          # 1 col              : b2_fused          (2H, 1)
C_B3 = C_B2 + 1          # 1 col              : b3_fused          (2D, 1)   rows 0:2D
C_M = C_B3 + 1           # 1 col              : coupling mask     (D, 1)    rows 0:D
CW = C_M + 1             # = 3 + 64 + 64 + 4 = 135


def realnvp_kernel(w_ref, x_ref, o_ref):
    """w_ref: (L, 2H, CW) packed weights; x_ref/o_ref: (D, TILE_B)."""
    x = x_ref[...]                                         # (D, TB) f32

    # L is small and static -> unroll the coupling layers.
    for i in range(L):
        w1t = w_ref[i, :, C_W1:C_W1 + D]                   # (2H, D)
        w2t = w_ref[i, :, C_W2:C_W2 + H2]                  # (2H, 2H)
        w3t = w_ref[i, 0:D2, C_W3:C_W3 + H2]               # (2D, 2H)
        b1 = w_ref[i, :, C_B1:C_B1 + 1]                    # (2H, 1)
        b2 = w_ref[i, :, C_B2:C_B2 + 1]                    # (2H, 1)
        b3 = w_ref[i, 0:D2, C_B3:C_B3 + 1]                 # (2D, 1)
        m = w_ref[i, 0:D, C_M:C_M + 1]                     # (D, 1)
        one_m = 1.0 - m

        x_ = x * m                                         # masked half, (D, TB)

        # Layer 1 (K = D = 3): VPU broadcast FMAs instead of a tiny MXU matmul.
        h = b1 + w1t[:, 0:1] * x_[0:1, :]
        for k in range(1, D):
            h = h + w1t[:, k:k + 1] * x_[k:k + 1, :]       # (2H, TB)
        h = jnp.where(h > 0, h, NEG_SLOPE * h)             # LeakyReLU

        # Layer 2: fused (2H, 2H) block-diagonal matmul on the MXU.
        h = jnp.dot(w2t, h, preferred_element_type=jnp.float32) + b2
        h = jnp.where(h > 0, h, NEG_SLOPE * h)

        # Layer 3: fused head -> rows 0:D are s (pre-tanh), rows D:2D are t.
        st = jnp.dot(w3t, h, preferred_element_type=jnp.float32) + b3  # (2D, TB)
        s = jnp.tanh(st[0:D, :])
        t = st[D:D2, :]

        # Coupling update; the outer one_m already zeroes the masked lanes,
        # so the reference's extra `s * (1-m)` / `t * (1-m)` is redundant.
        x = x_ + one_m * (x * jnp.exp(s) + t)

    o_ref[...] = x.astype(o_ref.dtype)


def pack_params(params, mask):
    """Pack all per-layer fused weights/biases + masks into one (L, 2H, CW) buffer."""
    p = {k: np.asarray(v, np.float32) for k, v in params.items()}
    mask = np.asarray(mask, np.float32)
    buf = np.zeros((L, H2, CW), np.float32)
    for i in range(L):
        w1f = np.concatenate([p["ws1"][i], p["wt1"][i]], axis=1)       # (D, 2H)
        b1f = np.concatenate([p["bs1"][i], p["bt1"][i]])               # (2H,)
        w2f = np.zeros((H2, H2), np.float32)                           # block diag
        w2f[:H, :H] = p["ws2"][i]
        w2f[H:, H:] = p["wt2"][i]
        b2f = np.concatenate([p["bs2"][i], p["bt2"][i]])               # (2H,)
        w3f = np.zeros((H2, D2), np.float32)                           # block diag
        w3f[:H, :D] = p["ws3"][i]
        w3f[H:, D:] = p["wt3"][i]
        b3f = np.concatenate([p["bs3"][i], p["bt3"][i]])               # (2D,)

        buf[i, :, C_W1:C_W1 + D] = w1f.T                               # (2H, D)
        buf[i, :, C_W2:C_W2 + H2] = w2f.T                              # (2H, 2H)
        buf[i, :D2, C_W3:C_W3 + H2] = w3f.T                            # (2D, 2H)
        buf[i, :, C_B1] = b1f
        buf[i, :, C_B2] = b2f
        buf[i, :D2, C_B3] = b3f
        buf[i, :D, C_M] = mask[i]
    return jnp.asarray(buf)


def realnvp_forward(z, packed_w, *, tile_b=128):
    """z: (B, D) float32, packed_w: (L, 2H, CW) from pack_params(). Returns (B, D)."""
    B = z.shape[0]
    n_blk = max(1, pl.cdiv(B, tile_b))
    Bp = n_blk * tile_b

    # Transpose so the batch sits on the lane axis; pad B up to the tile size.
    xt = jnp.zeros((D, Bp), jnp.float32).at[:, :B].set(
        jnp.asarray(z, jnp.float32).T)

    out_t = pl.pallas_call(
        realnvp_kernel,
        out_shape=jax.ShapeDtypeStruct((D, Bp), jnp.float32),
        grid=(n_blk,),
        in_specs=[
            # Whole packed weight buffer: constant block -> DMA'd once, stays in VMEM.
            pl.BlockSpec((L, H2, CW), lambda b: (0, 0, 0)),
            pl.BlockSpec((D, tile_b), lambda b: (0, b)),
        ],
        out_specs=pl.BlockSpec((D, tile_b), lambda b: (0, b)),
        compiler_params=pltpu.CompilerParams(
            dimension_semantics=("parallel",)),   # shards batch across v7x's 2 TCs
    )(packed_w, xt)

    return out_t[:, :B].T


# ---------------- pure-JAX reference (mirrors the PyTorch forward) -----------
def realnvp_forward_ref(z, mask, p):
    x = z
    for i in range(L):
        m = mask[i][None, :]
        x_ = x * m

        def mlp(xin, w1, b1, w2, b2, w3, b3):
            h = xin @ w1 + b1
            h = jnp.where(h > 0, h, NEG_SLOPE * h)
            h = h @ w2 + b2
            h = jnp.where(h > 0, h, NEG_SLOPE * h)
            return h @ w3 + b3

        s = jnp.tanh(mlp(x_, p["ws1"][i], p["bs1"][i], p["ws2"][i], p["bs2"][i],
                         p["ws3"][i], p["bs3"][i])) * (1.0 - m)
        t = mlp(x_, p["wt1"][i], p["bt1"][i], p["wt2"][i], p["bt2"][i],
                p["wt3"][i], p["bt3"][i]) * (1.0 - m)
        x = x_ + (1.0 - m) * (x * jnp.exp(s) + t)
    return x


def init_params(key):
    """Deterministic init; Linear weights stored as (in, out) so y = x @ W + b."""
    ks = jax.random.split(key, 12)

    def lin(k, fan_in, shape):
        bound = 1.0 / np.sqrt(fan_in)
        return jax.random.uniform(k, shape, jnp.float32, -bound, bound)

    return {
        # s-net: D -> H -> H -> D (Tanh head applied in kernel)
        "ws1": lin(ks[0], D, (L, D, H)), "bs1": lin(ks[1], D, (L, H)),
        "ws2": lin(ks[2], H, (L, H, H)), "bs2": lin(ks[3], H, (L, H)),
        "ws3": lin(ks[4], H, (L, H, D)), "bs3": lin(ks[5], H, (L, D)),
        # t-net: D -> H -> H -> D (no Tanh)
        "wt1": lin(ks[6], D, (L, D, H)), "bt1": lin(ks[7], D, (L, H)),
        "wt2": lin(ks[8], H, (L, H, H)), "bt2": lin(ks[9], H, (L, H)),
        "wt3": lin(ks[10], H, (L, H, D)), "bt3": lin(ks[11], H, (L, D)),
    }


if __name__ == "__main__":
    key = jax.random.PRNGKey(0)
    k_x, k_p = jax.random.split(key)

    # alternating binary masks, as in the standard RealNVP toy example
    base = np.array([[0.0, 1.0, 1.0], [1.0, 0.0, 0.0]], dtype=np.float32)
    mask = jnp.asarray(np.tile(base, (L // 2, 1)))            # (L, D)

    params = init_params(k_p)
    B = 256                                                   # 2 grid steps of 128
    z = jax.random.normal(k_x, (B, D), dtype=jnp.float32)     # prior sample stand-in

    packed_w = pack_params(params, mask)
    out = realnvp_forward(z, packed_w)
    out = jax.block_until_ready(out)

    ref = realnvp_forward_ref(z, mask, params)
    np.testing.assert_allclose(np.asarray(out), np.asarray(ref),
                               rtol=1e-4, atol=1e-4)

    # TODO(synk): backward() / log_prob() / sample() of the module are not part
    # of the forward pass and are not implemented as kernels.
    print("KERNEL_OK")
</pallas_src>

<mosaic_0001>
module attributes {stable_mosaic.version = 11 : i64} {
  func.func @realnvp_kernel(%arg0: i32, %arg1: memref<6x64x135xf32, #tpu.memory_space<vmem>>, %arg2: memref<3x128xf32, #tpu.memory_space<vmem>>, %arg3: memref<3x128xf32, #tpu.memory_space<vmem>>) attributes {dimension_semantics = [#tpu.dimension_semantics<parallel>], iteration_bounds = array<i64: 2>, scalar_prefetch = 0 : i64, scratch_operands = 0 : i64, tpu.core_type = #tpu.core_type<tc>, window_params = [{pipeline_mode = #tpu.pipeline_mode<synchronous>, transform_indices = @transform_0, window_bounds = array<i64: 6, 64, 135>}, {transform_indices = @transform_1, window_bounds = array<i64: 3, 128>}, {transform_indices = @transform_2, window_bounds = array<i64: 3, 128>}]} {
    %c0 = arith.constant 0 : index
    %c0_0 = arith.constant 0 : index
    %0 = vector.load %arg2[%c0, %c0_0] : memref<3x128xf32, #tpu.memory_space<vmem>>, vector<3x128xf32>
    %c0_1 = arith.constant 0 : index
    %c0_2 = arith.constant 0 : index
    %c0_3 = arith.constant 0 : index
    %1 = vector.load %arg1[%c0_1, %c0_2, %c0_3] : memref<6x64x135xf32, #tpu.memory_space<vmem>>, vector<1x64x3xf32>
    %2 = vector.shape_cast %1 : vector<1x64x3xf32> to vector<64x3xf32>
    %c0_4 = arith.constant 0 : index
    %c0_5 = arith.constant 0 : index
    %c3 = arith.constant 3 : index
    %3 = vector.load %arg1[%c0_4, %c0_5, %c3] : memref<6x64x135xf32, #tpu.memory_space<vmem>>, vector<1x64x64xf32>
    %4 = vector.shape_cast %3 : vector<1x64x64xf32> to vector<64x64xf32>
    %c0_6 = arith.constant 0 : index
    %c0_7 = arith.constant 0 : index
    %c67 = arith.constant 67 : index
    %5 = vector.load %arg1[%c0_6, %c0_7, %c67] : memref<6x64x135xf32, #tpu.memory_space<vmem>>, vector<1x6x64xf32>
    %6 = vector.shape_cast %5 : vector<1x6x64xf32> to vector<6x64xf32>
    %c0_8 = arith.constant 0 : index
    %c0_9 = arith.constant 0 : index
    %c131 = arith.constant 131 : index
    %7 = vector.load %arg1[%c0_8, %c0_9, %c131] : memref<6x64x135xf32, #tpu.memory_space<vmem>>, vector<1x64x1xf32>
    %8 = vector.shape_cast %7 : vector<1x64x1xf32> to vector<64x1xf32>
    %c0_10 = arith.constant 0 : index
    %c0_11 = arith.constant 0 : index
    %c132 = arith.constant 132 : index
    %9 = vector.load %arg1[%c0_10, %c0_11, %c132] : memref<6x64x135xf32, #tpu.memory_space<vmem>>, vector<1x64x1xf32>
    %10 = vector.shape_cast %9 : vector<1x64x1xf32> to vector<64x1xf32>
    %c0_12 = arith.constant 0 : index
    %c0_13 = arith.constant 0 : index
    %c133 = arith.constant 133 : index
    %11 = vector.load %arg1[%c0_12, %c0_13, %c133] : memref<6x64x135xf32, #tpu.memory_space<vmem>>, vector<1x6x1xf32>
    %12 = vector.shape_cast %11 : vector<1x6x1xf32> to vector<6x1xf32>
    %c0_14 = arith.constant 0 : index
    %c0_15 = arith.constant 0 : index
    %c134 = arith.constant 134 : index
    %13 = vector.load %arg1[%c0_14, %c0_15, %c134] : memref<6x64x135xf32, #tpu.memory_space<vmem>>, vector<1x3x1xf32>
    %14 = vector.shape_cast %13 : vector<1x3x1xf32> to vector<3x1xf32>
    %cst = arith.constant 1.000000e+00 : f32
    %15 = vector.broadcast %cst : f32 to vector<3x1xf32>
    %16 = arith.subf %15, %14 : vector<3x1xf32>
    %17 = vector.broadcast %14 : vector<3x1xf32> to vector<3x128xf32>
    %18 = arith.mulf %0, %17 : vector<3x128xf32>
    %19 = vector.extract_strided_slice %2 {offsets = [0, 0], sizes = [64, 1], strides = [1, 1]} : vector<64x3xf32> to vector<64x1xf32>
    %20 = vector.extract_strided_slice %18 {offsets = [0, 0], sizes = [1, 128], strides = [1, 1]} : vector<3x128xf32> to vector<1x128xf32>
    %21 = vector.broadcast %19 : vector<64x1xf32> to vector<64x128xf32>
    %22 = vector.broadcast %20 : vector<1x128xf32> to vector<64x128xf32>
    %23 = arith.mulf %21, %22 : vector<64x128xf32>
    %24 = vector.broadcast %8 : vector<64x1xf32> to vector<64x128xf32>
    %25 = arith.addf %24, %23 : vector<64x128xf32>
    %26 = vector.extract_strided_slice %2 {offsets = [0, 1], sizes = [64, 1], strides = [1, 1]} : vector<64x3xf32> to vector<64x1xf32>
    %27 = vector.extract_strided_slice %18 {offsets = [1, 0], sizes = [1, 128], strides = [1, 1]} : vector<3x128xf32> to vector<1x128xf32>
    %28 = vector.broadcast %26 : vector<64x1xf32> to vector<64x128xf32>
    %29 = vector.broadcast %27 : vector<1x128xf32> to vector<64x128xf32>
    %30 = arith.mulf %28, %29 : vector<64x128xf32>
    %31 = arith.addf %25, %30 : vector<64x128xf32>
    %32 = vector.extract_strided_slice %2 {offsets = [0, 2], sizes = [64, 1], strides = [1, 1]} : vector<64x3xf32> to vector<64x1xf32>
    %33 = vector.extract_strided_slice %18 {offsets = [2, 0], sizes = [1, 128], strides = [1, 1]} : vector<3x128xf32> to vector<1x128xf32>
    %34 = vector.broadcast %32 : vector<64x1xf32> to vector<64x128xf32>
    %35 = vector.broadcast %33 : vector<1x128xf32> to vector<64x128xf32>
    %36 = arith.mulf %34, %35 : vector<64x128xf32>
    %37 = arith.addf %31, %36 : vector<64x128xf32>
    %cst_16 = arith.constant 0.000000e+00 : f32
    %38 = vector.broadcast %cst_16 : f32 to vector<64x128xf32>
    %39 = arith.cmpf ogt, %37, %38 : vector<64x128xf32>
    %cst_17 = arith.constant 0.00999999977 : f32
    %40 = vector.broadcast %cst_17 : f32 to vector<64x128xf32>
    %41 = arith.mulf %40, %37 : vector<64x128xf32>
    %42 = arith.select %39, %37, %41 : vector<64x128xi1>, vector<64x128xf32>
    %cst_18 = arith.constant dense<0.000000e+00> : vector<64x128xf32>
    %43 = tpu.matmul %4, %42, %cst_18 {dimension_numbers = #tpu.dot_dimension_numbers<[1], [0], [0], [1], [0, 0, 1, 1], [], []>} : vector<64x64xf32>, vector<64x128xf32>, vector<64x128xf32> -> vector<64x128xf32>
    %44 = vector.broadcast %10 : vector<64x1xf32> to vector<64x128xf32>
    %45 = arith.addf %43, %44 : vector<64x128xf32>
    %cst_19 = arith.constant 0.000000e+00 : f32
    %46 = vector.broadcast %cst_19 : f32 to vector<64x128xf32>
    %47 = arith.cmpf ogt, %45, %46 : vector<64x128xf32>
    %cst_20 = arith.constant 0.00999999977 : f32
    %48 = vector.broadcast %cst_20 : f32 to vector<64x128xf32>
    %49 = arith.mulf %48, %45 : vector<64x128xf32>
    %50 = arith.select %47, %45, %49 : vector<64x128xi1>, vector<64x128xf32>
    %cst_21 = arith.constant dense<0.000000e+00> : vector<6x128xf32>
    %51 = tpu.matmul %6, %50, %cst_21 {dimension_numbers = #tpu.dot_dimension_numbers<[1], [0], [0], [1], [0, 0, 1, 1], [], []>} : vector<6x64xf32>, vector<64x128xf32>, vector<6x128xf32> -> vector<6x128xf32>
    %52 = vector.broadcast %12 : vector<6x1xf32> to vector<6x128xf32>
    %53 = arith.addf %51, %52 : vector<6x128xf32>
    %54 = vector.extract_strided_slice %53 {offsets = [0, 0], sizes = [3, 128], strides = [1, 1]} : vector<6x128xf32> to vector<3x128xf32>
    %55 = math.tanh %54 : vector<3x128xf32>
    %56 = vector.extract_strided_slice %53 {offsets = [3, 0], sizes = [3, 128], strides = [1, 1]} : vector<6x128xf32> to vector<3x128xf32>
    %57 = math.exp %55 : vector<3x128xf32>
    %58 = arith.mulf %0, %57 : vector<3x128xf32>
    %59 = arith.addf %58, %56 : vector<3x128xf32>
    %60 = vector.broadcast %16 : vector<3x1xf32> to vector<3x128xf32>
    %61 = arith.mulf %60, %59 : vector<3x128xf32>
    %62 = arith.addf %18, %61 : vector<3x128xf32>
    %c1 = arith.constant 1 : index
    %c0_22 = arith.constant 0 : index
    %c0_23 = arith.constant 0 : index
    %63 = vector.load %arg1[%c1, %c0_22, %c0_23] : memref<6x64x135xf32, #tpu.memory_space<vmem>>, vector<1x64x3xf32>
    %64 = vector.shape_cast %63 : vector<1x64x3xf32> to vector<64x3xf32>
    %c1_24 = arith.constant 1 : index
    %c0_25 = arith.constant 0 : index
    %c3_26 = arith.constant 3 : index
    %65 = vector.load %arg1[%c1_24, %c0_25, %c3_26] : memref<6x64x135xf32, #tpu.memory_space<vmem>>, vector<1x64x64xf32>
    %66 = vector.shape_cast %65 : vector<1x64x64xf32> to vector<64x64xf32>
    %c1_27 = arith.constant 1 : index
    %c0_28 = arith.constant 0 : index
    %c67_29 = arith.constant 67 : index
    %67 = vector.load %arg1[%c1_27, %c0_28, %c67_29] : memref<6x64x135xf32, #tpu.memory_space<vmem>>, vector<1x6x64xf32>
    %68 = vector.shape_cast %67 : vector<1x6x64xf32> to vector<6x64xf32>
    %c1_30 = arith.constant 1 : index
    %c0_31 = arith.constant 0 : index
    %c131_32 = arith.constant 131 : index
    %69 = vector.load %arg1[%c1_30, %c0_31, %c131_32] : memref<6x64x135xf32, #tpu.memory_space<vmem>>, vector<1x64x1xf32>
    %70 = vector.shape_cast %69 : vector<1x64x1xf32> to vector<64x1xf32>
    %c1_33 = arith.constant 1 : index
    %c0_34 = arith.constant 0 : index
    %c132_35 = arith.constant 132 : index
    %71 = vector.load %arg1[%c1_33, %c0_34, %c132_35] : memref<6x64x135xf32, #tpu.memory_space<vmem>>, vector<1x64x1xf32>
    %72 = vector.shape_cast %71 : vector<1x64x1xf32> to vector<64x1xf32>
    %c1_36 = arith.constant 1 : index
    %c0_37 = arith.constant 0 : index
    %c133_38 = arith.constant 133 : index
    %73 = vector.load %arg1[%c1_36, %c0_37, %c133_38] : memref<6x64x135xf32, #tpu.memory_space<vmem>>, vector<1x6x1xf32>
    %74 = vector.shape_cast %73 : vector<1x6x1xf32> to vector<6x1xf32>
    %c1_39 = arith.constant 1 : index
    %c0_40 = arith.constant 0 : index
    %c134_41 = arith.constant 134 : index
    %75 = vector.load %arg1[%c1_39, %c0_40, %c134_41] : memref<6x64x135xf32, #tpu.memory_space<vmem>>, vector<1x3x1xf32>
    %76 = vector.shape_cast %75 : vector<1x3x1xf32> to vector<3x1xf32>
    %cst_42 = arith.constant 1.000000e+00 : f32
    %77 = vector.broadcast %cst_42 : f32 to vector<3x1xf32>
    %78 = arith.subf %77, %76 : vector<3x1xf32>
    %79 = vector.broadcast %76 : vector<3x1xf32> to vector<3x128xf32>
    %80 = arith.mulf %62, %79 : vector<3x128xf32>
    %81 = vector.extract_strided_slice %64 {offsets = [0, 0], sizes = [64, 1], strides = [1, 1]} : vector<64x3xf32> to vector<64x1xf32>
    %82 = vector.extract_strided_slice %80 {offsets = [0, 0], sizes = [1, 128], strides = [1, 1]} : vector<3x128xf32> to vector<1x128xf32>
    %83 = vector.broadcast %81 : vector<64x1xf32> to vector<64x128xf32>
    %84 = vector.broadcast %82 : vector<1x128xf32> to vector<64x128xf32>
    %85 = arith.mulf %83, %84 : vector<64x128xf32>
    %86 = vector.broadcast %70 : vector<64x1xf32> to vector<64x128xf32>
    %87 = arith.addf %86, %85 : vector<64x128xf32>
    %88 = vector.extract_strided_slice %64 {offsets = [0, 1], sizes = [64, 1], strides = [1, 1]} : vector<64x3xf32> to vector<64x1xf32>
    %89 = vector.extract_strided_slice %80 {offsets = [1, 0], sizes = [1, 128], strides = [1, 1]} : vector<3x128xf32> to vector<1x128xf32>
    %90 = vector.broadcast %88 : vector<64x1xf32> to vector<64x128xf32>
    %91 = vector.broadcast %89 : vector<1x128xf32> to vector<64x128xf32>
    %92 = arith.mulf %90, %91 : vector<64x128xf32>
    %93 = arith.addf %87, %92 : vector<64x128xf32>
    %94 = vector.extract_strided_slice %64 {offsets = [0, 2], sizes = [64, 1], strides = [1, 1]} : vector<64x3xf32> to vector<64x1xf32>
    %95 = vector.extract_strided_slice %80 {offsets = [2, 0], sizes = [1, 128], strides = [1, 1]} : vector<3x128xf32> to vector<1x128xf32>
    %96 = vector.broadcast %94 : vector<64x1xf32> to vector<64x128xf32>
    %97 = vector.broadcast %95 : vector<1x128xf32> to vector<64x128xf32>
    %98 = arith.mulf %96, %97 : vector<64x128xf32>
    %99 = arith.addf %93, %98 : vector<64x128xf32>
    %cst_43 = arith.constant 0.000000e+00 : f32
    %100 = vector.broadcast %cst_43 : f32 to vector<64x128xf32>
    %101 = arith.cmpf ogt, %99, %100 : vector<64x128xf32>
    %cst_44 = arith.constant 0.00999999977 : f32
    %102 = vector.broadcast %cst_44 : f32 to vector<64x128xf32>
    %103 = arith.mulf %102, %99 : vector<64x128xf32>
    %104 = arith.select %101, %99, %103 : vector<64x128xi1>, vector<64x128xf32>
    %cst_45 = arith.constant dense<0.000000e+00> : vector<64x128xf32>
    %105 = tpu.matmul %66, %104, %cst_45 {dimension_numbers = #tpu.dot_dimension_numbers<[1], [0], [0], [1], [0, 0, 1, 1], [], []>} : vector<64x64xf32>, vector<64x128xf32>, vector<64x128xf32> -> vector<64x128xf32>
    %106 = vector.broadcast %72 : vector<64x1xf32> to vector<64x128xf32>
    %107 = arith.addf %105, %106 : vector<64x128xf32>
    %cst_46 = arith.constant 0.000000e+00 : f32
    %108 = vector.broadcast %cst_46 : f32 to vector<64x128xf32>
    %109 = arith.cmpf ogt, %107, %108 : vector<64x128xf32>
    %cst_47 = arith.constant 0.00999999977 : f32
    %110 = vector.broadcast %cst_47 : f32 to vector<64x128xf32>
    %111 = arith.mulf %110, %107 : vector<64x128xf32>
    %112 = arith.select %109, %107, %111 : vector<64x128xi1>, vector<64x128xf32>
    %cst_48 = arith.constant dense<0.000000e+00> : vector<6x128xf32>
    %113 = tpu.matmul %68, %112, %cst_48 {dimension_numbers = #tpu.dot_dimension_numbers<[1], [0], [0], [1], [0, 0, 1, 1], [], []>} : vector<6x64xf32>, vector<64x128xf32>, vector<6x128xf32> -> vector<6x128xf32>
    %114 = vector.broadcast %74 : vector<6x1xf32> to vector<6x128xf32>
    %115 = arith.addf %113, %114 : vector<6x128xf32>
    %116 = vector.extract_strided_slice %115 {offsets = [0, 0], sizes = [3, 128], strides = [1, 1]} : vector<6x128xf32> to vector<3x128xf32>
    %117 = math.tanh %116 : vector<3x128xf32>
    %118 = vector.extract_strided_slice %115 {offsets = [3, 0], sizes = [3, 128], strides = [1, 1]} : vector<6x128xf32> to vector<3x128xf32>
    %119 = math.exp %117 : vector<3x128xf32>
    %120 = arith.mulf %62, %119 : vector<3x128xf32>
    %121 = arith.addf %120, %118 : vector<3x128xf32>
    %122 = vector.broadcast %78 : vector<3x1xf32> to vector<3x128xf32>
    %123 = arith.mulf %122, %121 : vector<3x128xf32>
    %124 = arith.addf %80, %123 : vector<3x128xf32>
    %c2 = arith.constant 2 : index
    %c0_49 = arith.constant 0 : index
    %c0_50 = arith.constant 0 : index
    %125 = vector.load %arg1[%c2, %c0_49, %c0_50] : memref<6x64x135xf32, #tpu.memory_space<vmem>>, vector<1x64x3xf32>
    %126 = vector.shape_cast %125 : vector<1x64x3xf32> to vector<64x3xf32>
    %c2_51 = arith.constant 2 : index
    %c0_52 = arith.constant 0 : index
    %c3_53 = arith.constant 3 : index
    %127 = vector.load %arg1[%c2_51, %c0_52, %c3_53] : memref<6x64x135xf32, #tpu.memory_space<vmem>>, vector<1x64x64xf32>
    %128 = vector.shape_cast %127 : vector<1x64x64xf32> to vector<64x64xf32>
    %c2_54 = arith.constant 2 : index
    %c0_55 = arith.constant 0 : index
    %c67_56 = arith.constant 67 : index
    %129 = vector.load %arg1[%c2_54, %c0_55, %c67_56] : memref<6x64x135xf32, #tpu.memory_space<vmem>>, vector<1x6x64xf32>
    %130 = vector.shape_cast %129 : vector<1x6x64xf32> to vector<6x64xf32>
    %c2_57 = arith.constant 2 : index
    %c0_58 = arith.constant 0 : index
    %c131_59 = arith.constant 131 : index
    %131 = vector.load %arg1[%c2_57, %c0_58, %c131_59] : memref<6x64x135xf32, #tpu.memory_space<vmem>>, vector<1x64x1xf32>
    %132 = vector.shape_cast %131 : vector<1x64x1xf32> to vector<64x1xf32>
    %c2_60 = arith.constant 2 : index
    %c0_61 = arith.constant 0 : index
    %c132_62 = arith.constant 132 : index
    %133 = vector.load %arg1[%c2_60, %c0_61, %c132_62] : memref<6x64x135xf32, #tpu.memory_space<vmem>>, vector<1x64x1xf32>
    %134 = vector.shape_cast %133 : vector<1x64x1xf32> to vector<64x1xf32>
    %c2_63 = arith.constant 2 : index
    %c0_64 = arith.constant 0 : index
    %c133_65 = arith.constant 133 : index
    %135 = vector.load %arg1[%c2_63, %c0_64, %c133_65] : memref<6x64x135xf32, #tpu.memory_space<vmem>>, vector<1x6x1xf32>
    %136 = vector.shape_cast %135 : vector<1x6x1xf32> to vector<6x1xf32>
    %c2_66 = arith.constant 2 : index
    %c0_67 = arith.constant 0 : index
    %c134_68 = arith.constant 134 : index
    %137 = vector.load %arg1[%c2_66, %c0_67, %c134_68] : memref<6x64x135xf32, #tpu.memory_space<vmem>>, vector<1x3x1xf32>
    %138 = vector.shape_cast %137 : vector<1x3x1xf32> to vector<3x1xf32>
    %cst_69 = arith.constant 1.000000e+00 : f32
    %139 = vector.broadcast %cst_69 : f32 to vector<3x1xf32>
    %140 = arith.subf %139, %138 : vector<3x1xf32>
    %141 = vector.broadcast %138 : vector<3x1xf32> to vector<3x128xf32>
    %142 = arith.mulf %124, %141 : vector<3x128xf32>
    %143 = vector.extract_strided_slice %126 {offsets = [0, 0], sizes = [64, 1], strides = [1, 1]} : vector<64x3xf32> to vector<64x1xf32>
    %144 = vector.extract_strided_slice %142 {offsets = [0, 0], sizes = [1, 128], strides = [1, 1]} : vector<3x128xf32> to vector<1x128xf32>
    %145 = vector.broadcast %143 : vector<64x1xf32> to vector<64x128xf32>
    %146 = vector.broadcast %144 : vector<1x128xf32> to vector<64x128xf32>
    %147 = arith.mulf %145, %146 : vector<64x128xf32>
    %148 = vector.broadcast %132 : vector<64x1xf32> to vector<64x128xf32>
    %149 = arith.addf %148, %147 : vector<64x128xf32>
    %150 = vector.extract_strided_slice %126 {offsets = [0, 1], sizes = [64, 1], strides = [1, 1]} : vector<64x3xf32> to vector<64x1xf32>
    %151 = vector.extract_strided_slice %142 {offsets = [1, 0], sizes = [1, 128], strides = [1, 1]} : vector<3x128xf32> to vector<1x128xf32>
    %152 = vector.broadcast %150 : vector<64x1xf32> to vector<64x128xf32>
    %153 = vector.broadcast %151 : vector<1x128xf32> to vector<64x128xf32>
    %154 = arith.mulf %152, %153 : vector<64x128xf32>
    %155 = arith.addf %149, %154 : vector<64x128xf32>
    %156 = vector.extract_strided_slice %126 {offsets = [0, 2], sizes = [64, 1], strides = [1, 1]} : vector<64x3xf32> to vector<64x1xf32>
    %157 = vector.extract_strided_slice %142 {offsets = [2, 0], sizes = [1, 128], strides = [1, 1]} : vector<3x128xf32> to vector<1x128xf32>
    %158 = vector.broadcast %156 : vector<64x1xf32> to vector<64x128xf32>
    %159 = vector.broadcast %157 : vector<1x128xf32> to vector<64x128xf32>
    %160 = arith.mulf %158, %159 : vector<64x128xf32>
    %161 = arith.addf %155, %160 : vector<64x128xf32>
    %cst_70 = arith.constant 0.000000e+00 : f32
    %162 = vector.broadcast %cst_70 : f32 to vector<64x128xf32>
    %163 = arith.cmpf ogt, %161, %162 : vector<64x128xf32>
    %cst_71 = arith.constant 0.00999999977 : f32
    %164 = vector.broadcast %cst_71 : f32 to vector<64x128xf32>
    %165 = arith.mulf %164, %161 : vector<64x128xf32>
    %166 = arith.select %163, %161, %165 : vector<64x128xi1>, vector<64x128xf32>
    %cst_72 = arith.constant dense<0.000000e+00> : vector<64x128xf32>
    %167 = tpu.matmul %128, %166, %cst_72 {dimension_numbers = #tpu.dot_dimension_numbers<[1], [0], [0], [1], [0, 0, 1, 1], [], []>} : vector<64x64xf32>, vector<64x128xf32>, vector<64x128xf32> -> vector<64x128xf32>
    %168 = vector.broadcast %134 : vector<64x1xf32> to vector<64x128xf32>
    %169 = arith.addf %167, %168 : vector<64x128xf32>
    %cst_73 = arith.constant 0.000000e+00 : f32
    %170 = vector.broadcast %cst_73 : f32 to vector<64x128xf32>
    %171 = arith.cmpf ogt, %169, %170 : vector<64x128xf32>
    %cst_74 = arith.constant 0.00999999977 : f32
    %172 = vector.broadcast %cst_74 : f32 to vector<64x128xf32>
    %173 = arith.mulf %172, %169 : vector<64x128xf32>
    %174 = arith.select %171, %169, %173 : vector<64x128xi1>, vector<64x128xf32>
    %cst_75 = arith.constant dense<0.000000e+00> : vector<6x128xf32>
    %175 = tpu.matmul %130, %174, %cst_75 {dimension_numbers = #tpu.dot_dimension_numbers<[1], [0], [0], [1], [0, 0, 1, 1], [], []>} : vector<6x64xf32>, vector<64x128xf32>, vector<6x128xf32> -> vector<6x128xf32>
    %176 = vector.broadcast %136 : vector<6x1xf32> to vector<6x128xf32>
    %177 = arith.addf %175, %176 : vector<6x128xf32>
    %178 = vector.extract_strided_slice %177 {offsets = [0, 0], sizes = [3, 128], strides = [1, 1]} : vector<6x128xf32> to vector<3x128xf32>
    %179 = math.tanh %178 : vector<3x128xf32>
    %180 = vector.extract_strided_slice %177 {offsets = [3, 0], sizes = [3, 128], strides = [1, 1]} : vector<6x128xf32> to vector<3x128xf32>
    %181 = math.exp %179 : vector<3x128xf32>
    %182 = arith.mulf %124, %181 : vector<3x128xf32>
    %183 = arith.addf %182, %180 : vector<3x128xf32>
    %184 = vector.broadcast %140 : vector<3x1xf32> to vector<3x128xf32>
    %185 = arith.mulf %184, %183 : vector<3x128xf32>
    %186 = arith.addf %142, %185 : vector<3x128xf32>
    %c3_76 = arith.constant 3 : index
    %c0_77 = arith.constant 0 : index
    %c0_78 = arith.constant 0 : index
    %187 = vector.load %arg1[%c3_76, %c0_77, %c0_78] : memref<6x64x135xf32, #tpu.memory_space<vmem>>, vector<1x64x3xf32>
    %188 = vector.shape_cast %187 : vector<1x64x3xf32> to vector<64x3xf32>
    %c3_79 = arith.constant 3 : index
    %c0_80 = arith.constant 0 : index
    %c3_81 = arith.constant 3 : index
    %189 = vector.load %arg1[%c3_79, %c0_80, %c3_81] : memref<6x64x135xf32, #tpu.memory_space<vmem>>, vector<1x64x64xf32>
    %190 = vector.shape_cast %189 : vector<1x64x64xf32> to vector<64x64xf32>
    %c3_82 = arith.constant 3 : index
    %c0_83 = arith.constant 0 : index
    %c67_84 = arith.constant 67 : index
    %191 = vector.load %arg1[%c3_82, %c0_83, %c67_84] : memref<6x64x135xf32, #tpu.memory_space<vmem>>, vector<1x6x64xf32>
    %192 = vector.shape_cast %191 : vector<1x6x64xf32> to vector<6x64xf32>
    %c3_85 = arith.constant 3 : index
    %c0_86 = arith.constant 0 : index
    %c131_87 = arith.constant 131 : index
    %193 = vector.load %arg1[%c3_85, %c0_86, %c131_87] : memref<6x64x135xf32, #tpu.memory_space<vmem>>, vector<1x64x1xf32>
    %194 = vector.shape_cast %193 : vector<1x64x1xf32> to vector<64x1xf32>
    %c3_88 = arith.constant 3 : index
    %c0_89 = arith.constant 0 : index
    %c132_90 = arith.constant 132 : index
    %195 = vector.load %arg1[%c3_88, %c0_89, %c132_90] : memref<6x64x135xf32, #tpu.memory_space<vmem>>, vector<1x64x1xf32>
    %196 = vector.shape_cast %195 : vector<1x64x1xf32> to vector<64x1xf32>
    %c3_91 = arith.constant 3 : index
    %c0_92 = arith.constant 0 : index
    %c133_93 = arith.constant 133 : index
    %197 = vector.load %arg1[%c3_91, %c0_92, %c133_93] : memref<6x64x135xf32, #tpu.memory_space<vmem>>, vector<1x6x1xf32>
    %198 = vector.shape_cast %197 : vector<1x6x1xf32> to vector<6x1xf32>
    %c3_94 = arith.constant 3 : index
    %c0_95 = arith.constant 0 : index
    %c134_96 = arith.constant 134 : index
    %199 = vector.load %arg1[%c3_94, %c0_95, %c134_96] : memref<6x64x135xf32, #tpu.memory_space<vmem>>, vector<1x3x1xf32>
    %200 = vector.shape_cast %199 : vector<1x3x1xf32> to vector<3x1xf32>
    %cst_97 = arith.constant 1.000000e+00 : f32
    %201 = vector.broadcast %cst_97 : f32 to vector<3x1xf32>
    %202 = arith.subf %201, %200 : vector<3x1xf32>
    %203 = vector.broadcast %200 : vector<3x1xf32> to vector<3x128xf32>
    %204 = arith.mulf %186, %203 : vector<3x128xf32>
    %205 = vector.extract_strided_slice %188 {offsets = [0, 0], sizes = [64, 1], strides = [1, 1]} : vector<64x3xf32> to vector<64x1xf32>
    %206 = vector.extract_strided_slice %204 {offsets = [0, 0], sizes = [1, 128], strides = [1, 1]} : vector<3x128xf32> to vector<1x128xf32>
    %207 = vector.broadcast %205 : vector<64x1xf32> to vector<64x128xf32>
    %208 = vector.broadcast %206 : vector<1x128xf32> to vector<64x128xf32>
    %209 = arith.mulf %207, %208 : vector<64x128xf32>
    %210 = vector.broadcast %194 : vector<64x1xf32> to vector<64x128xf32>
    %211 = arith.addf %210, %209 : vector<64x128xf32>
    %212 = vector.extract_strided_slice %188 {offsets = [0, 1], sizes = [64, 1], strides = [1, 1]} : vector<64x3xf32> to vector<64x1xf32>
    %213 = vector.extract_strided_slice %204 {offsets = [1, 0], sizes = [1, 128], strides = [1, 1]} : vector<3x128xf32> to vector<1x128xf32>
    %214 = vector.broadcast %212 : vector<64x1xf32> to vector<64x128xf32>
    %215 = vector.broadcast %213 : vector<1x128xf32> to vector<64x128xf32>
    %216 = arith.mulf %214, %215 : vector<64x128xf32>
    %217 = arith.addf %211, %216 : vector<64x128xf32>
    %218 = vector.extract_strided_slice %188 {offsets = [0, 2], sizes = [64, 1], strides = [1, 1]} : vector<64x3xf32> to vector<64x1xf32>
    %219 = vector.extract_strided_slice %204 {offsets = [2, 0], sizes = [1, 128], strides = [1, 1]} : vector<3x128xf32> to vector<1x128xf32>
    %220 = vector.broadcast %218 : vector<64x1xf32> to vector<64x128xf32>
    %221 = vector.broadcast %219 : vector<1x128xf32> to vector<64x128xf32>
    %222 = arith.mulf %220, %221 : vector<64x128xf32>
    %223 = arith.addf %217, %222 : vector<64x128xf32>
    %cst_98 = arith.constant 0.000000e+00 : f32
    %224 = vector.broadcast %cst_98 : f32 to vector<64x128xf32>
    %225 = arith.cmpf ogt, %223, %224 : vector<64x128xf32>
    %cst_99 = arith.constant 0.00999999977 : f32
    %226 = vector.broadcast %cst_99 : f32 to vector<64x128xf32>
    %227 = arith.mulf %226, %223 : vector<64x128xf32>
    %228 = arith.select %225, %223, %227 : vector<64x128xi1>, vector<64x128xf32>
    %cst_100 = arith.constant dense<0.000000e+00> : vector<64x128xf32>
    %229 = tpu.matmul %190, %228, %cst_100 {dimension_numbers = #tpu.dot_dimension_numbers<[1], [0], [0], [1], [0, 0, 1, 1], [], []>} : vector<64x64xf32>, vector<64x128xf32>, vector<64x128xf32> -> vector<64x128xf32>
    %230 = vector.broadcast %196 : vector<64x1xf32> to vector<64x128xf32>
    %231 = arith.addf %229, %230 : vector<64x128xf32>
    %cst_101 = arith.constant 0.000000e+00 : f32
    %232 = vector.broadcast %cst_101 : f32 to vector<64x128xf32>
    %233 = arith.cmpf ogt, %231, %232 : vector<64x128xf32>
    %cst_102 = arith.constant 0.00999999977 : f32
    %234 = vector.broadcast %cst_102 : f32 to vector<64x128xf32>
    %235 = arith.mulf %234, %231 : vector<64x128xf32>
    %236 = arith.select %233, %231, %235 : vector<64x128xi1>, vector<64x128xf32>
    %cst_103 = arith.constant dense<0.000000e+00> : vector<6x128xf32>
    %237 = tpu.matmul %192, %236, %cst_103 {dimension_numbers = #tpu.dot_dimension_numbers<[1], [0], [0], [1], [0, 0, 1, 1], [], []>} : vector<6x64xf32>, vector<64x128xf32>, vector<6x128xf32> -> vector<6x128xf32>
    %238 = vector.broadcast %198 : vector<6x1xf32> to vector<6x128xf32>
    %239 = arith.addf %237, %238 : vector<6x128xf32>
    %240 = vector.extract_strided_slice %239 {offsets = [0, 0], sizes = [3, 128], strides = [1, 1]} : vector<6x128xf32> to vector<3x128xf32>
    %241 = math.tanh %240 : vector<3x128xf32>
    %242 = vector.extract_strided_slice %239 {offsets = [3, 0], sizes = [3, 128], strides = [1, 1]} : vector<6x128xf32> to vector<3x128xf32>
    %243 = math.exp %241 : vector<3x128xf32>
    %244 = arith.mulf %186, %243 : vector<3x128xf32>
    %245 = arith.addf %244, %242 : vector<3x128xf32>
    %246 = vector.broadcast %202 : vector<3x1xf32> to vector<3x128xf32>
    %247 = arith.mulf %246, %245 : vector<3x128xf32>
    %248 = arith.addf %204, %247 : vector<3x128xf32>
    %c4 = arith.constant 4 : index
    %c0_104 = arith.constant 0 : index
    %c0_105 = arith.constant 0 : index
    %249 = vector.load %arg1[%c4, %c0_104, %c0_105] : memref<6x64x135xf32, #tpu.memory_space<vmem>>, vector<1x64x3xf32>
    %250 = vector.shape_cast %249 : vector<1x64x3xf32> to vector<64x3xf32>
    %c4_106 = arith.constant 4 : index
    %c0_107 = arith.constant 0 : index
    %c3_108 = arith.constant 3 : index
    %251 = vector.load %arg1[%c4_106, %c0_107, %c3_108] : memref<6x64x135xf32, #tpu.memory_space<vmem>>, vector<1x64x64xf32>
    %252 = vector.shape_cast %251 : vector<1x64x64xf32> to vector<64x64xf32>
    %c4_109 = arith.constant 4 : index
    %c0_110 = arith.constant 0 : index
    %c67_111 = arith.constant 67 : index
    %253 = vector.load %arg1[%c4_109, %c0_110, %c67_111] : memref<6x64x135xf32, #tpu.memory_space<vmem>>, vector<1x6x64xf32>
    %254 = vector.shape_cast %253 : vector<1x6x64xf32> to vector<6x64xf32>
    %c4_112 = arith.constant 4 : index
    %c0_113 = arith.constant 0 : index
    %c131_114 = arith.constant 131 : index
    %255 = vector.load %arg1[%c4_112, %c0_113, %c131_114] : memref<6x64x135xf32, #tpu.memory_space<vmem>>, vector<1x64x1xf32>
    %256 = vector.shape_cast %255 : vector<1x64x1xf32> to vector<64x1xf32>
    %c4_115 = arith.constant 4 : index
    %c0_116 = arith.constant 0 : index
    %c132_117 = arith.constant 132 : index
    %257 = vector.load %arg1[%c4_115, %c0_116, %c132_117] : memref<6x64x135xf32, #tpu.memory_space<vmem>>, vector<1x64x1xf32>
    %258 = vector.shape_cast %257 : vector<1x64x1xf32> to vector<64x1xf32>
    %c4_118 = arith.constant 4 : index
    %c0_119 = arith.constant 0 : index
    %c133_120 = arith.constant 133 : index
    %259 = vector.load %arg1[%c4_118, %c0_119, %c133_120] : memref<6x64x135xf32, #tpu.memory_space<vmem>>, vector<1x6x1xf32>
    %260 = vector.shape_cast %259 : vector<1x6x1xf32> to vector<6x1xf32>
    %c4_121 = arith.constant 4 : index
    %c0_122 = arith.constant 0 : index
    %c134_123 = arith.constant 134 : index
    %261 = vector.load %arg1[%c4_121, %c0_122, %c134_123] : memref<6x64x135xf32, #tpu.memory_space<vmem>>, vector<1x3x1xf32>
    %262 = vector.shape_cast %261 : vector<1x3x1xf32> to vector<3x1xf32>
    %cst_124 = arith.constant 1.000000e+00 : f32
    %263 = vector.broadcast %cst_124 : f32 to vector<3x1xf32>
    %264 = arith.subf %263, %262 : vector<3x1xf32>
    %265 = vector.broadcast %262 : vector<3x1xf32> to vector<3x128xf32>
    %266 = arith.mulf %248, %265 : vector<3x128xf32>
    %267 = vector.extract_strided_slice %250 {offsets = [0, 0], sizes = [64, 1], strides = [1, 1]} : vector<64x3xf32> to vector<64x1xf32>
    %268 = vector.extract_strided_slice %266 {offsets = [0, 0], sizes = [1, 128], strides = [1, 1]} : vector<3x128xf32> to vector<1x128xf32>
    %269 = vector.broadcast %267 : vector<64x1xf32> to vector<64x128xf32>
    %270 = vector.broadcast %268 : vector<1x128xf32> to vector<64x128xf32>
    %271 = arith.mulf %269, %270 : vector<64x128xf32>
    %272 = vector.broadcast %256 : vector<64x1xf32> to vector<64x128xf32>
    %273 = arith.addf %272, %271 : vector<64x128xf32>
    %274 = vector.extract_strided_slice %250 {offsets = [0, 1], sizes = [64, 1], strides = [1, 1]} : vector<64x3xf32> to vector<64x1xf32>
    %275 = vector.extract_strided_slice %266 {offsets = [1, 0], sizes = [1, 128], strides = [1, 1]} : vector<3x128xf32> to vector<1x128xf32>
    %276 = vector.broadcast %274 : vector<64x1xf32> to vector<64x128xf32>
    %277 = vector.broadcast %275 : vector<1x128xf32> to vector<64x128xf32>
    %278 = arith.mulf %276, %277 : vector<64x128xf32>
    %279 = arith.addf %273, %278 : vector<64x128xf32>
    %280 = vector.extract_strided_slice %250 {offsets = [0, 2], sizes = [64, 1], strides = [1, 1]} : vector<64x3xf32> to vector<64x1xf32>
    %281 = vector.extract_strided_slice %266 {offsets = [2, 0], sizes = [1, 128], strides = [1, 1]} : vector<3x128xf32> to vector<1x128xf32>
    %282 = vector.broadcast %280 : vector<64x1xf32> to vector<64x128xf32>
    %283 = vector.broadcast %281 : vector<1x128xf32> to vector<64x128xf32>
    %284 = arith.mulf %282, %283 : vector<64x128xf32>
    %285 = arith.addf %279, %284 : vector<64x128xf32>
    %cst_125 = arith.constant 0.000000e+00 : f32
    %286 = vector.broadcast %cst_125 : f32 to vector<64x128xf32>
    %287 = arith.cmpf ogt, %285, %286 : vector<64x128xf32>
    %cst_126 = arith.constant 0.00999999977 : f32
    %288 = vector.broadcast %cst_126 : f32 to vector<64x128xf32>
    %289 = arith.mulf %288, %285 : vector<64x128xf32>
    %290 = arith.select %287, %285, %289 : vector<64x128xi1>, vector<64x128xf32>
    %cst_127 = arith.constant dense<0.000000e+00> : vector<64x128xf32>
    %291 = tpu.matmul %252, %290, %cst_127 {dimension_numbers = #tpu.dot_dimension_numbers<[1], [0], [0], [1], [0, 0, 1, 1], [], []>} : vector<64x64xf32>, vector<64x128xf32>, vector<64x128xf32> -> vector<64x128xf32>
    %292 = vector.broadcast %258 : vector<64x1xf32> to vector<64x128xf32>
    %293 = arith.addf %291, %292 : vector<64x128xf32>
    %cst_128 = arith.constant 0.000000e+00 : f32
    %294 = vector.broadcast %cst_128 : f32 to vector<64x128xf32>
    %295 = arith.cmpf ogt, %293, %294 : vector<64x128xf32>
    %cst_129 = arith.constant 0.00999999977 : f32
    %296 = vector.broadcast %cst_129 : f32 to vector<64x128xf32>
    %297 = arith.mulf %296, %293 : vector<64x128xf32>
    %298 = arith.select %295, %293, %297 : vector<64x128xi1>, vector<64x128xf32>
    %cst_130 = arith.constant dense<0.000000e+00> : vector<6x128xf32>
    %299 = tpu.matmul %254, %298, %cst_130 {dimension_numbers = #tpu.dot_dimension_numbers<[1], [0], [0], [1], [0, 0, 1, 1], [], []>} : vector<6x64xf32>, vector<64x128xf32>, vector<6x128xf32> -> vector<6x128xf32>
    %300 = vector.broadcast %260 : vector<6x1xf32> to vector<6x128xf32>
    %301 = arith.addf %299, %300 : vector<6x128xf32>
    %302 = vector.extract_strided_slice %301 {offsets = [0, 0], sizes = [3, 128], strides = [1, 1]} : vector<6x128xf32> to vector<3x128xf32>
    %303 = math.tanh %302 : vector<3x128xf32>
    %304 = vector.extract_strided_slice %301 {offsets = [3, 0], sizes = [3, 128], strides = [1, 1]} : vector<6x128xf32> to vector<3x128xf32>
    %305 = math.exp %303 : vector<3x128xf32>
    %306 = arith.mulf %248, %305 : vector<3x128xf32>
    %307 = arith.addf %306, %304 : vector<3x128xf32>
    %308 = vector.broadcast %264 : vector<3x1xf32> to vector<3x128xf32>
    %309 = arith.mulf %308, %307 : vector<3x128xf32>
    %310 = arith.addf %266, %309 : vector<3x128xf32>
    %c5 = arith.constant 5 : index
    %c0_131 = arith.constant 0 : index
    %c0_132 = arith.constant 0 : index
    %311 = vector.load %arg1[%c5, %c0_131, %c0_132] : memref<6x64x135xf32, #tpu.memory_space<vmem>>, vector<1x64x3xf32>
    %312 = vector.shape_cast %311 : vector<1x64x3xf32> to vector<64x3xf32>
    %c5_133 = arith.constant 5 : index
    %c0_134 = arith.constant 0 : index
    %c3_135 = arith.constant 3 : index
    %313 = vector.load %arg1[%c5_133, %c0_134, %c3_135] : memref<6x64x135xf32, #tpu.memory_space<vmem>>, vector<1x64x64xf32>
    %314 = vector.shape_cast %313 : vector<1x64x64xf32> to vector<64x64xf32>
    %c5_136 = arith.constant 5 : index
    %c0_137 = arith.constant 0 : index
    %c67_138 = arith.constant 67 : index
    %315 = vector.load %arg1[%c5_136, %c0_137, %c67_138] : memref<6x64x135xf32, #tpu.memory_space<vmem>>, vector<1x6x64xf32>
    %316 = vector.shape_cast %315 : vector<1x6x64xf32> to vector<6x64xf32>
    %c5_139 = arith.constant 5 : index
    %c0_140 = arith.constant 0 : index
    %c131_141 = arith.constant 131 : index
    %317 = vector.load %arg1[%c5_139, %c0_140, %c131_141] : memref<6x64x135xf32, #tpu.memory_space<vmem>>, vector<1x64x1xf32>
    %318 = vector.shape_cast %317 : vector<1x64x1xf32> to vector<64x1xf32>
    %c5_142 = arith.constant 5 : index
    %c0_143 = arith.constant 0 : index
    %c132_144 = arith.constant 132 : index
    %319 = vector.load %arg1[%c5_142, %c0_143, %c132_144] : memref<6x64x135xf32, #tpu.memory_space<vmem>>, vector<1x64x1xf32>
    %320 = vector.shape_cast %319 : vector<1x64x1xf32> to vector<64x1xf32>
    %c5_145 = arith.constant 5 : index
    %c0_146 = arith.constant 0 : index
    %c133_147 = arith.constant 133 : index
    %321 = vector.load %arg1[%c5_145, %c0_146, %c133_147] : memref<6x64x135xf32, #tpu.memory_space<vmem>>, vector<1x6x1xf32>
    %322 = vector.shape_cast %321 : vector<1x6x1xf32> to vector<6x1xf32>
    %c5_148 = arith.constant 5 : index
    %c0_149 = arith.constant 0 : index
    %c134_150 = arith.constant 134 : index
    %323 = vector.load %arg1[%c5_148, %c0_149, %c134_150] : memref<6x64x135xf32, #tpu.memory_space<vmem>>, vector<1x3x1xf32>
    %324 = vector.shape_cast %323 : vector<1x3x1xf32> to vector<3x1xf32>
    %cst_151 = arith.constant 1.000000e+00 : f32
    %325 = vector.broadcast %cst_151 : f32 to vector<3x1xf32>
    %326 = arith.subf %325, %324 : vector<3x1xf32>
    %327 = vector.broadcast %324 : vector<3x1xf32> to vector<3x128xf32>
    %328 = arith.mulf %310, %327 : vector<3x128xf32>
    %329 = vector.extract_strided_slice %312 {offsets = [0, 0], sizes = [64, 1], strides = [1, 1]} : vector<64x3xf32> to vector<64x1xf32>
    %330 = vector.extract_strided_slice %328 {offsets = [0, 0], sizes = [1, 128], strides = [1, 1]} : vector<3x128xf32> to vector<1x128xf32>
    %331 = vector.broadcast %329 : vector<64x1xf32> to vector<64x128xf32>
    %332 = vector.broadcast %330 : vector<1x128xf32> to vector<64x128xf32>
    %333 = arith.mulf %331, %332 : vector<64x128xf32>
    %334 = vector.broadcast %318 : vector<64x1xf32> to vector<64x128xf32>
    %335 = arith.addf %334, %333 : vector<64x128xf32>
    %336 = vector.extract_strided_slice %312 {offsets = [0, 1], sizes = [64, 1], strides = [1, 1]} : vector<64x3xf32> to vector<64x1xf32>
    %337 = vector.extract_strided_slice %328 {offsets = [1, 0], sizes = [1, 128], strides = [1, 1]} : vector<3x128xf32> to vector<1x128xf32>
    %338 = vector.broadcast %336 : vector<64x1xf32> to vector<64x128xf32>
    %339 = vector.broadcast %337 : vector<1x128xf32> to vector<64x128xf32>
    %340 = arith.mulf %338, %339 : vector<64x128xf32>
    %341 = arith.addf %335, %340 : vector<64x128xf32>
    %342 = vector.extract_strided_slice %312 {offsets = [0, 2], sizes = [64, 1], strides = [1, 1]} : vector<64x3xf32> to vector<64x1xf32>
    %343 = vector.extract_strided_slice %328 {offsets = [2, 0], sizes = [1, 128], strides = [1, 1]} : vector<3x128xf32> to vector<1x128xf32>
    %344 = vector.broadcast %342 : vector<64x1xf32> to vector<64x128xf32>
    %345 = vector.broadcast %343 : vector<1x128xf32> to vector<64x128xf32>
    %346 = arith.mulf %344, %345 : vector<64x128xf32>
    %347 = arith.addf %341, %346 : vector<64x128xf32>
    %cst_152 = arith.constant 0.000000e+00 : f32
    %348 = vector.broadcast %cst_152 : f32 to vector<64x128xf32>
    %349 = arith.cmpf ogt, %347, %348 : vector<64x128xf32>
    %cst_153 = arith.constant 0.00999999977 : f32
    %350 = vector.broadcast %cst_153 : f32 to vector<64x128xf32>
    %351 = arith.mulf %350, %347 : vector<64x128xf32>
    %352 = arith.select %349, %347, %351 : vector<64x128xi1>, vector<64x128xf32>
    %cst_154 = arith.constant dense<0.000000e+00> : vector<64x128xf32>
    %353 = tpu.matmul %314, %352, %cst_154 {dimension_numbers = #tpu.dot_dimension_numbers<[1], [0], [0], [1], [0, 0, 1, 1], [], []>} : vector<64x64xf32>, vector<64x128xf32>, vector<64x128xf32> -> vector<64x128xf32>
    %354 = vector.broadcast %320 : vector<64x1xf32> to vector<64x128xf32>
    %355 = arith.addf %353, %354 : vector<64x128xf32>
    %cst_155 = arith.constant 0.000000e+00 : f32
    %356 = vector.broadcast %cst_155 : f32 to vector<64x128xf32>
    %357 = arith.cmpf ogt, %355, %356 : vector<64x128xf32>
    %cst_156 = arith.constant 0.00999999977 : f32
    %358 = vector.broadcast %cst_156 : f32 to vector<64x128xf32>
    %359 = arith.mulf %358, %355 : vector<64x128xf32>
    %360 = arith.select %357, %355, %359 : vector<64x128xi1>, vector<64x128xf32>
    %cst_157 = arith.constant dense<0.000000e+00> : vector<6x128xf32>
    %361 = tpu.matmul %316, %360, %cst_157 {dimension_numbers = #tpu.dot_dimension_numbers<[1], [0], [0], [1], [0, 0, 1, 1], [], []>} : vector<6x64xf32>, vector<64x128xf32>, vector<6x128xf32> -> vector<6x128xf32>
    %362 = vector.broadcast %322 : vector<6x1xf32> to vector<6x128xf32>
    %363 = arith.addf %361, %362 : vector<6x128xf32>
    %364 = vector.extract_strided_slice %363 {offsets = [0, 0], sizes = [3, 128], strides = [1, 1]} : vector<6x128xf32> to vector<3x128xf32>
    %365 = math.tanh %364 : vector<3x128xf32>
    %366 = vector.extract_strided_slice %363 {offsets = [3, 0], sizes = [3, 128], strides = [1, 1]} : vector<6x128xf32> to vector<3x128xf32>
    %367 = math.exp %365 : vector<3x128xf32>
    %368 = arith.mulf %310, %367 : vector<3x128xf32>
    %369 = arith.addf %368, %366 : vector<3x128xf32>
    %370 = vector.broadcast %326 : vector<3x1xf32> to vector<3x128xf32>
    %371 = arith.mulf %370, %369 : vector<3x128xf32>
    %372 = arith.addf %328, %371 : vector<3x128xf32>
    %c0_158 = arith.constant 0 : index
    %c0_159 = arith.constant 0 : index
    %373 = vector.load %arg3[%c0_158, %c0_159] : memref<3x128xf32, #tpu.memory_space<vmem>>, vector<3x128xf32>
    tpu.vector_store %arg3[%c0_158, %c0_159], %372 {strides = array<i32>} : memref<3x128xf32, #tpu.memory_space<vmem>>, vector<3x128xf32>,
    return
  }
  func.func @transform_0(%arg0: i32) -> (i32, i32, i32) {
    %c0_i32 = arith.constant 0 : i32
    %c0_i32_0 = arith.constant 0 : i32
    %c0_i32_1 = arith.constant 0 : i32
    %c0_i32_2 = arith.constant 0 : i32
    return %c0_i32, %c0_i32_0, %c0_i32_1 : i32, i32, i32
  }
  func.func @transform_1(%arg0: i32) -> (i32, i32) {
    %c0_i32 = arith.constant 0 : i32
    %c0_i32_0 = arith.constant 0 : i32
    return %c0_i32, %arg0 : i32, i32
  }
  func.func @transform_2(%arg0: i32) -> (i32, i32) {
    %c0_i32 = arith.constant 0 : i32
    %c0_i32_0 = arith.constant 0 : i32
    return %c0_i32, %arg0 : i32, i32
  }
}

</mosaic_0001>

<bundles_post_ra>
// kernel: tpu_custom_call.1
= control target key start
LH: loop header
LB: loop body
LE: loop exit
PB: predicated region body
PF: predicated region fallthrough
CT: control target
= control target key end

     0   :  { %7 = vsyncpa [#allocation3], 0  ;;  %s5736_s0 = inlined_call_operand.hbm [shape: f32[6,64,135], index: 0, kind: input, shape index: {}]   ;;  %s5737_s1 = inlined_call_operand.hbm [shape: f32[3,256], index: 1, kind: input, shape index: {}]   ;;  %s5738_s2 = inlined_call_operand.hbm [shape: f32[3,256], index: 2, kind: output, shape index: {}]  }
   0x1   :  { %8 = vsyncpa [#allocation6], 0 }
   0x2   :  { %10 = vsyncpa [#allocation6 + $0x1], 0 }
   0x3   :  { %11 = vsyncpa [#allocation4], 0 }
   0x4   :  { %13 = vsyncpa [#allocation4 + $0x1], 0  ;;  %s4624_s9 = smov 0   ;;  %s4626_s10 = smov 0  }
   0x5   :  { %s4628_s11 = smov 0   ;;  %s4630_s12 = smov 0  }
   0x6 LB: > { %s4645_s13 = sadd.s32 4294967295, %s4590_s12   ;;  %s3549_s14 = sadd.s32 4294967294, %s4590_s12   ;;  %s4590_s12 = sphi %s4630_s12, %s5758_s12   ;;  %s4586_s11 = sphi %s4628_s11, %s5757_s11   ;;  %s4582_s10 = sphi %s4626_s10, %s5756_s10   ;;  %s4578_s9 = sphi %s4624_s9, %s5755_s9  }
   0x7   : > { %p60_p0 = scmp.ne.s32.totalorder %s4582_s10, %s4578_s9  ;;  %p5739_p1 = scmp.eq.s32.totalorder %s4645_s13, 0 }
   0x8   : > { %p90_p3 = scmp.eq.s32.totalorder %s3549_s14, 1  ;;  %p3550_p5 = scmp.ge.s32.totalorder %s4590_s12, 1 }
   0x9   : > { %p4654_p4 = por %p5739_p1, %p60_p0  ;;  %p97_p7 = scmp.lt.s32.totalorder %s4590_s12, 3 }
   0xa   : > { %p4659_p6 = por %p90_p3, %p60_p0  ;;  %s4592_s18 = smov [#allocation2]  }
   0xb   : > { %s5742_s15 = scalar_select %p4654_p4, 1, 0 }
   0xc   : > { %s5743_s16 = scalar_select %p4659_p6, 1, 0 }
   0xd   : > { %p4664_p8 = pnand %p3550_p5, %p97_p7  ;;  %s109_s19 = sshll.u32 %s4592_s18, 4  ;;  %s4668_s19 = int_to_ptr.vmem [resolvable:$true] %s109_s19 }
   0xe   : > { %s4680_s21 = sadd.s32 1, %s4590_s12   ;;  %s47_s22 = sadd.s32 1, %s4586_s11 }
   0xf   : > { %s5744_s17 = scalar_select %p4664_p8, 1, 0 }
  0x10   : > { %p4225_p9 = pneg %p4664_p8  ;;  %s44_s23 = ssub.s32 %s4590_s12, %s4680_s21 }
  0x11   : > { %s4462_s26 = scalar_lea.hbm %s5736_s0, 12288 }
  0x12   : > { %p4675_p11 = pnand %p4225_p9, %p5739_p1  ;;  %p4463_p12 = scmp.ne.s32.totalorder %s5736_s0, %s4462_s26 }
  0x13   : > { %p4469_p5 = scmp.lt.u32.totalorder %s4462_s26, %s5736_s0 }
  0x14   : > { %p4464_p13 = pneg %p4675_p11 }
  0x16   : > { %p4465_p0 = pnand %p4464_p13, %p4463_p12 }
  0x18   : > { %p4466_p3 = pneg %p4465_p0 }
  0x1a   : > { %p4471_p7 = pnand %p4469_p5, %p4466_p3 }
  0x1c   : > { %4474 = shalt.err (!%p4471_p7)
}
  0x1d   : > { %s4475_s3 = scalar_lea.vmem %s4668_s19, 12288  ;;  %p4483_p2 = scmp.lt.s32.totalorder %s4668_s19, %s4668_s19 }
  0x1e   : > { %p4476_p9 = scmp.ne.s32.totalorder %s4668_s19, %s4475_s3  ;;  %p4484_p6 = scmp.lt.s32.totalorder %s4475_s3, %s4475_s3 }
  0x20   : > { %p4478_p10 = pnand %p4476_p9, %p4464_p13  ;;  %p4485_p4 = por %p4484_p6, %p4483_p2 }
  0x22   : > { %p4479_p1 = pneg %p4478_p10 }
  0x24   : > { %p4486_p8 = pnand %p4485_p4, %p4479_p1 }
  0x26   : > { %4489 = shalt.err (!%p4486_p8)
}
  0x27   : > { %s4593_s4 = smov 256   ;;  %s4594_s5 = smov 16  }
  0x28   : > { %4228 = dma.hbm_to_vmem [thread:$0]  (!%p4675_p11), %s5736_s0, 12288, %s4668_s19, [#allocation3], %s4593_s4, %s4593_s4, %s4594_s5  }
  0x29   : > { %p45_p2 = scmp.eq.s32.totalorder %s44_s23, 0  ;;  %p54_p1 = scmp.ne.s32.totalorder %s4586_s11, %s4582_s10 }
  0x2a   : > { %p55_p4 = scmp.eq.s32.totalorder %s4590_s12, 0  ;;  %p4238_p6 = scmp.lt.s32.totalorder %s4590_s12, 2 }
  0x2b   : > { %s4711_s8 = scalar_select %p45_p2, %s4586_s11, %s47_s22  }
  0x2c   : > { %p56_p8 = por %p55_p4, %p54_p1  ;;  %p5746_p10 = scmp.eq.s32.totalorder %s4645_s13, 1 }
  0x2d   : > { %s123_s18 = sand.u32 1, %s4586_s11   ;;  %s3554_s24 = sshll.u32 %s4590_s12, 6 }
  0x2e   : > { %p4715_p12 = por %p5746_p10, %p54_p1  ;;  %s3553_s25 = sshll.u32 %s123_s18, 2 }
  0x2f   : > { %s4724_s27 = scalar_lea.hbm %s5737_s1, %s3554_s24  ;;  %s127_s19 = scalar_lea.vmem [#allocation5], %s3553_s25 }
  0x30   : > { %s134_s22 = sshll.u32 %s127_s19, 4  ;;  %p4726_p11 = pnand %p4238_p6, %p56_p8  ;;  %s4730_s22 = int_to_ptr.vmem [resolvable:$true] %s134_s22 }
  0x31   : > { %s124_s28 = scalar_lea.sflag [#allocation6], %s123_s18  ;;  %s4490_s29 = scalar_lea.hbm %s4724_s27, 64 }
  0x32   : > { %p4491_p13 = scmp.ne.s32.totalorder %s4724_s27, %s4490_s29  ;;  %p4492_p0 = pneg %p4726_p11 }
  0x33   : > { %s4495_s4 = scalar_lea.hbm %s5737_s1, 128  ;;  %p4496_p7 = scmp.lt.u32.totalorder %s4724_s27, %s5737_s1 }
  0x34   : > { %p4493_p3 = pnand %p4492_p0, %p4491_p13  ;;  %p4497_p9 = scmp.lt.u32.totalorder %s4495_s4, %s4490_s29 }
  0x35   : > { %p4499_p1 = scmp.lt.u32.totalorder %s4490_s29, %s4724_s27 }
  0x36   : > { %p4494_p5 = pneg %p4493_p3  ;;  %p4498_p2 = por %p4497_p9, %p4496_p7 }
  0x38   : > { %p4500_p4 = por %p4499_p1, %p4498_p2 }
  0x3a   : > { %p4501_p6 = pnand %p4500_p4, %p4494_p5 }
  0x3c   : > { %4504 = shalt.err (!%p4501_p6)
}
  0x3d   : > { %s4505_s7 = scalar_lea.vmem %s4730_s22, 64  ;;  %s4595_s18 = smov [#allocation5]  }
  0x3e   : > { %p4506_p8 = scmp.ne.s32.totalorder %s4730_s22, %s4505_s7  ;;  %s4510_s24 = sshll.u32 %s4595_s18, 4  ;;  %s4511_s24 = int_to_ptr.vmem [resolvable:$false] %s4510_s24 }
  0x3f   : > { %s4512_s25 = scalar_lea.vmem %s4511_s24, 128  ;;  %p4513_p3 = scmp.lt.s32.totalorder %s4730_s22, %s4511_s24 }
  0x40   : > { %p4508_p10 = pnand %p4506_p8, %p4492_p0  ;;  %p4514_p7 = scmp.lt.s32.totalorder %s4512_s25, %s4505_s7 }
  0x42   : > { %p4509_p13 = pneg %p4508_p10  ;;  %p4515_p9 = por %p4514_p7, %p4513_p3 }
  0x44   : > { %p4516_p2 = pnand %p4515_p9, %p4509_p13 }
  0x46   : > { %4519 = shalt.err (!%p4516_p2)
}
  0x47   : > { %4232 = dma.hbm_to_vmem [thread:$0]  (!%p4726_p11), %s4724_s27, 64, %s4730_s22, %s124_s28  }
  0x48   : > { %p5749_p5 = scmp.ne.s32.totalorder %s5744_s17, 0 }
  0x49   : > { %p5750_p0 = scmp.eq.s32.totalorder (!%p5749_p5), %s4645_s13, 0 }
  0x4a   : > { %143 = sbr.rel (%p5749_p5) target bundleno = 3411 (0xd53), region = 28 }
  0x51   : > { %4565 = dma.done.wait (%p5750_p0), [#allocation3], 12288   ;;  %p5751_p1 = pmov %p5750_p0 }
  0x52   : > { %s4764_s20 = sand.u32 1, %s4582_s10   ;;  %p5752_p11 = scmp.ne.s32.totalorder %s5742_s15, 0 }
  0x53   : > { %4567 = vsyncadd (%p5751_p1), [#allocation3], 4294955008  ;;  %s3557_s26 = sshll.u32 %s4764_s20, 2  ;;  %s150_s19 = scalar_lea.sflag [#allocation6], %s4764_s20 }
  0x54   : > { %s4770_s27 = scalar_lea.vmem [#allocation5], %s3557_s26 }
  0x55   : > { %4569 = dma.done.wait (%p5752_p11), %s150_s19, 64  }
  0x56   : > { %4571 = vsyncadd (%p5752_p11), %s150_s19, 4294967232  ;;  %v4596_v0 = vmov 0   ;;  %v4597_v1 = vmov 6   ;;  %v4778_v2 = vld [vmem:[#allocation2 + $0x8] sm:$0x7]  ;;  %v4780_v3 = vld [vmem:[#allocation2 + $0x10] sm:$0xff]  ;;  %v241_v29 = vlaneseq }
  0x57   : > { %4289 = vset.pattern.permute.xlu1 %v4596_v0  ;;  %4288 = vset.pattern.permute.xlu0 %v4597_v1  ;;  %v4784_v4 = vld [vmem:[#allocation2 + $0x28] sm:$0xff]  ;;  %v4598_v6 = vmov 3   ;;  %v4792_v7 = vld [vmem:[#allocation2 + $0x58] sm:$0xff]  ;;  %v175_v9 = vld [vmem:[#allocation2] sm:$0xff]  ;;  %v4599_v10 = vmov 1   ;;  %v4600_v14 = vmov 2  }
  0x58   : > { %197 = vperm.xlu0 %4288, %v4778_v2   ;;  %208 = vperm.xlu1 %4289, %v4780_v3   ;;  %v4786_v5 = vld [vmem:[#allocation2 + $0x8] sm:$0xff]  ;;  %v4794_v8 = vld [vmem:[#allocation2 + $0x18] sm:$0xff]  ;;  %v178_v11 = vld [vmem:[#allocation2 + $0x30] sm:$0xff]  ;;  %s4601_s15 = smov 125   ;;  %v4602_v22 = vmov 4   ;;  %v194_v32 = vsub.f32 1.0, %v4778_v2 }
  0x59   : > { %v177_v12 = vld [vmem:[#allocation2 + $0x20] sm:$0xff]  ;;  %v188_v15 = vld [vmem:[#allocation2 + $0x38] sm:$0xff]  ;;  %v180_v17 = vld [vmem:[#allocation2 + $0x50] sm:$0xff]  ;;  %s4603_s17 = smov 61   ;;  %v242_v33 = vshrl.u32 %v241_v29, 7  ;;  %vm477_vm6 = vcmask 523264  }
  0x5a   : > { %v181_v13 = vld [vmem:[#allocation2 + $0x60] sm:$0xff]  ;;  %v182_v18 = vld [vmem:[#allocation2 + $0x70] sm:$0xff]  ;;  %v189_v19 = vld [vmem:[#allocation2 + $0x48] sm:$0xff]  ;;  %vm4605_vm9 = vmmov 0   ;;  %s3614_s22 = sshll.u32 %s4645_s13, 6  ;;  %s173_s23 = scalar_lea.vmem [#allocation7], %s3557_s26 }
  0x5b   : > { %v179_v16 = vld [vmem:[#allocation2 + $0x40] sm:$0xff]  ;;  %v191_v20 = vld [vmem:[#allocation2 + $0x68] sm:$0xff]  ;;  %v192_v21 = vld [vmem:[#allocation2 + $0x78] sm:$0xff]  ;;  %v4844_v37 = vsub.s32 0, %v242_v33  ;;  %v4846_v38 = vsub.s32 1, %v242_v33  ;;  %v4860_v44 = vsub.s32 2, %v242_v33  ;;  %s5692_s3 = scalar_lea.hbm %s5738_s2, %s3614_s22 }
  0x5c   : > { %4294 = vset.pattern.permute.xlu0 %v4598_v6  ;;  %4290 = vset.pattern.permute.xlu1 %v4598_v6  ;;  %v4832_v27 = vld [vmem:[#allocation2 + $0x8] sm:$0x3f]  ;;  %v183_v28 = vld [vmem:[#allocation2] sm:$0x3f]  ;;  %s3467_s28 = sshll.u32 %s173_s23, 4  ;;  %s3454_s4 = scalar_lea.sflag [#allocation4], %s4764_s20  ;;  %s5694_s28 = int_to_ptr.vmem [resolvable:$true] %s3467_s28 }
  0x5d   : > { %265 = vperm.xlu0 %4294, %v4784_v4   ;;  %255 = vperm.xlu1 %4290, %v4786_v5   ;;  %v4842_v34 = vld [vmem:[%s4770_s27] sm:$0x7]  ;;  %s4520_s5 = scalar_lea.vmem %s5694_s28, 64  ;;  %s4608_s13 = smov [#allocation7]  }
  0x5e   : > { %p4521_p4 = scmp.ne.s32.totalorder %s5694_s28, %s4520_s5  ;;  %s4524_s6 = sshll.u32 %s4608_s13, 4  ;;  %s4525_s6 = int_to_ptr.vmem [resolvable:$false] %s4524_s6 }
  0x5f   : > { %s4526_s7 = scalar_lea.vmem %s4525_s6, 128  ;;  %p4527_p10 = scmp.lt.s32.totalorder %s5694_s28, %s4525_s6 }
  0x60   : > { %p4522_p6 = pnand %p4521_p4, %p4715_p12  ;;  %p4528_p13 = scmp.lt.s32.totalorder %s4526_s7, %s4520_s5 }
  0x61   : > { %280 = vperm.xlu0 %4294, %v4792_v7   ;;  %260 = vperm.xlu1 %4290, %v4794_v8  }
  0x62   : > { %p4523_p8 = pneg %p4522_p6  ;;  %p4529_p3 = por %p4528_p13, %p4527_p10 }
  0x64   : > { %p4530_p7 = pnand %p4529_p3, %p4523_p8 }
  0x65   : > { %4300 = vset.pattern.permute.xlu0 %v4596_v0  ;;  %4291 = vset.pattern.permute.xlu1 %v4599_v10 }
  0x66   : > { %306 = vperm.xlu1 %4291, %v4780_v3   ;;  %203 = vperm.xlu0 %4300, %v175_v9  }
  0x6a   : > { %4292 = vset.pattern.permute.xlu1 %v4596_v0  ;;  %218 = vperm.xlu0 %4300, %v178_v11  }
  0x6b   : > { %213 = vperm.xlu1 %4292, %v177_v12  }
  0x6e   : > { %233 = vperm.xlu0 %4300, %v181_v13  }
  0x6f   : > { %4293 = vset.pattern.permute.xlu1 %v4600_v14 }
  0x70   : > { %354 = vperm.xlu1 %4293, %v175_v9  }
  0x72   : > { %4302 = vset.pattern.permute.xlu0 %v4599_v10 }
  0x73   : > { %302 = vperm.xlu0 %4302, %v175_v9  }
  0x74   : > { %358 = vperm.xlu1 %4293, %v4780_v3  }
  0x77   : > { %314 = vperm.xlu0 %4302, %v178_v11  }
  0x78   : > { %4295 = vset.pattern.permute.xlu1 %v4598_v6 }
  0x79   : > { %270 = vperm.xlu1 %4295, %v188_v15  }
  0x7b   : > { %326 = vperm.xlu0 %4302, %v181_v13  }
  0x7d   : > { %4296 = vset.pattern.permute.xlu1 %v4599_v10 }
  0x7e   : > { %310 = vperm.xlu1 %4296, %v177_v12  }
  0x7f   : > { %4306 = vset.pattern.permute.xlu0 %v4600_v14 }
  0x80   : > { %362 = vperm.xlu0 %4306, %v177_v12  }
  0x82   : > { %4297 = vset.pattern.permute.xlu1 %v4596_v0 }
  0x83   : > { %223 = vperm.xlu1 %4297, %v179_v16  }
  0x84   : > { %374 = vperm.xlu0 %4306, %v180_v17  }
  0x87   : > { %228 = vperm.xlu1 %4297, %v180_v17  }
  0x88   : > { %382 = vperm.xlu0 %4306, %v182_v18  }
  0x8b   : > { %4298 = vset.pattern.permute.xlu1 %v4600_v14 }
  0x8c   : > { %366 = vperm.xlu1 %4298, %v178_v11   ;;  %465 = vrot.lane.b32.xlu0 %v177_v12, %s4601_s15 }
  0x8d   : > { %4309 = vset.pattern.permute.xlu0 %v4602_v22 }
  0x90   : > { %4299 = vset.pattern.permute.xlu1 %v4598_v6  ;;  %469 = vrot.lane.b32.xlu0 %v179_v16, %s4601_s15 }
  0x91   : > { %275 = vperm.xlu1 %4299, %v189_v19  }
  0x94   : > { %473 = vrot.lane.b32.xlu0 %v181_v13, %s4601_s15 }
  0x95   : > { %4301 = vset.pattern.permute.xlu1 %v4599_v10 }
  0x96   : > { %318 = vperm.xlu1 %4301, %v179_v16  }
  0x98   : > { %430 = vperm.xlu0 %4309, %v4786_v5  }
  0x9a   : > { %322 = vperm.xlu1 %4301, %v180_v17  }
  0x9c   : > { %442 = vperm.xlu0 %4309, %v188_v15  }
  0x9e   : > { %4303 = vset.pattern.permute.xlu1 %v4596_v0 }
  0x9f   : > { %238 = vperm.xlu1 %4303, %v182_v18  }
  0xa0   : > { %450 = vperm.xlu0 %4309, %v4792_v7  }
  0xa3   : > { %4304 = vset.pattern.permute.xlu1 %v4600_v14 }
  0xa4   : > { %370 = vperm.xlu1 %4304, %v179_v16   ;;  %458 = vperm.xlu0 %4309, %v192_v21  }
  0xa8   : > { %4305 = vset.pattern.permute.xlu1 %v4598_v6  ;;  %631 = vrot.lane.b32.xlu0 %v4832_v27, %s4603_s17 }
  0xa9   : > { %285 = vperm.xlu1 %4305, %v191_v20   ;;  %4312 = vset.pattern.permute.xlu0 %v4597_v1 }
  0xac   : > { %717 = vperm.xlu0 %4312, %v194_v32  }
  0xad   : > { %290 = vperm.xlu1 %4305, %v192_v21  }
  0xb0   : > { %4319 = vset.pattern.permute.xlu0 %v4598_v6 }
  0xb1   : > { %4307 = vset.pattern.permute.xlu1 %v4599_v10 }
  0xb2   : > { %330 = vperm.xlu1 %4307, %v182_v18  }
  0xb6   : > { %4308 = vset.pattern.permute.xlu1 %v4600_v14 }
  0xb7   : > { %378 = vperm.xlu1 %4308, %v181_v13  }
  0xbb   : > { %461 = vrot.lane.b32.xlu1 %v175_v9, %s4601_s15 }
  0xbc   : > { %4310 = vset.pattern.permute.xlu1 %v4602_v22 }
  0xbf   : > { %463 = vrot.lane.b32.xlu1 %v4780_v3, %s4601_s15 }
  0xc3   : > { %467 = vrot.lane.b32.xlu1 %v178_v11, %s4601_s15 }
  0xc7   : > { %471 = vrot.lane.b32.xlu1 %v180_v17, %s4601_s15 }
  0xcb   : > { %475 = vrot.lane.b32.xlu1 %v182_v18, %s4601_s15 }
  0xcf   : > { %434 = vperm.xlu1 %4310, %v4794_v8  }
  0xd3   : > { %438 = vperm.xlu1 %4310, %v4784_v4  }
  0xd7   : > { %v209_v23 = vpop.permute.xlu1 %208  ;;  %v198_v24 = vpop.permute.xlu0 %197  ;;  %446 = vperm.xlu1 %4310, %v189_v19  }
  0xd8   : > { %v4849_v39 = vmul.f32 %v198_v24, %v4842_v34 }
  0xda   : > { %v4854_v42 = vrot.slane %v4849_v39, %v4844_v37  ;;  %v4858_v43 = vrot.slane %v4849_v39, %v4846_v38  ;;  %v4869_v50 = vrot.slane %v4849_v39, %v4860_v44 }
  0xdb   : > { %454 = vperm.xlu1 %4310, %v191_v20  }
  0xdc   : > { %v256_v25 = vpop.permute.xlu1 %255  ;;  %v266_v26 = vpop.permute.xlu0 %265  ;;  %v246_v48 = vmul.f32 %v4854_v42, %v209_v23 }
  0xdf   : > { %629 = vrot.lane.b32.xlu1 %v183_v28, %s4603_s17 }
  0xe0   : > { %v261_v30 = vpop.permute.xlu1 %260  ;;  %v4834_v31 = vpop.permute.xlu0 %280 }
  0xe1   : > { %v294_v51 = vadd.f32 %v261_v30, %v246_v48 }
  0xe5   : > { %v307_v35 = vpop.permute.xlu1 %306  ;;  %v204_v36 = vpop.permute.xlu0 %203 }
  0xe6   : > { %v245_v46 = vmul.f32 %v4854_v42, %v204_v36  ;;  %v338_v49 = vmul.f32 %v4858_v43, %v307_v35 }
  0xe8   : > { %v293_v53 = vadd.f32 %v256_v25, %v245_v46  ;;  %v346_v56 = vadd.f32 %v338_v49, %v294_v51 }
  0xe9   : > { %v219_v40 = vpop.permute.xlu0 %218 }
  0xea   : > { %v214_v41 = vpop.permute.xlu1 %213  ;;  %v248_v17 = vmul.f32 %v4854_v42, %v219_v40 }
  0xeb   : > { %v247_v11 = vmul.f32 %v4854_v42, %v214_v41 }
  0xed   : > { %v4862_v45 = vpop.permute.xlu0 %233  ;;  %v295_v16 = vadd.f32 %v266_v26, %v247_v11 }
  0xee   : > { %v251_v11 = vmul.f32 %v4854_v42, %v4862_v45 }
  0xef   : > { %v355_v47 = vpop.permute.xlu1 %354 }
  0xf0   : > { %v389_v58 = vmul.f32 %v4869_v50, %v355_v47 }
  0xf2   : > { %v303_v52 = vpop.permute.xlu0 %302 }
  0xf3   : > { %v337_v54 = vmul.f32 %v4858_v43, %v303_v52  ;;  %v359_v55 = vpop.permute.xlu1 %358 }
  0xf4   : > { %v390_v57 = vmul.f32 %v4869_v50, %v359_v55 }
  0xf5   : > { %v345_v59 = vadd.f32 %v337_v54, %v293_v53 }
  0xf6   : > { %v398_v60 = vadd.f32 %v390_v57, %v346_v56  ;;  %v315_v62 = vpop.permute.xlu0 %314 }
  0xf7   : > { %v397_v61 = vadd.f32 %v389_v58, %v345_v59  ;;  %v340_v21 = vmul.f32 %v4858_v43, %v315_v62 }
  0xf8   : > { %v271_v63 = vpop.permute.xlu1 %270  ;;  %vm406_vm0 = vcmp.gt.f32.partialorder %v398_v60, 0.0  ;;  %v414_v2 = vmul.f32 0.01, %v398_v60 }
  0xf9   : > { %vm405_vm1 = vcmp.gt.f32.partialorder %v397_v61, 0.0  ;;  %v413_v3 = vmul.f32 0.01, %v397_v61  ;;  %v296_v23 = vadd.f32 %v271_v63, %v248_v17 }
  0xfa   : > { %v422_v4 = vsel %vm406_vm0, %v398_v60, %v414_v2  ;;  %v4874_v8 = vpop.permute.xlu0 %326 }
  0xfb   : > { %v421_v5 = vsel %vm405_vm1, %v397_v61, %v413_v3  ;;  %v348_v28 = vadd.f32 %v340_v21, %v296_v23 }
  0xfc   : > { %v4049_v7 = vpack.c.bf16 %v422_v4, %v421_v5 }
  0xfd   : > { %v311_v9 = vpop.permute.xlu1 %310 }
  0xfe   : > { %4050 = vmatprep.subr.bf16.mxu0 %v4049_v7  ;;  %v339_v12 = vmul.f32 %v4858_v43, %v311_v9 }
  0xff   : > { %4052 = vmatpush3.bf16.msra.mxu0 %v4049_v7  ;;  %v363_v15 = vpop.permute.xlu0 %362 }
 0x100   : > { %v347_v18 = vadd.f32 %v339_v12, %v295_v16  ;;  %v391_v19 = vmul.f32 %v4869_v50, %v363_v15 }
 0x102   : > { %v224_v13 = vpop.permute.xlu1 %223  ;;  %v399_v24 = vadd.f32 %v391_v19, %v347_v18 }
 0x103   : > { %v375_v53 = vpop.permute.xlu0 %374  ;;  %v249_v54 = vmul.f32 %v4854_v42, %v224_v13 }
 0x104   : > { %v415_v30 = vmul.f32 0.01, %v399_v24  ;;  %vm407_vm2 = vcmp.gt.f32.partialorder %v399_v24, 0.0  ;;  %v394_v55 = vmul.f32 %v4869_v50, %v375_v53  ;;  %v4921_v53 = vld [vmem:[#allocation2 + $0x90] sm:$0xff] }
 0x106   : > { %v229_v20 = vpop.permute.xlu1 %228  ;;  %v423_v26 = vsel %vm407_vm2, %v399_v24, %v415_v30  ;;  %vm633_vm2 = vcmask 498688  }
 0x107   : > { %v250_v46 = vmul.f32 %v4854_v42, %v229_v20  ;;  %v383_v12 = vpop.permute.xlu0 %382  ;;  %v343_v20 = vmul.f32 %v4858_v43, %v4874_v8 }
 0x108   : > { %v396_v18 = vmul.f32 %v4869_v50, %v383_v12 }
 0x109   : > { %v298_v49 = vadd.f32 %v4834_v31, %v250_v46  ;;  %v4606_v46 = vmov 0.0  }
 0x10a   : > { %3811 = vmatprep.mubr.msk.f32.mxu1 %vm4605_vm9, %v4606_v46 }
 0x10b   : > { %v367_v25 = vpop.permute.xlu1 %366 }
 0x10c   : > { %v392_v29 = vmul.f32 %v4869_v50, %v367_v25 }
 0x10e   : > { %v400_v32 = vadd.f32 %v392_v29, %v348_v28 }
 0x110   : > { %v416_v33 = vmul.f32 0.01, %v400_v32  ;;  %v276_v35 = vpop.permute.xlu1 %275  ;;  %vm408_vm3 = vcmp.gt.f32.partialorder %v400_v32, 0.0 }
 0x111   : > { %v297_v57 = vadd.f32 %v276_v35, %v249_v54  ;;  %v4926_v54 = vld [vmem:[#allocation2 + $0xb0] sm:$0xff] }
 0x112   : > { %v424_v36 = vsel %vm408_vm3, %v400_v32, %v416_v33 }
 0x113   : > { %v4053_v40 = vpack.c.bf16 %v424_v36, %v423_v26  ;;  %v466_v26 = vpop.permute.xlu0 %465 }
 0x115   : > { %v319_v41 = vpop.permute.xlu1 %318  ;;  %4054 = vmatprep.subr.bf16.mxu0 %v4053_v40 }
 0x116   : > { %4056 = vmatpush3.bf16.msra.mxu0 %v4053_v40  ;;  %v341_v56 = vmul.f32 %v4858_v43, %v319_v41  ;;  %v4604_v41 = vmov 0.0|0.0  }
 0x117   : > { %4065 = vmatprep.subr.bf16.mxu1 %v4604_v41 }
 0x118   : > { %v349_v60 = vadd.f32 %v341_v56, %v297_v57  ;;  %v4931_v56 = vld [vmem:[#allocation2 + $0xe0] sm:$0xff] }
 0x119   : > { %v323_v47 = vpop.permute.xlu1 %322  ;;  %v725_v57 = vld [vmem:[#allocation2 + $0xa0] sm:$0xff] }
 0x11a   : > { %v342_v48 = vmul.f32 %v4858_v43, %v323_v47  ;;  %v4607_v47 = vmov 5  }
 0x11b   : > { %4311 = vset.pattern.permute.xlu1 %v4607_v47 }
 0x11c   : > { %v350_v51 = vadd.f32 %v342_v48, %v298_v49  ;;  %625 = vperm.xlu1 %4311, %v4832_v27   ;;  %v4910_v48 = vld [vmem:[#allocation2 + $0xa8] sm:$0xff] }
 0x11d   : > { %v4912_v49 = vld [vmem:[#allocation2 + $0x88] sm:$0x7]  ;;  %813 = vperm.xlu0 %4319, %v4910_v48  }
 0x11e   : > { %v239_v52 = vpop.permute.xlu1 %238  ;;  %v402_v58 = vadd.f32 %v394_v55, %v350_v51  ;;  %v738_v51 = vld [vmem:[#allocation2 + $0xd8] sm:$0xff]  ;;  %v733_v27 = vld [vmem:[#allocation2 + $0x88] sm:$0xff] }
 0x11f   : > { %v252_v9 = vmul.f32 %v4854_v42, %v239_v52  ;;  %v4917_v52 = vld [vmem:[#allocation2 + $0x80] sm:$0xff]  ;;  %v4929_v55 = vld [vmem:[#allocation2 + $0x98] sm:$0xff] }
 0x120   : > { %v418_v63 = vmul.f32 0.01, %v402_v58  ;;  %vm410_vm4 = vcmp.gt.f32.partialorder %v402_v58, 0.0  ;;  %4313 = vset.pattern.permute.xlu1 %v4597_v1 }
 0x121   : > { %745 = vperm.xlu1 %4313, %v4912_v49   ;;  %828 = vperm.xlu0 %4319, %v738_v51  }
 0x122   : > { %v426_v4 = vsel %vm410_vm4, %v402_v58, %v418_v63  ;;  %v736_v58 = vld [vmem:[#allocation2 + $0xb8] sm:$0xff] }
 0x123   : > { %v371_v59 = vpop.permute.xlu1 %370  ;;  %v740_v63 = vld [vmem:[#allocation2 + $0xf8] sm:$0xff] }
 0x124   : > { %v393_v61 = vmul.f32 %v4869_v50, %v371_v59  ;;  %v4946_v59 = vld [vmem:[#allocation2 + $0xd0] sm:$0xff] }
 0x125   : > { %4314 = vset.pattern.permute.xlu1 %v4596_v0  ;;  %4325 = vset.pattern.permute.xlu0 %v4596_v0 }
 0x126   : > { %v401_v62 = vadd.f32 %v393_v61, %v349_v60  ;;  %751 = vperm.xlu1 %4314, %v4917_v52   ;;  %756 = vperm.xlu0 %4325, %v4921_v53   ;;  %v4950_v60 = vld [vmem:[#allocation2 + $0xf0] sm:$0xff]  ;;  %v727_v61 = vld [vmem:[#allocation2 + $0xc0] sm:$0xff] }
 0x128   : > { %v417_v2 = vmul.f32 0.01, %v401_v62  ;;  %v286_v31 = vpop.permute.xlu1 %285  ;;  %vm409_vm5 = vcmp.gt.f32.partialorder %v401_v62, 0.0 }
 0x129   : > { %v299_v17 = vadd.f32 %v286_v31, %v251_v11 }
 0x12a   : > { %v425_v3 = vsel %vm409_vm5, %v401_v62, %v417_v2  ;;  %4315 = vset.pattern.permute.xlu1 %v4598_v6  ;;  %766 = vperm.xlu0 %4325, %v4926_v54   ;;  %v4963_v62 = vld [vmem:[#allocation2 + $0xc8] sm:$0xff] }
 0x12b   : > { %v4057_v5 = vpack.c.bf16 %v426_v4, %v425_v3  ;;  %v351_v24 = vadd.f32 %v343_v20, %v299_v17  ;;  %803 = vperm.xlu1 %4315, %v733_v27   ;;  %v4973_v2 = vld [vmem:[#allocation2 + $0xe8] sm:$0xff] }
 0x12c   : > { %v291_v7 = vpop.permute.xlu1 %290 }
 0x12d   : > { %4058 = vmatprep.subr.bf16.mxu0 %v4057_v5  ;;  %v300_v15 = vadd.f32 %v291_v7, %v252_v9 }
 0x12e   : > { %4060 = vmatpush3.bf16.msra.mxu0 %v4057_v5  ;;  %781 = vperm.xlu0 %4325, %v4931_v56  }
 0x12f   : > { %808 = vperm.xlu1 %4315, %v4929_v55  }
 0x131   : > { %v331_v13 = vpop.permute.xlu1 %330 }
 0x132   : > { %v344_v16 = vmul.f32 %v4858_v43, %v331_v13  ;;  %4327 = vset.pattern.permute.xlu0 %v4599_v10 }
 0x133   : > { %4316 = vset.pattern.permute.xlu1 %v4599_v10  ;;  %850 = vperm.xlu0 %4327, %v4917_v52  }
 0x134   : > { %v352_v19 = vadd.f32 %v344_v16, %v300_v15  ;;  %854 = vperm.xlu1 %4316, %v4921_v53  }
 0x136   : > { %v404_v21 = vadd.f32 %v396_v18, %v352_v19  ;;  %v379_v23 = vpop.permute.xlu1 %378 }
 0x137   : > { %v395_v25 = vmul.f32 %v4869_v50, %v379_v23  ;;  %v470_v50 = vpop.permute.xlu0 %469  ;;  %862 = vperm.xlu0 %4327, %v4926_v54  }
 0x138   : > { %v420_v42 = vmul.f32 0.01, %v404_v21  ;;  %vm412_vm7 = vcmp.gt.f32.partialorder %v404_v21, 0.0  ;;  %4317 = vset.pattern.permute.xlu1 %v4596_v0 }
 0x139   : > { %v403_v28 = vadd.f32 %v395_v25, %v351_v24  ;;  %761 = vperm.xlu1 %4317, %v725_v57  }
 0x13a   : > { %v462_v45 = vpop.permute.xlu1 %461  ;;  %v428_v32 = vsel %vm412_vm7, %v404_v21, %v420_v42 }
 0x13b   : > { %v419_v29 = vmul.f32 0.01, %v403_v28  ;;  %vm411_vm8 = vcmp.gt.f32.partialorder %v403_v28, 0.0  ;;  %3783 = vmatprep.mubr.msk.f32.mxu0 %vm477_vm6, %v462_v45  ;;  %v474_v36 = vpop.permute.xlu0 %473  ;;  %874 = vperm.xlu0 %4327, %v4931_v56  }
 0x13d   : > { %v427_v30 = vsel %vm411_vm8, %v403_v28, %v419_v29  ;;  %4318 = vset.pattern.permute.xlu1 %v4600_v14 }
 0x13e   : > { %v4061_v33 = vpack.c.bf16 %v428_v32, %v427_v30  ;;  %v464_v35 = vpop.permute.xlu1 %463  ;;  %902 = vperm.xlu1 %4318, %v4917_v52  }
 0x13f   : > { %4331 = vset.pattern.permute.xlu0 %v4600_v14  ;;  %v431_v31 = vpop.permute.xlu0 %430 }
 0x140   : > { %4062 = vmatprep.subr.bf16.mxu0 %v4061_v33  ;;  %910 = vperm.xlu0 %4331, %v725_v57  }
 0x141   : > { %4064 = vmatpush3.bf16.msra.mxu0 %v4061_v33 }
 0x142   : > { %v468_v43 = vpop.permute.xlu1 %467  ;;  %906 = vperm.xlu1 %4318, %v4921_v53  }
 0x143   : > { %v443_v4 = vpop.permute.xlu0 %442 }
 0x144   : > { %3784 = vmatmul.mubr.msk.f32.vlgmr.msra.gmra.mrb[0].mxu0 %vm477_vm6, %v464_v35  ;;  %922 = vperm.xlu0 %4331, %v4946_v59  }
 0x145   : > { %3786 = vmatprep.mubr.msk.f32.mxu0 %vm477_vm6, %v466_v26 }
 0x146   : > { %v472_v8 = vpop.permute.xlu1 %471  ;;  %4320 = vset.pattern.permute.xlu1 %v4598_v6 }
 0x147   : > { %818 = vperm.xlu1 %4320, %v736_v58   ;;  %v451_v20 = vpop.permute.xlu0 %450 }
 0x148   : > { %3787 = vmatmul.mubr.msk.f32.gmra.mrb[2].mxu0 %vm477_vm6, %v468_v43  ;;  %930 = vperm.xlu0 %4331, %v4950_v60  }
 0x149   : > { %3789 = vmatprep.mubr.msk.f32.mxu0 %vm477_vm6, %v470_v50 }
 0x14a   : > { %v476_v40 = vpop.permute.xlu1 %475 }
 0x14b   : > { %4321 = vset.pattern.permute.xlu1 %v4599_v10  ;;  %v459_v50 = vpop.permute.xlu0 %458 }
 0x14c   : > { %3790 = vmatmul.mubr.msk.f32.gmra.mrb[4].mxu0 %vm477_vm6, %v472_v8  ;;  %858 = vperm.xlu1 %4321, %v725_v57  }
 0x14d   : > { %3792 = vmatprep.mubr.msk.f32.mxu0 %vm477_vm6, %v474_v36  ;;  %1013 = vrot.lane.b32.xlu0 %v725_v57, %s4601_s15 }
 0x14e   : > { %4334 = vset.pattern.permute.xlu0 %v4602_v22  ;;  %v435_v3 = vpop.permute.xlu1 %434 }
 0x150   : > { %3793 = vmatmul.mubr.msk.f32.gmra.mrb[6].mxu0 %vm477_vm6, %v476_v40  ;;  %4322 = vset.pattern.permute.xlu1 %v4596_v0 }
 0x151   : > { %771 = vperm.xlu1 %4322, %v727_v61   ;;  %1017 = vrot.lane.b32.xlu0 %v727_v61, %s4601_s15 }
 0x152   : > { %v439_v7 = vpop.permute.xlu1 %438 }
 0x155   : > { %776 = vperm.xlu1 %4322, %v4946_v59   ;;  %1021 = vrot.lane.b32.xlu0 %v4931_v56, %s4601_s15 }
 0x156   : > { %v447_v24 = vpop.permute.xlu1 %446 }
 0x159   : > { %4323 = vset.pattern.permute.xlu1 %v4600_v14  ;;  %978 = vperm.xlu0 %4334, %v733_v27  }
 0x15a   : > { %914 = vperm.xlu1 %4323, %v4926_v54   ;;  %v455_v40 = vpop.permute.xlu1 %454 }
 0x15d   : > { %990 = vperm.xlu0 %4334, %v736_v58  }
 0x15e   : > { %4324 = vset.pattern.permute.xlu1 %v4598_v6 }
 0x15f   : > { %823 = vperm.xlu1 %4324, %v4963_v62  }
 0x161   : > { %998 = vperm.xlu0 %4334, %v738_v51  }
 0x163   : > { %4326 = vset.pattern.permute.xlu1 %v4599_v10 }
 0x164   : > { %866 = vperm.xlu1 %4326, %v727_v61  }
 0x165   : > { %1006 = vperm.xlu0 %4334, %v740_v63  }
 0x168   : > { %870 = vperm.xlu1 %4326, %v4946_v59  }
 0x169   : > { %4337 = vset.pattern.permute.xlu0 %v4597_v1 }
 0x16c   : > { %4328 = vset.pattern.permute.xlu1 %v4596_v0 }
 0x16d   : > { %786 = vperm.xlu1 %4328, %v4950_v60  }
 0x171   : > { %4329 = vset.pattern.permute.xlu1 %v4600_v14 }
 0x172   : > { %918 = vperm.xlu1 %4329, %v727_v61  }
 0x176   : > { %4330 = vset.pattern.permute.xlu1 %v4598_v6 }
 0x177   : > { %833 = vperm.xlu1 %4330, %v4973_v2  }
 0x17b   : > { %838 = vperm.xlu1 %4330, %v740_v63  }
 0x17f   : > { %4332 = vset.pattern.permute.xlu1 %v4599_v10 }
 0x180   : > { %878 = vperm.xlu1 %4332, %v4950_v60  }
 0x184   : > { %4333 = vset.pattern.permute.xlu1 %v4600_v14 }
 0x185   : > { %926 = vperm.xlu1 %4333, %v4931_v56  }
 0x189   : > { %1009 = vrot.lane.b32.xlu1 %v4917_v52, %s4601_s15 }
 0x18a   : > { %4335 = vset.pattern.permute.xlu1 %v4602_v22 }
 0x18d   : > { %1011 = vrot.lane.b32.xlu1 %v4921_v53, %s4601_s15 }
 0x191   : > { %1015 = vrot.lane.b32.xlu1 %v4926_v54, %s4601_s15 }
 0x195   : > { %1019 = vrot.lane.b32.xlu1 %v4946_v59, %s4601_s15 }
 0x199   : > { %1023 = vrot.lane.b32.xlu1 %v4950_v60, %s4601_s15 }
 0x19d   : > { %982 = vperm.xlu1 %4335, %v4929_v55  }
 0x1a1   : > { %986 = vperm.xlu1 %4335, %v4910_v48  }
 0x1a5   : > { %994 = vperm.xlu1 %4335, %v4963_v62  }
 0x1a9   : > { %1002 = vperm.xlu1 %4335, %v4973_v2  }
 0x1ad   : > { %4336 = vset.pattern.permute.xlu1 %v4607_v47 }
 0x217   : > { %v3785_v5 = vpop.f32.mrb[0].mxu0 }
 0x218   : > { %v566_v9 = vadd.f32 %v3785_v5, %v435_v3  ;;  %v560_v11 = vpop.f32.mrb[1].mxu0  ;;  %v632_v3 = vpop.permute.xlu0 %631 }
 0x219   : > { %v561_v12 = vadd.f32 %v560_v11, %v431_v31 }
 0x21a   : > { %v608_v13 = vmul.f32 0.01, %v566_v9  ;;  %vm600_vm10 = vcmp.gt.f32.partialorder %v566_v9, 0.0 }
 0x21b   : > { %v607_v15 = vmul.f32 0.01, %v561_v12  ;;  %v3788_v16 = vpop.f32.mrb[2].mxu0  ;;  %vm599_vm11 = vcmp.gt.f32.partialorder %v561_v12, 0.0 }
 0x21c   : > { %v576_v17 = vadd.f32 %v3788_v16, %v443_v4  ;;  %v570_v18 = vpop.f32.mrb[3].mxu0  ;;  %v616_v19 = vsel %vm600_vm10, %v566_v9, %v608_v13  ;;  %v630_v4 = vpop.permute.xlu1 %629 }
 0x21d   : > { %v571_v21 = vadd.f32 %v570_v18, %v439_v7  ;;  %v615_v23 = vsel %vm599_vm11, %v561_v12, %v607_v15  ;;  %v634_v7 = vsel %vm633_vm2, %v630_v4, %v632_v3 }
 0x21e   : > { %vm602_vm12 = vcmp.gt.f32.partialorder %v576_v17, 0.0  ;;  %v610_v25 = vmul.f32 0.01, %v576_v17  ;;  %v4066_v28 = vpack.c.bf16 %v616_v19, %v615_v23 }
 0x21f   : > { %vm601_vm13 = vcmp.gt.f32.partialorder %v571_v21, 0.0  ;;  %v609_v42 = vmul.f32 0.01, %v571_v21  ;;  %v3791_v45 = vpop.f32.mrb[4].mxu0 }
 0x220   : > { %v586_v29 = vadd.f32 %v3791_v45, %v451_v20  ;;  %v580_v30 = vpop.f32.mrb[5].mxu0  ;;  %4067 = vmatpush3.bf16.msra.mxu1 %v4066_v28  ;;  %v618_v32 = vsel %vm602_vm12, %v576_v17, %v610_v25  ;;  %v626_v54 = vpop.permute.xlu1 %625 }
 0x221   : > { %v581_v33 = vadd.f32 %v580_v30, %v447_v24  ;;  %4068 = vmatprep.subr.bf16.mxu1 %v4604_v41  ;;  %v617_v35 = vsel %vm601_vm13, %v571_v21, %v609_v42  ;;  %v731_v30 = vld [vmem:[#allocation2 + $0x80] sm:$0x3f] }
 0x222   : > { %vm604_vm14 = vcmp.gt.f32.partialorder %v586_v29, 0.0  ;;  %v612_v26 = vmul.f32 0.01, %v586_v29  ;;  %v4069_v43 = vpack.c.bf16 %v618_v32, %v617_v35  ;;  %v742_v32 = vsub.f32 1.0, %v4912_v49  ;;  %1176 = vrot.lane.b32.xlu1 %v731_v30, %s4603_s17 }
 0x223   : > { %vm603_vm15 = vcmp.gt.f32.partialorder %v581_v33, 0.0  ;;  %v611_v8 = vmul.f32 0.01, %v581_v33  ;;  %v3794_v36 = vpop.f32.mrb[6].mxu0 }
 0x224   : > { %v596_v51 = vadd.f32 %v3794_v36, %v459_v50  ;;  %v590_v52 = vpop.f32.mrb[7].mxu0  ;;  %4070 = vmatpush3.bf16.msra.mxu1 %v4069_v43  ;;  %v620_v27 = vsel %vm604_vm14, %v586_v29, %v612_v26  ;;  %v746_v59 = vpop.permute.xlu1 %745  ;;  %v732_v29 = vld [vmem:[#allocation2 + $0x88] sm:$0x3f] }
 0x225   : > { %v591_v56 = vadd.f32 %v590_v52, %v455_v40  ;;  %4071 = vmatprep.subr.bf16.mxu1 %v4604_v41  ;;  %v619_v57 = vsel %vm603_vm15, %v581_v33, %v611_v8  ;;  %1178 = vrot.lane.b32.xlu0 %v732_v29, %s4603_s17  ;;  %v718_v33 = vpop.permute.xlu0 %717 }
 0x226   : > { %vm606_vm0 = vcmp.gt.f32.partialorder %v596_v51, 0.0  ;;  %v614_v58 = vmul.f32 0.01, %v596_v51  ;;  %v4072_v61 = vpack.c.bf16 %v620_v27, %v619_v57  ;;  %1172 = vperm.xlu1 %4336, %v732_v29  }
 0x227   : > { %vm605_vm1 = vcmp.gt.f32.partialorder %v591_v56, 0.0  ;;  %v613_v53 = vmul.f32 0.01, %v591_v56 }
 0x228   : > { %4073 = vmatpush3.bf16.msra.mxu1 %v4072_v61  ;;  %v622_v63 = vsel %vm606_vm0, %v596_v51, %v614_v58  ;;  %v5005_v9 = vpop.permute.xlu1 %751 }
 0x229   : > { %4074 = vmatprep.subr.bf16.mxu1 %v4604_v41  ;;  %v621_v31 = vsel %vm605_vm1, %v591_v56, %v613_v53  ;;  %1263 = vperm.xlu0 %4337, %v742_v32   ;;  %v814_v35 = vpop.permute.xlu0 %813 }
 0x22a   : > { %v4075_v5 = vpack.c.bf16 %v622_v63, %v621_v31  ;;  %4338 = vset.pattern.permute.xlu1 %v4597_v1 }
 0x22c   : > { %4076 = vmatpush3.bf16.msra.mxu1 %v4075_v5  ;;  %v5007_v60 = vpop.permute.xlu1 %803 }
 0x22d   : > { %4093 = vmatprep.subr.bf16.mxu1 %v4604_v41  ;;  %4344 = vset.pattern.permute.xlu0 %v4598_v6  ;;  %v829_v26 = vpop.permute.xlu0 %828 }
 0x22f   : > { %3812 = vmatmul.mubr.msk.f32.vlgmr.msra.gmra.mrb[0].mxu1 %vm477_vm6, %v634_v7 }
 0x230   : > { %3858 = vmatprep.mubr.msk.f32.mxu1 %vm4605_vm9, %v4606_v46  ;;  %v5009_v11 = vpop.permute.xlu1 %808 }
 0x231   : > { %v757_v50 = vpop.permute.xlu0 %756 }
 0x234   : > { %v855_v12 = vpop.permute.xlu1 %854 }
 0x235   : > { %v767_v40 = vpop.permute.xlu0 %766 }
 0x238   : > { %v5011_v13 = vpop.permute.xlu1 %761 }
 0x239   : > { %v782_v49 = vpop.permute.xlu0 %781 }
 0x23c   : > { %v5013_v55 = vpop.permute.xlu1 %902 }
 0x23d   : > { %v851_v27 = vpop.permute.xlu0 %850 }
 0x240   : > { %v907_v48 = vpop.permute.xlu1 %906 }
 0x241   : > { %v863_v56 = vpop.permute.xlu0 %862 }
 0x244   : > { %v5015_v15 = vpop.permute.xlu1 %818 }
 0x245   : > { %v875_v63 = vpop.permute.xlu0 %874 }
 0x248   : > { %v5017_v62 = vpop.permute.xlu1 %858 }
 0x249   : > { %v911_v5 = vpop.permute.xlu0 %910 }
 0x24c   : > { %v772_v2 = vpop.permute.xlu1 %771 }
 0x250   : > { %v777_v16 = vpop.permute.xlu1 %776 }
 0x254   : > { %v915_v17 = vpop.permute.xlu1 %914 }
 0x258   : > { %v824_v18 = vpop.permute.xlu1 %823 }
 0x25c   : > { %v867_v19 = vpop.permute.xlu1 %866 }
 0x260   : > { %v871_v20 = vpop.permute.xlu1 %870 }
 0x264   : > { %v5019_v21 = vpop.permute.xlu1 %786 }
 0x268   : > { %v5021_v23 = vpop.permute.xlu1 %918 }
 0x26c   : > { %v5023_v24 = vpop.permute.xlu1 %833 }
 0x270   : > { %v5025_v25 = vpop.permute.xlu1 %838 }
 0x274   : > { %v5027_v28 = vpop.permute.xlu1 %878 }
 0x278   : > { %v5029_v42 = vpop.permute.xlu1 %926 }
 0x27c   : > { %v1010_v45 = vpop.permute.xlu1 %1009 }
 0x27d   : > { %3830 = vmatprep.mubr.msk.f32.mxu0 %vm477_vm6, %v1010_v45 }
 0x302   : > { %v703_v43 = vpop.f32.mrb[0].mxu1 }
 0x303   : > { %v704_v8 = vadd.f32 %v703_v43, %v626_v54  ;;  %v3813_v36 = vpop.f32.mrb[1].mxu1 }
 0x305   : > { %4438 = vtanh.f32 %v704_v8  ;;  %v712_v61 = vrot.slane %v704_v8, 3 }
 0x30f   : > { %v4439_v51 = vpop.eup %4438 }
 0x310   : > { %v708_v52 = vmul.f32 1.442695, %v4439_v51 }
 0x312   : > { %4440 = vpow2.f32 %v708_v52 }
 0x31c   : > { %v4441_v57 = vpop.eup %4440 }
 0x31d   : > { %v710_v58 = vmul.f32 %v4441_v57, %v4842_v34 }
 0x31f   : > { %v714_v53 = vadd.f32 %v712_v61, %v710_v58 }
 0x321   : > { %v720_v31 = vmul.f32 %v718_v33, %v714_v53  ;;  %v923_v53 = vpop.permute.xlu0 %922 }
 0x323   : > { %v5039_v3 = vadd.f32 %v720_v31, %v4849_v39 }
 0x325   : > { %v5042_v4 = vmul.f32 %v746_v59, %v5039_v3 }
 0x327   : > { %v792_v7 = vrot.slane %v5042_v4, %v4844_v37  ;;  %v884_v54 = vrot.slane %v5042_v4, %v4846_v38  ;;  %v936_v34 = vrot.slane %v5042_v4, %v4860_v44 }
 0x329   : > { %v798_v45 = vmul.f32 %v792_v7, %v777_v16  ;;  %v940_v29 = vmul.f32 %v936_v34, %v915_v17  ;;  %v794_v30 = vmul.f32 %v792_v7, %v757_v50  ;;  %v886_v32 = vmul.f32 %v884_v54, %v855_v12 }
 0x32a   : > { %v938_v33 = vmul.f32 %v936_v34, %v907_v48  ;;  %v797_v39 = vmul.f32 %v792_v7, %v772_v2  ;;  %v796_v43 = vmul.f32 %v792_v7, %v767_v40  ;;  %v799_v36 = vmul.f32 %v792_v7, %v782_v49 }
 0x32b   : > { %v846_v8 = vadd.f32 %v829_v26, %v798_v45  ;;  %v842_v59 = vadd.f32 %v5009_v11, %v794_v30  ;;  %v890_v51 = vmul.f32 %v884_v54, %v871_v20  ;;  %v889_v58 = vmul.f32 %v884_v54, %v867_v19 }
 0x32c   : > { %v845_v52 = vadd.f32 %v824_v18, %v797_v39  ;;  %v844_v57 = vadd.f32 %v5015_v15, %v796_v43  ;;  %v793_v61 = vmul.f32 %v792_v7, %v5005_v9  ;;  %v885_v17 = vmul.f32 %v884_v54, %v851_v27 }
 0x32d   : > { %v894_v31 = vadd.f32 %v886_v32, %v842_v59  ;;  %v898_v16 = vadd.f32 %v890_v51, %v846_v8  ;;  %v800_v12 = vmul.f32 %v792_v7, %v5019_v21  ;;  %v888_v26 = vmul.f32 %v884_v54, %v863_v56 }
 0x32e   : > { %v897_v48 = vadd.f32 %v889_v58, %v845_v52  ;;  %v841_v2 = vadd.f32 %v5007_v60, %v793_v61  ;;  %v941_v11 = vmul.f32 %v936_v34, %v5021_v23  ;;  %v937_v20 = vmul.f32 %v936_v34, %v5013_v55  ;;  %v931_v55 = vpop.permute.xlu0 %930 }
 0x32f   : > { %v891_v18 = vmul.f32 %v884_v54, %v875_v63  ;;  %v847_v15 = vadd.f32 %v5023_v24, %v799_v36  ;;  %v795_v19 = vmul.f32 %v792_v7, %v5011_v13  ;;  %v946_v9 = vadd.f32 %v938_v33, %v894_v31 }
 0x330   : > { %v893_v50 = vadd.f32 %v885_v17, %v841_v2  ;;  %v896_v40 = vadd.f32 %v888_v26, %v844_v57  ;;  %v949_v49 = vadd.f32 %v941_v11, %v897_v48  ;;  %v887_v21 = vmul.f32 %v884_v54, %v5017_v62 }
 0x331   : > { %v899_v27 = vadd.f32 %v891_v18, %v847_v15  ;;  %v843_v45 = vadd.f32 %v814_v35, %v795_v19  ;;  %v848_v60 = vadd.f32 %v5025_v25, %v800_v12  ;;  %v939_v23 = vmul.f32 %v936_v34, %v911_v5  ;;  %v1012_v12 = vpop.permute.xlu1 %1011  ;;  %v5070_v19 = vld [vmem:[#allocation2 + $0x108] sm:$0x7] }
 0x332   : > { %v945_v56 = vadd.f32 %v937_v20, %v893_v50  ;;  %v948_v30 = vadd.f32 %v940_v29, %v896_v40  ;;  %v942_v32 = vmul.f32 %v936_v34, %v923_v53  ;;  %v965_v63 = vmul.f32 0.01, %v949_v49  ;;  %v1014_v2 = vpop.permute.xlu0 %1013  ;;  %1291 = vperm.xlu1 %4338, %v5070_v19   ;;  %v5075_v50 = vld [vmem:[#allocation2 + $0x128] sm:$0xff]  ;;  %v1284_v40 = vld [vmem:[#allocation2 + $0x158] sm:$0xff] }
 0x333   : > { %v895_v39 = vadd.f32 %v887_v21, %v843_v45  ;;  %v892_v24 = vmul.f32 %v884_v54, %v5027_v28  ;;  %v943_v13 = vmul.f32 %v936_v34, %v5029_v42  ;;  %vm954_vm4 = vcmp.gt.f32.partialorder %v946_v9, 0.0  ;;  %1359 = vperm.xlu0 %4344, %v5075_v50   ;;  %v5083_v45 = vld [vmem:[#allocation2 + $0x110] sm:$0xff] }
 0x334   : > { %v950_v7 = vadd.f32 %v942_v32, %v898_v16  ;;  %vm953_vm3 = vcmp.gt.f32.partialorder %v945_v56, 0.0  ;;  %v961_v33 = vmul.f32 0.01, %v945_v56  ;;  %v944_v62 = vmul.f32 %v936_v34, %v931_v55  ;;  %v5088_v21 = vld [vmem:[#allocation2 + $0x130] sm:$0xff]  ;;  %v1273_v32 = vld [vmem:[#allocation2 + $0x140] sm:$0xff] }
 0x335   : > { %v947_v35 = vadd.f32 %v939_v23, %v895_v39  ;;  %v900_v43 = vadd.f32 %v892_v24, %v848_v60  ;;  %v962_v8 = vmul.f32 0.01, %v946_v9  ;;  %v951_v25 = vadd.f32 %v943_v13, %v899_v27  ;;  %v1016_v26 = vpop.permute.xlu1 %1015  ;;  %v5081_v27 = vld [vmem:[#allocation2 + $0x118] sm:$0xff]  ;;  %v1275_v60 = vld [vmem:[#allocation2 + $0x160] sm:$0xff]  ;;  %v5102_v23 = vld [vmem:[#allocation2 + $0x150] sm:$0xff] }
 0x336   : > { %v969_v59 = vsel %vm953_vm3, %v945_v56, %v961_v33  ;;  %vm956_vm5 = vcmp.gt.f32.partialorder %v948_v30, 0.0  ;;  %v964_v5 = vmul.f32 0.01, %v948_v30  ;;  %v966_v36 = vmul.f32 0.01, %v950_v7  ;;  %v1018_v11 = vpop.permute.xlu0 %1017  ;;  %4339 = vset.pattern.permute.xlu1 %v4596_v0  ;;  %v1271_v56 = vld [vmem:[#allocation2 + $0x120] sm:$0xff] }
 0x337   : > { %v963_v29 = vmul.f32 0.01, %v947_v35  ;;  %v952_v51 = vadd.f32 %v944_v62, %v900_v43  ;;  %v970_v52 = vsel %vm954_vm4, %v946_v9, %v962_v8  ;;  %vm955_vm7 = vcmp.gt.f32.partialorder %v947_v35, 0.0  ;;  %v5073_v9 = vld [vmem:[#allocation2 + $0x100] sm:$0xff]  ;;  %1374 = vperm.xlu0 %4344, %v1284_v40   ;;  %v5106_v55 = vld [vmem:[#allocation2 + $0x170] sm:$0xff]  ;;  %v1286_v39 = vld [vmem:[#allocation2 + $0x178] sm:$0xff] }
 0x338   : > { %v4077_v57 = vpack.c.bf16 %v970_v52, %v969_v59  ;;  %v972_v28 = vsel %vm956_vm5, %v948_v30, %v964_v5  ;;  %vm957_vm8 = vcmp.gt.f32.partialorder %v949_v49, 0.0  ;;  %vm958_vm10 = vcmp.gt.f32.partialorder %v950_v7, 0.0  ;;  %1297 = vperm.xlu1 %4339, %v5073_v9   ;;  %v1282_v30 = vld [vmem:[#allocation2 + $0x138] sm:$0xff]  ;;  %v5127_v24 = vld [vmem:[#allocation2 + $0x168] sm:$0xff] }
 0x339   : > { %v971_v42 = vsel %vm955_vm7, %v947_v35, %v963_v29  ;;  %v968_v58 = vmul.f32 0.01, %v952_v51  ;;  %v967_v61 = vmul.f32 0.01, %v951_v25  ;;  %v973_v34 = vsel %vm957_vm8, %v949_v49, %v965_v63  ;;  %v1020_v20 = vpop.permute.xlu1 %1019  ;;  %v1279_v49 = vld [vmem:[#allocation2 + $0x108] sm:$0xff] }
 0x33a   : > { %4078 = vmatprep.subr.bf16.mxu0 %v4077_v57  ;;  %v4081_v54 = vpack.c.bf16 %v972_v28, %v971_v42  ;;  %v974_v53 = vsel %vm958_vm10, %v950_v7, %v966_v36  ;;  %vm959_vm11 = vcmp.gt.f32.partialorder %v951_v25, 0.0  ;;  %vm960_vm12 = vcmp.gt.f32.partialorder %v952_v51, 0.0  ;;  %v1022_v18 = vpop.permute.xlu0 %1021  ;;  %v5117_v63 = vld [vmem:[#allocation2 + $0x148] sm:$0xff] }
 0x33b   : > { %4080 = vmatpush3.bf16.msra.mxu0 %v4077_v57  ;;  %v4085_v31 = vpack.c.bf16 %v974_v53, %v973_v34  ;;  %v975_v16 = vsel %vm959_vm11, %v951_v25, %v967_v61  ;;  %v976_v17 = vsel %vm960_vm12, %v952_v51, %v968_v58  ;;  %4350 = vset.pattern.permute.xlu0 %v4596_v0 }
 0x33c   : > { %4082 = vmatprep.subr.bf16.mxu0 %v4081_v54  ;;  %v4089_v48 = vpack.c.bf16 %v976_v17, %v975_v16  ;;  %4340 = vset.pattern.permute.xlu1 %v4598_v6 }
 0x33d   : > { %v1024_v15 = vpop.permute.xlu1 %1023  ;;  %1349 = vperm.xlu1 %4340, %v1279_v49   ;;  %1302 = vperm.xlu0 %4350, %v5083_v45  }
 0x33e   : > { %v979_v13 = vpop.permute.xlu0 %978 }
 0x33f   : > { %4084 = vmatpush3.bf16.msra.mxu0 %v4081_v54 }
 0x340   : > { %4086 = vmatprep.subr.bf16.mxu0 %v4085_v31 }
 0x341   : > { %1354 = vperm.xlu1 %4340, %v5081_v27   ;;  %1312 = vperm.xlu0 %4350, %v5088_v21   ;;  %v983_v7 = vpop.permute.xlu1 %982 }
 0x342   : > { %v991_v33 = vpop.permute.xlu0 %990 }
 0x343   : > { %4088 = vmatpush3.bf16.msra.mxu0 %v4085_v31 }
 0x344   : > { %4090 = vmatprep.subr.bf16.mxu0 %v4089_v48 }
 0x345   : > { %4341 = vset.pattern.permute.xlu1 %v4599_v10  ;;  %1327 = vperm.xlu0 %4350, %v1275_v60   ;;  %v987_v43 = vpop.permute.xlu1 %986 }
 0x346   : > { %1400 = vperm.xlu1 %4341, %v5083_v45   ;;  %v999_v57 = vpop.permute.xlu0 %998 }
 0x347   : > { %4092 = vmatpush3.bf16.msra.mxu0 %v4089_v48 }
 0x349   : > { %4352 = vset.pattern.permute.xlu0 %v4599_v10  ;;  %v995_v54 = vpop.permute.xlu1 %994 }
 0x34a   : > { %3831 = vmatmul.mubr.msk.f32.vlgmr.msra.gmra.mrb[8].mxu0 %vm477_vm6, %v1012_v12  ;;  %4342 = vset.pattern.permute.xlu1 %v4596_v0 }
 0x34b   : > { %3833 = vmatprep.mubr.msk.f32.mxu0 %vm477_vm6, %v1014_v2  ;;  %1307 = vperm.xlu1 %4342, %v1271_v56  }
 0x34c   : > { %1396 = vperm.xlu0 %4352, %v5073_v9  }
 0x34e   : > { %3834 = vmatmul.mubr.msk.f32.gmra.mrb[10].mxu0 %vm477_vm6, %v1016_v26 }
 0x34f   : > { %3836 = vmatprep.mubr.msk.f32.mxu0 %vm477_vm6, %v1018_v11  ;;  %4343 = vset.pattern.permute.xlu1 %v4600_v14  ;;  %v1007_v11 = vpop.permute.xlu0 %1006 }
 0x350   : > { %1448 = vperm.xlu1 %4343, %v5073_v9   ;;  %1408 = vperm.xlu0 %4352, %v5088_v21  }
 0x352   : > { %3837 = vmatmul.mubr.msk.f32.gmra.mrb[12].mxu0 %vm477_vm6, %v1020_v20 }
 0x353   : > { %3839 = vmatprep.mubr.msk.f32.mxu0 %vm477_vm6, %v1022_v18 }
 0x354   : > { %1452 = vperm.xlu1 %4343, %v5083_v45   ;;  %1420 = vperm.xlu0 %4352, %v1275_v60  }
 0x356   : > { %3840 = vmatmul.mubr.msk.f32.gmra.mrb[14].mxu0 %vm477_vm6, %v1024_v15  ;;  %v1003_v15 = vpop.permute.xlu1 %1002 }
 0x358   : > { %4345 = vset.pattern.permute.xlu1 %v4598_v6  ;;  %4356 = vset.pattern.permute.xlu0 %v4600_v14 }
 0x359   : > { %1364 = vperm.xlu1 %4345, %v1282_v30   ;;  %1456 = vperm.xlu0 %4356, %v1271_v56  }
 0x35d   : > { %4346 = vset.pattern.permute.xlu1 %v4599_v10  ;;  %1468 = vperm.xlu0 %4356, %v5102_v23  }
 0x35e   : > { %1404 = vperm.xlu1 %4346, %v1271_v56  }
 0x361   : > { %1476 = vperm.xlu0 %4356, %v5106_v55  }
 0x362   : > { %4347 = vset.pattern.permute.xlu1 %v4596_v0 }
 0x363   : > { %1317 = vperm.xlu1 %4347, %v1273_v32  }
 0x365   : > { %1559 = vrot.lane.b32.xlu0 %v1271_v56, %s4601_s15 }
 0x366   : > { %4359 = vset.pattern.permute.xlu0 %v4602_v22 }
 0x367   : > { %1322 = vperm.xlu1 %4347, %v5102_v23  }
 0x369   : > { %1563 = vrot.lane.b32.xlu0 %v1273_v32, %s4601_s15 }
 0x36b   : > { %4348 = vset.pattern.permute.xlu1 %v4600_v14 }
 0x36c   : > { %1460 = vperm.xlu1 %4348, %v5088_v21  }
 0x36d   : > { %1567 = vrot.lane.b32.xlu0 %v1275_v60, %s4601_s15 }
 0x370   : > { %4349 = vset.pattern.permute.xlu1 %v4598_v6 }
 0x371   : > { %1369 = vperm.xlu1 %4349, %v5117_v63   ;;  %1524 = vperm.xlu0 %4359, %v1279_v49  }
 0x375   : > { %4351 = vset.pattern.permute.xlu1 %v4599_v10  ;;  %1536 = vperm.xlu0 %4359, %v1282_v30  }
 0x376   : > { %1412 = vperm.xlu1 %4351, %v1273_v32  }
 0x379   : > { %1544 = vperm.xlu0 %4359, %v1284_v40  }
 0x37a   : > { %1416 = vperm.xlu1 %4351, %v5102_v23  }
 0x37d   : > { %1552 = vperm.xlu0 %4359, %v1286_v39  }
 0x37e   : > { %4353 = vset.pattern.permute.xlu1 %v4596_v0 }
 0x37f   : > { %1332 = vperm.xlu1 %4353, %v5106_v55  }
 0x381   : > { %4362 = vset.pattern.permute.xlu0 %v4597_v1 }
 0x383   : > { %4354 = vset.pattern.permute.xlu1 %v4600_v14 }
 0x384   : > { %1464 = vperm.xlu1 %4354, %v1273_v32  }
 0x388   : > { %4355 = vset.pattern.permute.xlu1 %v4598_v6 }
 0x389   : > { %1379 = vperm.xlu1 %4355, %v5127_v24  }
 0x38d   : > { %1384 = vperm.xlu1 %4355, %v1286_v39  }
 0x391   : > { %4357 = vset.pattern.permute.xlu1 %v4599_v10 }
 0x392   : > { %1424 = vperm.xlu1 %4357, %v5106_v55  }
 0x396   : > { %4358 = vset.pattern.permute.xlu1 %v4600_v14 }
 0x397   : > { %1472 = vperm.xlu1 %4358, %v1275_v60  }
 0x39b   : > { %1555 = vrot.lane.b32.xlu1 %v5073_v9, %s4601_s15 }
 0x39c   : > { %4360 = vset.pattern.permute.xlu1 %v4602_v22 }
 0x39f   : > { %1557 = vrot.lane.b32.xlu1 %v5083_v45, %s4601_s15 }
 0x3a3   : > { %1561 = vrot.lane.b32.xlu1 %v5088_v21, %s4601_s15 }
 0x3a7   : > { %1565 = vrot.lane.b32.xlu1 %v5102_v23, %s4601_s15 }
 0x3ab   : > { %1569 = vrot.lane.b32.xlu1 %v5106_v55, %s4601_s15 }
 0x3af   : > { %1528 = vperm.xlu1 %4360, %v5081_v27  }
 0x3b3   : > { %1532 = vperm.xlu1 %4360, %v5075_v50  }
 0x3b7   : > { %1540 = vperm.xlu1 %4360, %v5117_v63  }
 0x3bb   : > { %1548 = vperm.xlu1 %4360, %v5127_v24  }
 0x3bf   : > { %4361 = vset.pattern.permute.xlu1 %v4607_v47 }
 0x41d   : > { %v3832_v35 = vpop.f32.mrb[8].mxu0 }
 0x41e   : > { %v1113_v62 = vadd.f32 %v3832_v35, %v983_v7  ;;  %v1107_v8 = vpop.f32.mrb[9].mxu0  ;;  %v1177_v7 = vpop.permute.xlu1 %1176 }
 0x41f   : > { %v1108_v25 = vadd.f32 %v1107_v8, %v979_v13  ;;  %v1179_v13 = vpop.permute.xlu0 %1178 }
 0x420   : > { %vm1147_vm13 = vcmp.gt.f32.partialorder %v1113_v62, 0.0  ;;  %v1155_v59 = vmul.f32 0.01, %v1113_v62 }
 0x421   : > { %vm1146_vm14 = vcmp.gt.f32.partialorder %v1108_v25, 0.0  ;;  %v1154_v5 = vmul.f32 0.01, %v1108_v25  ;;  %v3835_v29 = vpop.f32.mrb[10].mxu0 }
 0x422   : > { %v1163_v36 = vsel %vm1147_vm13, %v1113_v62, %v1155_v59  ;;  %v1123_v51 = vadd.f32 %v3835_v29, %v991_v33  ;;  %v1117_v52 = vpop.f32.mrb[11].mxu0  ;;  %v1180_v33 = vsel %vm633_vm2, %v1177_v7, %v1179_v13  ;;  %v1173_v55 = vpop.permute.xlu1 %1172 }
 0x423   : > { %v1162_v28 = vsel %vm1146_vm14, %v1108_v25, %v1154_v5  ;;  %v1118_v42 = vadd.f32 %v1117_v52, %v987_v43 }
 0x424   : > { %v4094_v58 = vpack.c.bf16 %v1163_v36, %v1162_v28  ;;  %vm1149_vm15 = vcmp.gt.f32.partialorder %v1123_v51, 0.0  ;;  %v1157_v61 = vmul.f32 0.01, %v1123_v51 }
 0x425   : > { %vm1148_vm0 = vcmp.gt.f32.partialorder %v1118_v42, 0.0  ;;  %v1156_v34 = vmul.f32 0.01, %v1118_v42  ;;  %v3838_v53 = vpop.f32.mrb[12].mxu0 }
 0x426   : > { %v1165_v31 = vsel %vm1149_vm15, %v1123_v51, %v1157_v61  ;;  %v1133_v16 = vadd.f32 %v3838_v53, %v999_v57  ;;  %v1127_v17 = vpop.f32.mrb[13].mxu0  ;;  %4095 = vmatpush3.bf16.msra.mxu1 %v4094_v58  ;;  %v1292_v35 = vpop.permute.xlu1 %1291 }
 0x427   : > { %v1164_v12 = vsel %vm1148_vm0, %v1118_v42, %v1156_v34  ;;  %v1128_v48 = vadd.f32 %v1127_v17, %v995_v54  ;;  %4096 = vmatprep.subr.bf16.mxu1 %v4604_v41  ;;  %v1288_v17 = vsub.f32 1.0, %v5070_v19 }
 0x428   : > { %v4097_v2 = vpack.c.bf16 %v1165_v31, %v1164_v12  ;;  %vm1151_vm1 = vcmp.gt.f32.partialorder %v1133_v16, 0.0  ;;  %v1159_v26 = vmul.f32 0.01, %v1133_v16  ;;  %v1278_v31 = vld [vmem:[#allocation2 + $0x108] sm:$0x3f]  ;;  %v1264_v12 = vpop.permute.xlu0 %1263 }
 0x429   : > { %vm1150_vm3 = vcmp.gt.f32.partialorder %v1128_v48, 0.0  ;;  %v1158_v20 = vmul.f32 0.01, %v1128_v48  ;;  %v3841_v18 = vpop.f32.mrb[14].mxu0  ;;  %1724 = vrot.lane.b32.xlu0 %v1278_v31, %s4603_s17 }
 0x42a   : > { %v1167_v9 = vsel %vm1151_vm1, %v1133_v16, %v1159_v26  ;;  %v1143_v40 = vadd.f32 %v3841_v18, %v1007_v11  ;;  %v1137_v49 = vpop.f32.mrb[15].mxu0  ;;  %4098 = vmatpush3.bf16.msra.mxu1 %v4097_v2  ;;  %v5158_v43 = vpop.permute.xlu1 %1297  ;;  %v1277_v16 = vld [vmem:[#allocation2 + $0x100] sm:$0x3f] }
 0x42b   : > { %v1166_v45 = vsel %vm1150_vm3, %v1128_v48, %v1158_v20  ;;  %v1138_v21 = vadd.f32 %v1137_v49, %v1003_v15  ;;  %4099 = vmatprep.subr.bf16.mxu1 %v4604_v41  ;;  %1722 = vrot.lane.b32.xlu1 %v1277_v16, %s4603_s17 }
 0x42c   : > { %v4100_v60 = vpack.c.bf16 %v1167_v9, %v1166_v45  ;;  %vm1153_vm4 = vcmp.gt.f32.partialorder %v1143_v40, 0.0  ;;  %v1161_v56 = vmul.f32 0.01, %v1143_v40  ;;  %v1360_v48 = vpop.permute.xlu0 %1359 }
 0x42d   : > { %vm1152_vm5 = vcmp.gt.f32.partialorder %v1138_v21, 0.0  ;;  %v1160_v30 = vmul.f32 0.01, %v1138_v21  ;;  %1809 = vperm.xlu0 %4362, %v1288_v17  }
 0x42e   : > { %v1169_v32 = vsel %vm1153_vm4, %v1143_v40, %v1161_v56  ;;  %4101 = vmatpush3.bf16.msra.mxu1 %v4100_v60  ;;  %v5160_v27 = vpop.permute.xlu1 %1349 }
 0x42f   : > { %v1168_v39 = vsel %vm1152_vm5, %v1138_v21, %v1160_v30  ;;  %4102 = vmatprep.subr.bf16.mxu1 %v4604_v41  ;;  %1718 = vperm.xlu1 %4361, %v1278_v31  }
 0x430   : > { %v4103_v23 = vpack.c.bf16 %v1169_v32, %v1168_v39  ;;  %v1375_v2 = vpop.permute.xlu0 %1374 }
 0x431   : > { %4369 = vset.pattern.permute.xlu0 %v4598_v6 }
 0x432   : > { %4104 = vmatpush3.bf16.msra.mxu1 %v4103_v23  ;;  %v5162_v62 = vpop.permute.xlu1 %1354 }
 0x433   : > { %4121 = vmatprep.subr.bf16.mxu1 %v4604_v41  ;;  %4363 = vset.pattern.permute.xlu1 %v4597_v1 }
 0x434   : > { %v1303_v11 = vpop.permute.xlu0 %1302 }
 0x435   : > { %3859 = vmatmul.mubr.msk.f32.vlgmr.msra.gmra.mrb[2].mxu1 %vm477_vm6, %v1180_v33 }
 0x436   : > { %3905 = vmatprep.mubr.msk.f32.mxu1 %vm4605_vm9, %v4606_v46  ;;  %v1401_v8 = vpop.permute.xlu1 %1400 }
 0x438   : > { %v1313_v15 = vpop.permute.xlu0 %1312 }
 0x43a   : > { %v5164_v25 = vpop.permute.xlu1 %1307 }
 0x43c   : > { %v1328_v19 = vpop.permute.xlu0 %1327 }
 0x43e   : > { %v5166_v50 = vpop.permute.xlu1 %1448 }
 0x440   : > { %v1397_v49 = vpop.permute.xlu0 %1396 }
 0x442   : > { %v1453_v59 = vpop.permute.xlu1 %1452 }
 0x444   : > { %v1409_v45 = vpop.permute.xlu0 %1408 }
 0x446   : > { %v5168_v5 = vpop.permute.xlu1 %1364 }
 0x448   : > { %v1421_v32 = vpop.permute.xlu0 %1420 }
 0x44a   : > { %v5170_v63 = vpop.permute.xlu1 %1404 }
 0x44c   : > { %v1457_v23 = vpop.permute.xlu0 %1456 }
 0x44e   : > { %v1318_v24 = vpop.permute.xlu1 %1317 }
 0x452   : > { %v1323_v29 = vpop.permute.xlu1 %1322 }
 0x456   : > { %v1461_v36 = vpop.permute.xlu1 %1460 }
 0x45a   : > { %v1370_v51 = vpop.permute.xlu1 %1369 }
 0x45e   : > { %v1413_v52 = vpop.permute.xlu1 %1412 }
 0x462   : > { %v1417_v57 = vpop.permute.xlu1 %1416 }
 0x466   : > { %v5172_v28 = vpop.permute.xlu1 %1332 }
 0x46a   : > { %v5174_v42 = vpop.permute.xlu1 %1464 }
 0x46e   : > { %v5176_v54 = vpop.permute.xlu1 %1379 }
 0x472   : > { %v5178_v58 = vpop.permute.xlu1 %1384 }
 0x476   : > { %v5180_v61 = vpop.permute.xlu1 %1424 }
 0x47a   : > { %v5182_v34 = vpop.permute.xlu1 %1472 }
 0x47e   : > { %v1556_v53 = vpop.permute.xlu1 %1555 }
 0x47f   : > { %3877 = vmatprep.mubr.msk.f32.mxu0 %vm477_vm6, %v1556_v53 }
 0x508   : > { %v1249_v26 = vpop.f32.mrb[2].mxu1 }
 0x509   : > { %v1250_v20 = vadd.f32 %v1249_v26, %v1173_v55  ;;  %v3860_v18 = vpop.f32.mrb[3].mxu1 }
 0x50b   : > { %4442 = vtanh.f32 %v1250_v20  ;;  %v1258_v56 = vrot.slane %v1250_v20, 3 }
 0x515   : > { %v4443_v9 = vpop.eup %4442 }
 0x516   : > { %v1254_v40 = vmul.f32 1.442695, %v4443_v9 }
 0x518   : > { %4444 = vpow2.f32 %v1254_v40 }
 0x522   : > { %v4445_v21 = vpop.eup %4444 }
 0x523   : > { %v1256_v60 = vmul.f32 %v4445_v21, %v5039_v3 }
 0x525   : > { %v1260_v30 = vadd.f32 %v1258_v56, %v1256_v60 }
 0x527   : > { %v1266_v39 = vmul.f32 %v1264_v12, %v1260_v30  ;;  %v1469_v30 = vpop.permute.xlu0 %1468 }
 0x529   : > { %v5192_v13 = vadd.f32 %v1266_v39, %v5042_v4 }
 0x52b   : > { %v5195_v7 = vmul.f32 %v1292_v35, %v5192_v13 }
 0x52d   : > { %v1338_v33 = vrot.slane %v5195_v7, %v4844_v37  ;;  %v1430_v55 = vrot.slane %v5195_v7, %v4846_v38  ;;  %v1482_v3 = vrot.slane %v5195_v7, %v4860_v44 }
 0x52f   : > { %v1344_v53 = vmul.f32 %v1338_v33, %v1323_v29  ;;  %v1486_v31 = vmul.f32 %v1482_v3, %v1461_v36  ;;  %v1340_v16 = vmul.f32 %v1338_v33, %v1303_v11  ;;  %v1432_v17 = vmul.f32 %v1430_v55, %v1401_v8 }
 0x530   : > { %v1484_v12 = vmul.f32 %v1482_v3, %v1453_v59  ;;  %v1343_v4 = vmul.f32 %v1338_v33, %v1318_v24  ;;  %v1342_v26 = vmul.f32 %v1338_v33, %v1313_v15  ;;  %v1345_v18 = vmul.f32 %v1338_v33, %v1328_v19 }
 0x531   : > { %v1392_v20 = vadd.f32 %v1375_v2, %v1344_v53  ;;  %v1388_v35 = vadd.f32 %v5162_v62, %v1340_v16  ;;  %v1436_v9 = vmul.f32 %v1430_v55, %v1417_v57  ;;  %v1435_v60 = vmul.f32 %v1430_v55, %v1413_v52 }
 0x532   : > { %v1391_v40 = vadd.f32 %v1370_v51, %v1343_v4  ;;  %v1390_v21 = vadd.f32 %v5168_v5, %v1342_v26  ;;  %v1339_v56 = vmul.f32 %v1338_v33, %v5158_v43  ;;  %v1431_v36 = vmul.f32 %v1430_v55, %v1397_v49 }
 0x533   : > { %v1440_v39 = vadd.f32 %v1432_v17, %v1388_v35  ;;  %v1444_v29 = vadd.f32 %v1436_v9, %v1392_v20  ;;  %v1346_v8 = vmul.f32 %v1338_v33, %v5172_v28  ;;  %v1434_v2 = vmul.f32 %v1430_v55, %v1409_v45 }
 0x534   : > { %v1443_v59 = vadd.f32 %v1435_v60, %v1391_v40  ;;  %v1387_v24 = vadd.f32 %v5160_v27, %v1339_v56  ;;  %v1487_v62 = vmul.f32 %v1482_v3, %v5174_v42  ;;  %v1483_v57 = vmul.f32 %v1482_v3, %v5166_v50  ;;  %v1477_v50 = vpop.permute.xlu0 %1476 }
 0x535   : > { %v1437_v51 = vmul.f32 %v1430_v55, %v1421_v32  ;;  %v1393_v5 = vadd.f32 %v5176_v54, %v1345_v18  ;;  %v1341_v52 = vmul.f32 %v1338_v33, %v5164_v25  ;;  %v1492_v43 = vadd.f32 %v1484_v12, %v1440_v39 }
 0x536   : > { %v1439_v11 = vadd.f32 %v1431_v36, %v1387_v24  ;;  %v1442_v15 = vadd.f32 %v1434_v2, %v1390_v21  ;;  %v1495_v19 = vadd.f32 %v1487_v62, %v1443_v59  ;;  %v1433_v28 = vmul.f32 %v1430_v55, %v5170_v63 }
 0x537   : > { %v1445_v49 = vadd.f32 %v1437_v51, %v1393_v5  ;;  %v1389_v53 = vadd.f32 %v1360_v48, %v1341_v52  ;;  %v1394_v27 = vadd.f32 %v5178_v58, %v1346_v8  ;;  %v1485_v42 = vmul.f32 %v1482_v3, %v1457_v23  ;;  %v1558_v8 = vpop.permute.xlu1 %1557  ;;  %v5223_v52 = vld [vmem:[#allocation2 + $0x188] sm:$0x7] }
 0x538   : > { %v1491_v45 = vadd.f32 %v1483_v57, %v1439_v11  ;;  %v1494_v16 = vadd.f32 %v1486_v31, %v1442_v15  ;;  %v1488_v17 = vmul.f32 %v1482_v3, %v1469_v30  ;;  %v1511_v32 = vmul.f32 0.01, %v1495_v19  ;;  %v1560_v24 = vpop.permute.xlu0 %1559  ;;  %1837 = vperm.xlu1 %4363, %v5223_v52   ;;  %v5228_v11 = vld [vmem:[#allocation2 + $0x1a8] sm:$0xff]  ;;  %v1830_v15 = vld [vmem:[#allocation2 + $0x1d8] sm:$0xff] }
 0x539   : > { %v1441_v4 = vadd.f32 %v1433_v28, %v1389_v53  ;;  %v1438_v54 = vmul.f32 %v1430_v55, %v5180_v61  ;;  %v1489_v25 = vmul.f32 %v1482_v3, %v5182_v34  ;;  %vm1500_vm8 = vcmp.gt.f32.partialorder %v1492_v43, 0.0  ;;  %1905 = vperm.xlu0 %4369, %v5228_v11   ;;  %v5236_v53 = vld [vmem:[#allocation2 + $0x190] sm:$0xff] }
 0x53a   : > { %v1496_v33 = vadd.f32 %v1488_v17, %v1444_v29  ;;  %vm1499_vm7 = vcmp.gt.f32.partialorder %v1491_v45, 0.0  ;;  %v1507_v12 = vmul.f32 0.01, %v1491_v45  ;;  %v1490_v63 = vmul.f32 %v1482_v3, %v1477_v50  ;;  %v5241_v28 = vld [vmem:[#allocation2 + $0x1b0] sm:$0xff]  ;;  %v1819_v17 = vld [vmem:[#allocation2 + $0x1c0] sm:$0xff] }
 0x53b   : > { %v1493_v48 = vadd.f32 %v1485_v42, %v1441_v4  ;;  %v1446_v26 = vadd.f32 %v1438_v54, %v1394_v27  ;;  %v1508_v20 = vmul.f32 0.01, %v1492_v43  ;;  %v1497_v58 = vadd.f32 %v1489_v25, %v1445_v49  ;;  %v1562_v2 = vpop.permute.xlu1 %1561  ;;  %v5234_v49 = vld [vmem:[#allocation2 + $0x198] sm:$0xff]  ;;  %v1821_v27 = vld [vmem:[#allocation2 + $0x1e0] sm:$0xff]  ;;  %v5255_v42 = vld [vmem:[#allocation2 + $0x1d0] sm:$0xff] }
 0x53c   : > { %v1515_v35 = vsel %vm1499_vm7, %v1491_v45, %v1507_v12  ;;  %vm1502_vm10 = vcmp.gt.f32.partialorder %v1494_v16, 0.0  ;;  %v1510_v23 = vmul.f32 0.01, %v1494_v16  ;;  %v1512_v18 = vmul.f32 0.01, %v1496_v33  ;;  %v1564_v62 = vpop.permute.xlu0 %1563  ;;  %4364 = vset.pattern.permute.xlu1 %v4596_v0  ;;  %v1817_v45 = vld [vmem:[#allocation2 + $0x1a0] sm:$0xff] }
 0x53d   : > { %v1509_v31 = vmul.f32 0.01, %v1493_v48  ;;  %v1498_v9 = vadd.f32 %v1490_v63, %v1446_v26  ;;  %v1516_v40 = vsel %vm1500_vm8, %v1492_v43, %v1508_v20  ;;  %vm1501_vm11 = vcmp.gt.f32.partialorder %v1493_v48, 0.0  ;;  %v5226_v43 = vld [vmem:[#allocation2 + $0x180] sm:$0xff]  ;;  %1920 = vperm.xlu0 %4369, %v1830_v15   ;;  %v5259_v50 = vld [vmem:[#allocation2 + $0x1f0] sm:$0xff]  ;;  %v1832_v4 = vld [vmem:[#allocation2 + $0x1f8] sm:$0xff] }
 0x53e   : > { %v4105_v21 = vpack.c.bf16 %v1516_v40, %v1515_v35  ;;  %v1518_v61 = vsel %vm1502_vm10, %v1494_v16, %v1510_v23  ;;  %vm1503_vm12 = vcmp.gt.f32.partialorder %v1495_v19, 0.0  ;;  %vm1504_vm13 = vcmp.gt.f32.partialorder %v1496_v33, 0.0  ;;  %1843 = vperm.xlu1 %4364, %v5226_v43   ;;  %v1828_v16 = vld [vmem:[#allocation2 + $0x1b8] sm:$0xff]  ;;  %v5280_v54 = vld [vmem:[#allocation2 + $0x1e8] sm:$0xff] }
 0x53f   : > { %v1517_v34 = vsel %vm1501_vm11, %v1493_v48, %v1509_v31  ;;  %v1514_v60 = vmul.f32 0.01, %v1498_v9  ;;  %v1513_v56 = vmul.f32 0.01, %v1497_v58  ;;  %v1519_v3 = vsel %vm1503_vm12, %v1495_v19, %v1511_v32  ;;  %v1566_v57 = vpop.permute.xlu1 %1565  ;;  %v1825_v19 = vld [vmem:[#allocation2 + $0x188] sm:$0xff] }
 0x540   : > { %4106 = vmatprep.subr.bf16.mxu0 %v4105_v21  ;;  %v4109_v55 = vpack.c.bf16 %v1518_v61, %v1517_v34  ;;  %v1520_v30 = vsel %vm1504_vm13, %v1496_v33, %v1512_v18  ;;  %vm1505_vm14 = vcmp.gt.f32.partialorder %v1497_v58, 0.0  ;;  %vm1506_vm15 = vcmp.gt.f32.partialorder %v1498_v9, 0.0  ;;  %v1568_v51 = vpop.permute.xlu0 %1567  ;;  %v5270_v32 = vld [vmem:[#allocation2 + $0x1c8] sm:$0xff] }
 0x541   : > { %4108 = vmatpush3.bf16.msra.mxu0 %v4105_v21  ;;  %v4113_v39 = vpack.c.bf16 %v1520_v30, %v1519_v3  ;;  %v1521_v29 = vsel %vm1505_vm14, %v1497_v58, %v1513_v56  ;;  %v1522_v36 = vsel %vm1506_vm15, %v1498_v9, %v1514_v60  ;;  %4375 = vset.pattern.permute.xlu0 %v4596_v0 }
 0x542   : > { %4110 = vmatprep.subr.bf16.mxu0 %v4109_v55  ;;  %v4117_v59 = vpack.c.bf16 %v1522_v36, %v1521_v29  ;;  %4365 = vset.pattern.permute.xlu1 %v4598_v6 }
 0x543   : > { %v1570_v5 = vpop.permute.xlu1 %1569  ;;  %1895 = vperm.xlu1 %4365, %v1825_v19   ;;  %1848 = vperm.xlu0 %4375, %v5236_v53  }
 0x544   : > { %v1525_v25 = vpop.permute.xlu0 %1524 }
 0x545   : > { %4112 = vmatpush3.bf16.msra.mxu0 %v4109_v55 }
 0x546   : > { %4114 = vmatprep.subr.bf16.mxu0 %v4113_v39 }
 0x547   : > { %1900 = vperm.xlu1 %4365, %v5234_v49   ;;  %1858 = vperm.xlu0 %4375, %v5241_v28   ;;  %v1529_v33 = vpop.permute.xlu1 %1528 }
 0x548   : > { %v1537_v12 = vpop.permute.xlu0 %1536 }
 0x549   : > { %4116 = vmatpush3.bf16.msra.mxu0 %v4113_v39 }
 0x54a   : > { %4118 = vmatprep.subr.bf16.mxu0 %v4117_v59 }
 0x54b   : > { %4366 = vset.pattern.permute.xlu1 %v4599_v10  ;;  %1873 = vperm.xlu0 %4375, %v1821_v27   ;;  %v1533_v26 = vpop.permute.xlu1 %1532 }
 0x54c   : > { %1946 = vperm.xlu1 %4366, %v5236_v53   ;;  %v1545_v21 = vpop.permute.xlu0 %1544 }
 0x54d   : > { %4120 = vmatpush3.bf16.msra.mxu0 %v4117_v59 }
 0x54f   : > { %4377 = vset.pattern.permute.xlu0 %v4599_v10  ;;  %v1541_v55 = vpop.permute.xlu1 %1540 }
 0x550   : > { %3878 = vmatmul.mubr.msk.f32.vlgmr.msra.gmra.mrb[16].mxu0 %vm477_vm6, %v1558_v8  ;;  %4367 = vset.pattern.permute.xlu1 %v4596_v0 }
 0x551   : > { %3880 = vmatprep.mubr.msk.f32.mxu0 %vm477_vm6, %v1560_v24  ;;  %1853 = vperm.xlu1 %4367, %v1817_v45  }
 0x552   : > { %1942 = vperm.xlu0 %4377, %v5226_v43  }
 0x554   : > { %3881 = vmatmul.mubr.msk.f32.gmra.mrb[18].mxu0 %vm477_vm6, %v1562_v2 }
 0x555   : > { %3883 = vmatprep.mubr.msk.f32.mxu0 %vm477_vm6, %v1564_v62  ;;  %4368 = vset.pattern.permute.xlu1 %v4600_v14  ;;  %v1553_v62 = vpop.permute.xlu0 %1552 }
 0x556   : > { %1994 = vperm.xlu1 %4368, %v5226_v43   ;;  %1954 = vperm.xlu0 %4377, %v5241_v28  }
 0x558   : > { %3884 = vmatmul.mubr.msk.f32.gmra.mrb[20].mxu0 %vm477_vm6, %v1566_v57 }
 0x559   : > { %3886 = vmatprep.mubr.msk.f32.mxu0 %vm477_vm6, %v1568_v51 }
 0x55a   : > { %1998 = vperm.xlu1 %4368, %v5236_v53   ;;  %1966 = vperm.xlu0 %4377, %v1821_v27  }
 0x55c   : > { %3887 = vmatmul.mubr.msk.f32.gmra.mrb[22].mxu0 %vm477_vm6, %v1570_v5  ;;  %v1549_v5 = vpop.permute.xlu1 %1548 }
 0x55e   : > { %4370 = vset.pattern.permute.xlu1 %v4598_v6  ;;  %4381 = vset.pattern.permute.xlu0 %v4600_v14 }
 0x55f   : > { %1910 = vperm.xlu1 %4370, %v1828_v16   ;;  %2002 = vperm.xlu0 %4381, %v1817_v45  }
 0x563   : > { %4371 = vset.pattern.permute.xlu1 %v4599_v10  ;;  %2014 = vperm.xlu0 %4381, %v5255_v42  }
 0x564   : > { %1950 = vperm.xlu1 %4371, %v1817_v45  }
 0x567   : > { %2022 = vperm.xlu0 %4381, %v5259_v50  }
 0x568   : > { %4372 = vset.pattern.permute.xlu1 %v4596_v0 }
 0x569   : > { %1863 = vperm.xlu1 %4372, %v1819_v17  }
 0x56b   : > { %2105 = vrot.lane.b32.xlu0 %v1817_v45, %s4601_s15 }
 0x56c   : > { %4384 = vset.pattern.permute.xlu0 %v4602_v22 }
 0x56d   : > { %1868 = vperm.xlu1 %4372, %v5255_v42  }
 0x56f   : > { %2109 = vrot.lane.b32.xlu0 %v1819_v17, %s4601_s15 }
 0x571   : > { %4373 = vset.pattern.permute.xlu1 %v4600_v14 }
 0x572   : > { %2006 = vperm.xlu1 %4373, %v5241_v28  }
 0x573   : > { %2113 = vrot.lane.b32.xlu0 %v1821_v27, %s4601_s15 }
 0x576   : > { %4374 = vset.pattern.permute.xlu1 %v4598_v6 }
 0x577   : > { %1915 = vperm.xlu1 %4374, %v5270_v32   ;;  %2070 = vperm.xlu0 %4384, %v1825_v19  }
 0x57b   : > { %4376 = vset.pattern.permute.xlu1 %v4599_v10  ;;  %2082 = vperm.xlu0 %4384, %v1828_v16  }
 0x57c   : > { %1958 = vperm.xlu1 %4376, %v1819_v17  }
 0x57f   : > { %2090 = vperm.xlu0 %4384, %v1830_v15  }
 0x580   : > { %1962 = vperm.xlu1 %4376, %v5255_v42  }
 0x583   : > { %2098 = vperm.xlu0 %4384, %v1832_v4  }
 0x584   : > { %4378 = vset.pattern.permute.xlu1 %v4596_v0 }
 0x585   : > { %1878 = vperm.xlu1 %4378, %v5259_v50  }
 0x587   : > { %4387 = vset.pattern.permute.xlu0 %v4597_v1 }
 0x589   : > { %4379 = vset.pattern.permute.xlu1 %v4600_v14 }
 0x58a   : > { %2010 = vperm.xlu1 %4379, %v1819_v17  }
 0x58e   : > { %4380 = vset.pattern.permute.xlu1 %v4598_v6 }
 0x58f   : > { %1925 = vperm.xlu1 %4380, %v5280_v54  }
 0x593   : > { %1930 = vperm.xlu1 %4380, %v1832_v4  }
 0x597   : > { %4382 = vset.pattern.permute.xlu1 %v4599_v10 }
 0x598   : > { %1970 = vperm.xlu1 %4382, %v5259_v50  }
 0x59c   : > { %4383 = vset.pattern.permute.xlu1 %v4600_v14 }
 0x59d   : > { %2018 = vperm.xlu1 %4383, %v1821_v27  }
 0x5a1   : > { %2101 = vrot.lane.b32.xlu1 %v5226_v43, %s4601_s15 }
 0x5a2   : > { %4385 = vset.pattern.permute.xlu1 %v4602_v22 }
 0x5a5   : > { %2103 = vrot.lane.b32.xlu1 %v5236_v53, %s4601_s15 }
 0x5a9   : > { %2107 = vrot.lane.b32.xlu1 %v5241_v28, %s4601_s15 }
 0x5ad   : > { %2111 = vrot.lane.b32.xlu1 %v5255_v42, %s4601_s15 }
 0x5b1   : > { %2115 = vrot.lane.b32.xlu1 %v5259_v50, %s4601_s15 }
 0x5b5   : > { %2074 = vperm.xlu1 %4385, %v5234_v49  }
 0x5b9   : > { %2078 = vperm.xlu1 %4385, %v5228_v11  }
 0x5bd   : > { %2086 = vperm.xlu1 %4385, %v5270_v32  }
 0x5c1   : > { %2094 = vperm.xlu1 %4385, %v5280_v54  }
 0x5c5   : > { %4386 = vset.pattern.permute.xlu1 %v4607_v47 }
 0x623   : > { %v3879_v48 = vpop.f32.mrb[16].mxu0 }
 0x624   : > { %v1659_v63 = vadd.f32 %v3879_v48, %v1529_v33  ;;  %v1653_v20 = vpop.f32.mrb[17].mxu0  ;;  %v1723_v33 = vpop.permute.xlu1 %1722 }
 0x625   : > { %v1654_v58 = vadd.f32 %v1653_v20, %v1525_v25  ;;  %v1725_v25 = vpop.permute.xlu0 %1724 }
 0x626   : > { %vm1693_vm0 = vcmp.gt.f32.partialorder %v1659_v63, 0.0  ;;  %v1701_v35 = vmul.f32 0.01, %v1659_v63 }
 0x627   : > { %vm1692_vm1 = vcmp.gt.f32.partialorder %v1654_v58, 0.0  ;;  %v1700_v23 = vmul.f32 0.01, %v1654_v58  ;;  %v3882_v31 = vpop.f32.mrb[18].mxu0 }
 0x628   : > { %v1709_v18 = vsel %vm1693_vm0, %v1659_v63, %v1701_v35  ;;  %v1669_v9 = vadd.f32 %v3882_v31, %v1537_v12  ;;  %v1663_v40 = vpop.f32.mrb[19].mxu0  ;;  %v1726_v12 = vsel %vm633_vm2, %v1723_v33, %v1725_v25  ;;  %v1719_v50 = vpop.permute.xlu1 %1718 }
 0x629   : > { %v1708_v61 = vsel %vm1692_vm1, %v1654_v58, %v1700_v23  ;;  %v1664_v34 = vadd.f32 %v1663_v40, %v1533_v26 }
 0x62a   : > { %v4122_v60 = vpack.c.bf16 %v1709_v18, %v1708_v61  ;;  %vm1695_vm3 = vcmp.gt.f32.partialorder %v1669_v9, 0.0  ;;  %v1703_v56 = vmul.f32 0.01, %v1669_v9 }
 0x62b   : > { %vm1694_vm4 = vcmp.gt.f32.partialorder %v1664_v34, 0.0  ;;  %v1702_v3 = vmul.f32 0.01, %v1664_v34  ;;  %v3885_v30 = vpop.f32.mrb[20].mxu0 }
 0x62c   : > { %v1711_v39 = vsel %vm1695_vm3, %v1669_v9, %v1703_v56  ;;  %v1679_v29 = vadd.f32 %v3885_v30, %v1545_v21  ;;  %v1673_v36 = vpop.f32.mrb[21].mxu0  ;;  %4123 = vmatpush3.bf16.msra.mxu1 %v4122_v60  ;;  %v1838_v48 = vpop.permute.xlu1 %1837 }
 0x62d   : > { %v1710_v8 = vsel %vm1694_vm4, %v1664_v34, %v1702_v3  ;;  %v1674_v59 = vadd.f32 %v1673_v36, %v1541_v55  ;;  %4124 = vmatprep.subr.bf16.mxu1 %v4604_v41  ;;  %v1834_v36 = vsub.f32 1.0, %v5223_v52 }
 0x62e   : > { %v4125_v24 = vpack.c.bf16 %v1711_v39, %v1710_v8  ;;  %vm1697_vm5 = vcmp.gt.f32.partialorder %v1679_v29, 0.0  ;;  %v1705_v2 = vmul.f32 0.01, %v1679_v29  ;;  %v1824_v39 = vld [vmem:[#allocation2 + $0x188] sm:$0x3f]  ;;  %v1810_v8 = vpop.permute.xlu0 %1809 }
 0x62f   : > { %vm1696_vm7 = vcmp.gt.f32.partialorder %v1674_v59, 0.0  ;;  %v1704_v57 = vmul.f32 0.01, %v1674_v59  ;;  %v3888_v51 = vpop.f32.mrb[22].mxu0  ;;  %2270 = vrot.lane.b32.xlu0 %v1824_v39, %s4603_s17 }
 0x630   : > { %v1713_v43 = vsel %vm1697_vm5, %v1679_v29, %v1705_v2  ;;  %v1689_v15 = vadd.f32 %v3888_v51, %v1553_v62  ;;  %v1683_v19 = vpop.f32.mrb[23].mxu0  ;;  %4126 = vmatpush3.bf16.msra.mxu1 %v4125_v24  ;;  %v5311_v26 = vpop.permute.xlu1 %1843  ;;  %v1823_v29 = vld [vmem:[#allocation2 + $0x180] sm:$0x3f] }
 0x631   : > { %v1712_v53 = vsel %vm1696_vm7, %v1674_v59, %v1704_v57  ;;  %v1684_v28 = vadd.f32 %v1683_v19, %v1549_v5  ;;  %4127 = vmatprep.subr.bf16.mxu1 %v4604_v41  ;;  %2268 = vrot.lane.b32.xlu1 %v1823_v29, %s4603_s17 }
 0x632   : > { %v4128_v27 = vpack.c.bf16 %v1713_v43, %v1712_v53  ;;  %vm1699_vm8 = vcmp.gt.f32.partialorder %v1689_v15, 0.0  ;;  %v1707_v45 = vmul.f32 0.01, %v1689_v15  ;;  %v1906_v59 = vpop.permute.xlu0 %1905 }
 0x633   : > { %vm1698_vm10 = vcmp.gt.f32.partialorder %v1684_v28, 0.0  ;;  %v1706_v16 = vmul.f32 0.01, %v1684_v28  ;;  %2355 = vperm.xlu0 %4387, %v1834_v36  }
 0x634   : > { %v1715_v17 = vsel %vm1699_vm8, %v1689_v15, %v1707_v45  ;;  %4129 = vmatpush3.bf16.msra.mxu1 %v4128_v27  ;;  %v5313_v49 = vpop.permute.xlu1 %1895 }
 0x635   : > { %v1714_v4 = vsel %vm1698_vm10, %v1684_v28, %v1706_v16  ;;  %4130 = vmatprep.subr.bf16.mxu1 %v4604_v41  ;;  %2264 = vperm.xlu1 %4386, %v1824_v39  }
 0x636   : > { %v4131_v42 = vpack.c.bf16 %v1715_v17, %v1714_v4  ;;  %v1921_v24 = vpop.permute.xlu0 %1920 }
 0x637   : > { %4394 = vset.pattern.permute.xlu0 %v4598_v6 }
 0x638   : > { %4132 = vmatpush3.bf16.msra.mxu1 %v4131_v42  ;;  %v5315_v63 = vpop.permute.xlu1 %1900 }
 0x639   : > { %4149 = vmatprep.subr.bf16.mxu1 %v4604_v41  ;;  %4388 = vset.pattern.permute.xlu1 %v4597_v1 }
 0x63a   : > { %v1849_v62 = vpop.permute.xlu0 %1848 }
 0x63b   : > { %3906 = vmatmul.mubr.msk.f32.vlgmr.msra.gmra.mrb[4].mxu1 %vm477_vm6, %v1726_v12 }
 0x63c   : > { %3952 = vmatprep.mubr.msk.f32.mxu1 %vm4605_vm9, %v4606_v46  ;;  %v1947_v20 = vpop.permute.xlu1 %1946 }
 0x63e   : > { %v1859_v5 = vpop.permute.xlu0 %1858 }
 0x640   : > { %v5317_v58 = vpop.permute.xlu1 %1853 }
 0x642   : > { %v1874_v52 = vpop.permute.xlu0 %1873 }
 0x644   : > { %v5319_v11 = vpop.permute.xlu1 %1994 }
 0x646   : > { %v1943_v19 = vpop.permute.xlu0 %1942 }
 0x648   : > { %v1999_v35 = vpop.permute.xlu1 %1998 }
 0x64a   : > { %v1955_v53 = vpop.permute.xlu0 %1954 }
 0x64c   : > { %v5321_v23 = vpop.permute.xlu1 %1910 }
 0x64e   : > { %v1967_v17 = vpop.permute.xlu0 %1966 }
 0x650   : > { %v5323_v32 = vpop.permute.xlu1 %1950 }
 0x652   : > { %v2003_v42 = vpop.permute.xlu0 %2002 }
 0x654   : > { %v1864_v54 = vpop.permute.xlu1 %1863 }
 0x658   : > { %v1869_v31 = vpop.permute.xlu1 %1868 }
 0x65c   : > { %v2007_v18 = vpop.permute.xlu1 %2006 }
 0x660   : > { %v1916_v9 = vpop.permute.xlu1 %1915 }
 0x664   : > { %v1959_v40 = vpop.permute.xlu1 %1958 }
 0x668   : > { %v1963_v21 = vpop.permute.xlu1 %1962 }
 0x66c   : > { %v5325_v61 = vpop.permute.xlu1 %1878 }
 0x670   : > { %v5327_v34 = vpop.permute.xlu1 %2010 }
 0x674   : > { %v5329_v55 = vpop.permute.xlu1 %1925 }
 0x678   : > { %v5331_v60 = vpop.permute.xlu1 %1930 }
 0x67c   : > { %v5333_v56 = vpop.permute.xlu1 %1970 }
 0x680   : > { %v5335_v3 = vpop.permute.xlu1 %2018 }
 0x684   : > { %v2102_v30 = vpop.permute.xlu1 %2101 }
 0x685   : > { %3924 = vmatprep.mubr.msk.f32.mxu0 %vm477_vm6, %v2102_v30 }
 0x70e   : > { %v1795_v2 = vpop.f32.mrb[4].mxu1 }
 0x70f   : > { %v1796_v57 = vadd.f32 %v1795_v2, %v1719_v50  ;;  %v3907_v51 = vpop.f32.mrb[5].mxu1 }
 0x711   : > { %4446 = vtanh.f32 %v1796_v57  ;;  %v1804_v45 = vrot.slane %v1796_v57, 3 }
 0x71b   : > { %v4447_v43 = vpop.eup %4446 }
 0x71c   : > { %v1800_v15 = vmul.f32 1.442695, %v4447_v43 }
 0x71e   : > { %4448 = vpow2.f32 %v1800_v15 }
 0x728   : > { %v4449_v28 = vpop.eup %4448 }
 0x729   : > { %v1802_v27 = vmul.f32 %v4449_v28, %v5192_v13 }
 0x72b   : > { %v1806_v16 = vadd.f32 %v1804_v45, %v1802_v27 }
 0x72d   : > { %v1812_v4 = vmul.f32 %v1810_v8, %v1806_v16  ;;  %v2015_v16 = vpop.permute.xlu0 %2014 }
 0x72f   : > { %v5345_v25 = vadd.f32 %v1812_v4, %v5195_v7 }
 0x731   : > { %v5348_v33 = vmul.f32 %v1838_v48, %v5345_v25 }
 0x733   : > { %v1884_v12 = vrot.slane %v5348_v33, %v4844_v37  ;;  %v1976_v50 = vrot.slane %v5348_v33, %v4846_v38  ;;  %v2028_v13 = vrot.slane %v5348_v33, %v4860_v44 }
 0x735   : > { %v1890_v30 = vmul.f32 %v1884_v12, %v1869_v31  ;;  %v2032_v39 = vmul.f32 %v2028_v13, %v2007_v18  ;;  %v1886_v29 = vmul.f32 %v1884_v12, %v1849_v62  ;;  %v1978_v36 = vmul.f32 %v1976_v50, %v1947_v20 }
 0x736   : > { %v2030_v8 = vmul.f32 %v2028_v13, %v1999_v35  ;;  %v1889_v7 = vmul.f32 %v1884_v12, %v1864_v54  ;;  %v1888_v2 = vmul.f32 %v1884_v12, %v1859_v5  ;;  %v1891_v51 = vmul.f32 %v1884_v12, %v1874_v52 }
 0x737   : > { %v1938_v57 = vadd.f32 %v1921_v24, %v1890_v30  ;;  %v1934_v48 = vadd.f32 %v5315_v63, %v1886_v29  ;;  %v1982_v43 = vmul.f32 %v1976_v50, %v1963_v21  ;;  %v1981_v27 = vmul.f32 %v1976_v50, %v1959_v40 }
 0x738   : > { %v1937_v15 = vadd.f32 %v1916_v9, %v1889_v7  ;;  %v1936_v28 = vadd.f32 %v5321_v23, %v1888_v2  ;;  %v1885_v45 = vmul.f32 %v1884_v12, %v5311_v26  ;;  %v1977_v18 = vmul.f32 %v1976_v50, %v1943_v19 }
 0x739   : > { %v1986_v4 = vadd.f32 %v1978_v36, %v1934_v48  ;;  %v1990_v31 = vadd.f32 %v1982_v43, %v1938_v57  ;;  %v1892_v20 = vmul.f32 %v1884_v12, %v5325_v61  ;;  %v1980_v24 = vmul.f32 %v1976_v50, %v1955_v53 }
 0x73a   : > { %v1989_v35 = vadd.f32 %v1981_v27, %v1937_v15  ;;  %v1933_v54 = vadd.f32 %v5313_v49, %v1885_v45  ;;  %v2033_v63 = vmul.f32 %v2028_v13, %v5327_v34  ;;  %v2029_v21 = vmul.f32 %v2028_v13, %v5319_v11  ;;  %v2023_v11 = vpop.permute.xlu0 %2022 }
 0x73b   : > { %v1983_v9 = vmul.f32 %v1976_v50, %v1967_v17  ;;  %v1939_v23 = vadd.f32 %v5329_v55, %v1891_v51  ;;  %v1887_v40 = vmul.f32 %v1884_v12, %v5317_v58  ;;  %v2038_v26 = vadd.f32 %v2030_v8, %v1986_v4 }
 0x73c   : > { %v1985_v62 = vadd.f32 %v1977_v18, %v1933_v54  ;;  %v1988_v5 = vadd.f32 %v1980_v24, %v1936_v28  ;;  %v2041_v52 = vadd.f32 %v2033_v63, %v1989_v35  ;;  %v1979_v61 = vmul.f32 %v1976_v50, %v5323_v32 }
 0x73d   : > { %v1991_v19 = vadd.f32 %v1983_v9, %v1939_v23  ;;  %v1935_v30 = vadd.f32 %v1906_v59, %v1887_v40  ;;  %v1940_v49 = vadd.f32 %v5331_v60, %v1892_v20  ;;  %v2031_v34 = vmul.f32 %v2028_v13, %v2003_v42  ;;  %v2104_v20 = vpop.permute.xlu1 %2103  ;;  %v5376_v40 = vld [vmem:[#allocation2 + $0x208] sm:$0x7] }
 0x73e   : > { %v2037_v53 = vadd.f32 %v2029_v21, %v1985_v62  ;;  %v2040_v29 = vadd.f32 %v2032_v39, %v1988_v5  ;;  %v2034_v36 = vmul.f32 %v2028_v13, %v2015_v16  ;;  %v2057_v17 = vmul.f32 0.01, %v2041_v52  ;;  %v2106_v54 = vpop.permute.xlu0 %2105  ;;  %2383 = vperm.xlu1 %4388, %v5376_v40   ;;  %v5381_v62 = vld [vmem:[#allocation2 + $0x228] sm:$0xff]  ;;  %v2376_v5 = vld [vmem:[#allocation2 + $0x258] sm:$0xff] }
 0x73f   : > { %v1987_v7 = vadd.f32 %v1979_v61, %v1935_v30  ;;  %v1984_v55 = vmul.f32 %v1976_v50, %v5333_v56  ;;  %v2035_v58 = vmul.f32 %v2028_v13, %v5335_v3  ;;  %vm2046_vm12 = vcmp.gt.f32.partialorder %v2038_v26, 0.0  ;;  %2451 = vperm.xlu0 %4394, %v5381_v62   ;;  %v5389_v30 = vld [vmem:[#allocation2 + $0x210] sm:$0xff] }
 0x740   : > { %v2042_v12 = vadd.f32 %v2034_v36, %v1990_v31  ;;  %vm2045_vm11 = vcmp.gt.f32.partialorder %v2037_v53, 0.0  ;;  %v2053_v8 = vmul.f32 0.01, %v2037_v53  ;;  %v2036_v32 = vmul.f32 %v2028_v13, %v2023_v11  ;;  %v5394_v61 = vld [vmem:[#allocation2 + $0x230] sm:$0xff]  ;;  %v2365_v36 = vld [vmem:[#allocation2 + $0x240] sm:$0xff] }
 0x741   : > { %v2039_v59 = vadd.f32 %v2031_v34, %v1987_v7  ;;  %v1992_v2 = vadd.f32 %v1984_v55, %v1940_v49  ;;  %v2054_v57 = vmul.f32 0.01, %v2038_v26  ;;  %v2043_v60 = vadd.f32 %v2035_v58, %v1991_v19  ;;  %v2108_v24 = vpop.permute.xlu1 %2107  ;;  %v5387_v19 = vld [vmem:[#allocation2 + $0x218] sm:$0xff]  ;;  %v2367_v49 = vld [vmem:[#allocation2 + $0x260] sm:$0xff]  ;;  %v5408_v34 = vld [vmem:[#allocation2 + $0x250] sm:$0xff] }
 0x742   : > { %v2061_v48 = vsel %vm2045_vm11, %v2037_v53, %v2053_v8  ;;  %vm2048_vm13 = vcmp.gt.f32.partialorder %v2040_v29, 0.0  ;;  %v2056_v42 = vmul.f32 0.01, %v2040_v29  ;;  %v2058_v51 = vmul.f32 0.01, %v2042_v12  ;;  %v2110_v63 = vpop.permute.xlu0 %2109  ;;  %4389 = vset.pattern.permute.xlu1 %v4596_v0  ;;  %v2363_v53 = vld [vmem:[#allocation2 + $0x220] sm:$0xff] }
 0x743   : > { %v2055_v39 = vmul.f32 0.01, %v2039_v59  ;;  %v2044_v43 = vadd.f32 %v2036_v32, %v1992_v2  ;;  %v2062_v15 = vsel %vm2046_vm12, %v2038_v26, %v2054_v57  ;;  %vm2047_vm14 = vcmp.gt.f32.partialorder %v2039_v59, 0.0  ;;  %v5379_v26 = vld [vmem:[#allocation2 + $0x200] sm:$0xff]  ;;  %2466 = vperm.xlu0 %4394, %v2376_v5   ;;  %v5412_v11 = vld [vmem:[#allocation2 + $0x270] sm:$0xff]  ;;  %v2378_v7 = vld [vmem:[#allocation2 + $0x278] sm:$0xff] }
 0x744   : > { %v4133_v28 = vpack.c.bf16 %v2062_v15, %v2061_v48  ;;  %v2064_v56 = vsel %vm2048_vm13, %v2040_v29, %v2056_v42  ;;  %vm2049_vm15 = vcmp.gt.f32.partialorder %v2041_v52, 0.0  ;;  %vm2050_vm0 = vcmp.gt.f32.partialorder %v2042_v12, 0.0  ;;  %2389 = vperm.xlu1 %4389, %v5379_v26   ;;  %v2374_v29 = vld [vmem:[#allocation2 + $0x238] sm:$0xff]  ;;  %v5433_v55 = vld [vmem:[#allocation2 + $0x268] sm:$0xff] }
 0x745   : > { %v2063_v3 = vsel %vm2047_vm14, %v2039_v59, %v2055_v39  ;;  %v2060_v27 = vmul.f32 0.01, %v2044_v43  ;;  %v2059_v45 = vmul.f32 0.01, %v2043_v60  ;;  %v2065_v13 = vsel %vm2049_vm15, %v2041_v52, %v2057_v17  ;;  %v2112_v21 = vpop.permute.xlu1 %2111  ;;  %v2371_v52 = vld [vmem:[#allocation2 + $0x208] sm:$0xff] }
 0x746   : > { %4134 = vmatprep.subr.bf16.mxu0 %v4133_v28  ;;  %v4137_v50 = vpack.c.bf16 %v2064_v56, %v2063_v3  ;;  %v2066_v16 = vsel %vm2050_vm0, %v2042_v12, %v2058_v51  ;;  %vm2051_vm1 = vcmp.gt.f32.partialorder %v2043_v60, 0.0  ;;  %vm2052_vm3 = vcmp.gt.f32.partialorder %v2044_v43, 0.0  ;;  %v2114_v9 = vpop.permute.xlu0 %2113  ;;  %v5423_v17 = vld [vmem:[#allocation2 + $0x248] sm:$0xff] }
 0x747   : > { %4136 = vmatpush3.bf16.msra.mxu0 %v4133_v28  ;;  %v4141_v4 = vpack.c.bf16 %v2066_v16, %v2065_v13  ;;  %v2067_v31 = vsel %vm2051_vm1, %v2043_v60, %v2059_v45  ;;  %v2068_v18 = vsel %vm2052_vm3, %v2044_v43, %v2060_v27  ;;  %4400 = vset.pattern.permute.xlu0 %v4596_v0 }
 0x748   : > { %4138 = vmatprep.subr.bf16.mxu0 %v4137_v50  ;;  %v4145_v35 = vpack.c.bf16 %v2068_v18, %v2067_v31  ;;  %4390 = vset.pattern.permute.xlu1 %v4598_v6 }
 0x749   : > { %v2116_v23 = vpop.permute.xlu1 %2115  ;;  %2441 = vperm.xlu1 %4390, %v2371_v52   ;;  %2394 = vperm.xlu0 %4400, %v5389_v30  }
 0x74a   : > { %v2071_v58 = vpop.permute.xlu0 %2070 }
 0x74b   : > { %4140 = vmatpush3.bf16.msra.mxu0 %v4137_v50 }
 0x74c   : > { %4142 = vmatprep.subr.bf16.mxu0 %v4141_v4 }
 0x74d   : > { %2446 = vperm.xlu1 %4390, %v5387_v19   ;;  %2404 = vperm.xlu0 %4400, %v5394_v61   ;;  %v2075_v12 = vpop.permute.xlu1 %2074 }
 0x74e   : > { %v2083_v8 = vpop.permute.xlu0 %2082 }
 0x74f   : > { %4144 = vmatpush3.bf16.msra.mxu0 %v4141_v4 }
 0x750   : > { %4146 = vmatprep.subr.bf16.mxu0 %v4145_v35 }
 0x751   : > { %4391 = vset.pattern.permute.xlu1 %v4599_v10  ;;  %2419 = vperm.xlu0 %4400, %v2367_v49   ;;  %v2079_v2 = vpop.permute.xlu1 %2078 }
 0x752   : > { %2492 = vperm.xlu1 %4391, %v5389_v30   ;;  %v2091_v28 = vpop.permute.xlu0 %2090 }
 0x753   : > { %4148 = vmatpush3.bf16.msra.mxu0 %v4145_v35 }
 0x755   : > { %4402 = vset.pattern.permute.xlu0 %v4599_v10  ;;  %v2087_v50 = vpop.permute.xlu1 %2086 }
 0x756   : > { %3925 = vmatmul.mubr.msk.f32.vlgmr.msra.gmra.mrb[24].mxu0 %vm477_vm6, %v2104_v20  ;;  %4392 = vset.pattern.permute.xlu1 %v4596_v0 }
 0x757   : > { %3927 = vmatprep.mubr.msk.f32.mxu0 %vm477_vm6, %v2106_v54  ;;  %2399 = vperm.xlu1 %4392, %v2363_v53  }
 0x758   : > { %2488 = vperm.xlu0 %4402, %v5379_v26  }
 0x75a   : > { %3928 = vmatmul.mubr.msk.f32.gmra.mrb[26].mxu0 %vm477_vm6, %v2108_v24 }
 0x75b   : > { %3930 = vmatprep.mubr.msk.f32.mxu0 %vm477_vm6, %v2110_v63  ;;  %4393 = vset.pattern.permute.xlu1 %v4600_v14  ;;  %v2099_v63 = vpop.permute.xlu0 %2098 }
 0x75c   : > { %2540 = vperm.xlu1 %4393, %v5379_v26   ;;  %2500 = vperm.xlu0 %4402, %v5394_v61  }
 0x75e   : > { %3931 = vmatmul.mubr.msk.f32.gmra.mrb[28].mxu0 %vm477_vm6, %v2112_v21 }
 0x75f   : > { %3933 = vmatprep.mubr.msk.f32.mxu0 %vm477_vm6, %v2114_v9 }
 0x760   : > { %2544 = vperm.xlu1 %4393, %v5389_v30   ;;  %2512 = vperm.xlu0 %4402, %v2367_v49  }
 0x762   : > { %3934 = vmatmul.mubr.msk.f32.gmra.mrb[30].mxu0 %vm477_vm6, %v2116_v23  ;;  %v2095_v23 = vpop.permute.xlu1 %2094 }
 0x764   : > { %4395 = vset.pattern.permute.xlu1 %v4598_v6  ;;  %4406 = vset.pattern.permute.xlu0 %v4600_v14 }
 0x765   : > { %2456 = vperm.xlu1 %4395, %v2374_v29   ;;  %2548 = vperm.xlu0 %4406, %v2363_v53  }
 0x769   : > { %4396 = vset.pattern.permute.xlu1 %v4599_v10  ;;  %2560 = vperm.xlu0 %4406, %v5408_v34  }
 0x76a   : > { %2496 = vperm.xlu1 %4396, %v2363_v53  }
 0x76d   : > { %2568 = vperm.xlu0 %4406, %v5412_v11  }
 0x76e   : > { %4397 = vset.pattern.permute.xlu1 %v4596_v0 }
 0x76f   : > { %2409 = vperm.xlu1 %4397, %v2365_v36  }
 0x771   : > { %2651 = vrot.lane.b32.xlu0 %v2363_v53, %s4601_s15 }
 0x772   : > { %4409 = vset.pattern.permute.xlu0 %v4602_v22 }
 0x773   : > { %2414 = vperm.xlu1 %4397, %v5408_v34  }
 0x775   : > { %2655 = vrot.lane.b32.xlu0 %v2365_v36, %s4601_s15 }
 0x777   : > { %4398 = vset.pattern.permute.xlu1 %v4600_v14 }
 0x778   : > { %2552 = vperm.xlu1 %4398, %v5394_v61  }
 0x779   : > { %2659 = vrot.lane.b32.xlu0 %v2367_v49, %s4601_s15 }
 0x77c   : > { %4399 = vset.pattern.permute.xlu1 %v4598_v6 }
 0x77d   : > { %2461 = vperm.xlu1 %4399, %v5423_v17   ;;  %2616 = vperm.xlu0 %4409, %v2371_v52  }
 0x781   : > { %4401 = vset.pattern.permute.xlu1 %v4599_v10  ;;  %2628 = vperm.xlu0 %4409, %v2374_v29  }
 0x782   : > { %2504 = vperm.xlu1 %4401, %v2365_v36  }
 0x785   : > { %2636 = vperm.xlu0 %4409, %v2376_v5  }
 0x786   : > { %2508 = vperm.xlu1 %4401, %v5408_v34  }
 0x789   : > { %2644 = vperm.xlu0 %4409, %v2378_v7  }
 0x78a   : > { %4403 = vset.pattern.permute.xlu1 %v4596_v0 }
 0x78b   : > { %2424 = vperm.xlu1 %4403, %v5412_v11  }
 0x78d   : > { %4412 = vset.pattern.permute.xlu0 %v4597_v1 }
 0x78f   : > { %4404 = vset.pattern.permute.xlu1 %v4600_v14 }
 0x790   : > { %2556 = vperm.xlu1 %4404, %v2365_v36  }
 0x794   : > { %4405 = vset.pattern.permute.xlu1 %v4598_v6 }
 0x795   : > { %2471 = vperm.xlu1 %4405, %v5433_v55  }
 0x799   : > { %2476 = vperm.xlu1 %4405, %v2378_v7  }
 0x79d   : > { %4407 = vset.pattern.permute.xlu1 %v4599_v10 }
 0x79e   : > { %2516 = vperm.xlu1 %4407, %v5412_v11  }
 0x7a2   : > { %4408 = vset.pattern.permute.xlu1 %v4600_v14 }
 0x7a3   : > { %2564 = vperm.xlu1 %4408, %v2367_v49  }
 0x7a7   : > { %2647 = vrot.lane.b32.xlu1 %v5379_v26, %s4601_s15 }
 0x7a8   : > { %4410 = vset.pattern.permute.xlu1 %v4602_v22 }
 0x7ab   : > { %2649 = vrot.lane.b32.xlu1 %v5389_v30, %s4601_s15 }
 0x7af   : > { %2653 = vrot.lane.b32.xlu1 %v5394_v61, %s4601_s15 }
 0x7b3   : > { %2657 = vrot.lane.b32.xlu1 %v5408_v34, %s4601_s15 }
 0x7b7   : > { %2661 = vrot.lane.b32.xlu1 %v5412_v11, %s4601_s15 }
 0x7bb   : > { %2620 = vperm.xlu1 %4410, %v5387_v19  }
 0x7bf   : > { %2624 = vperm.xlu1 %4410, %v5381_v62  }
 0x7c3   : > { %2632 = vperm.xlu1 %4410, %v5423_v17  }
 0x7c7   : > { %2640 = vperm.xlu1 %4410, %v5433_v55  }
 0x7cb   : > { %4411 = vset.pattern.permute.xlu1 %v4607_v47 }
 0x829   : > { %v3926_v59 = vpop.f32.mrb[24].mxu0 }
 0x82a   : > { %v2205_v32 = vadd.f32 %v3926_v59, %v2075_v12  ;;  %v2199_v57 = vpop.f32.mrb[25].mxu0  ;;  %v2269_v12 = vpop.permute.xlu1 %2268 }
 0x82b   : > { %v2200_v60 = vadd.f32 %v2199_v57, %v2071_v58  ;;  %v2271_v58 = vpop.permute.xlu0 %2270 }
 0x82c   : > { %vm2239_vm4 = vcmp.gt.f32.partialorder %v2205_v32, 0.0  ;;  %v2247_v48 = vmul.f32 0.01, %v2205_v32 }
 0x82d   : > { %vm2238_vm5 = vcmp.gt.f32.partialorder %v2200_v60, 0.0  ;;  %v2246_v42 = vmul.f32 0.01, %v2200_v60  ;;  %v3929_v39 = vpop.f32.mrb[26].mxu0 }
 0x82e   : > { %v2255_v51 = vsel %vm2239_vm4, %v2205_v32, %v2247_v48  ;;  %v2215_v43 = vadd.f32 %v3929_v39, %v2083_v8  ;;  %v2209_v15 = vpop.f32.mrb[27].mxu0  ;;  %v2272_v8 = vsel %vm633_vm2, %v2269_v12, %v2271_v58  ;;  %v2265_v11 = vpop.permute.xlu1 %2264 }
 0x82f   : > { %v2254_v56 = vsel %vm2238_vm5, %v2200_v60, %v2246_v42  ;;  %v2210_v3 = vadd.f32 %v2209_v15, %v2079_v2 }
 0x830   : > { %v4150_v27 = vpack.c.bf16 %v2255_v51, %v2254_v56  ;;  %vm2241_vm7 = vcmp.gt.f32.partialorder %v2215_v43, 0.0  ;;  %v2249_v45 = vmul.f32 0.01, %v2215_v43 }
 0x831   : > { %vm2240_vm8 = vcmp.gt.f32.partialorder %v2210_v3, 0.0  ;;  %v2248_v13 = vmul.f32 0.01, %v2210_v3  ;;  %v3932_v16 = vpop.f32.mrb[28].mxu0 }
 0x832   : > { %v2257_v4 = vsel %vm2241_vm7, %v2215_v43, %v2249_v45  ;;  %v2225_v31 = vadd.f32 %v3932_v16, %v2091_v28  ;;  %v2219_v18 = vpop.f32.mrb[29].mxu0  ;;  %4151 = vmatpush3.bf16.msra.mxu1 %v4150_v27  ;;  %v2384_v59 = vpop.permute.xlu1 %2383 }
 0x833   : > { %v2256_v20 = vsel %vm2240_vm8, %v2210_v3, %v2248_v13  ;;  %v2220_v35 = vadd.f32 %v2219_v18, %v2087_v50  ;;  %4152 = vmatprep.subr.bf16.mxu1 %v4604_v41  ;;  %v2380_v18 = vsub.f32 1.0, %v5376_v40 }
 0x834   : > { %v4153_v54 = vpack.c.bf16 %v2257_v4, %v2256_v20  ;;  %vm2243_vm10 = vcmp.gt.f32.partialorder %v2225_v31, 0.0  ;;  %v2251_v24 = vmul.f32 0.01, %v2225_v31  ;;  %v2370_v4 = vld [vmem:[#allocation2 + $0x208] sm:$0x3f]  ;;  %v2356_v20 = vpop.permute.xlu0 %2355 }
 0x835   : > { %vm2242_vm11 = vcmp.gt.f32.partialorder %v2220_v35, 0.0  ;;  %v2250_v21 = vmul.f32 0.01, %v2220_v35  ;;  %v3935_v9 = vpop.f32.mrb[30].mxu0  ;;  %2816 = vrot.lane.b32.xlu0 %v2370_v4, %s4603_s17 }
 0x836   : > { %v2259_v26 = vsel %vm2243_vm10, %v2225_v31, %v2251_v24  ;;  %v2235_v5 = vadd.f32 %v3935_v9, %v2099_v63  ;;  %v2229_v52 = vpop.f32.mrb[31].mxu0  ;;  %4154 = vmatpush3.bf16.msra.mxu1 %v4153_v54  ;;  %v5464_v2 = vpop.permute.xlu1 %2389  ;;  %v2369_v31 = vld [vmem:[#allocation2 + $0x200] sm:$0x3f] }
 0x837   : > { %v2258_v30 = vsel %vm2242_vm11, %v2220_v35, %v2250_v21  ;;  %v2230_v61 = vadd.f32 %v2229_v52, %v2095_v23  ;;  %4155 = vmatprep.subr.bf16.mxu1 %v4604_v41  ;;  %2814 = vrot.lane.b32.xlu1 %v2369_v31, %s4603_s17 }
 0x838   : > { %v4156_v49 = vpack.c.bf16 %v2259_v26, %v2258_v30  ;;  %vm2245_vm12 = vcmp.gt.f32.partialorder %v2235_v5, 0.0  ;;  %v2253_v53 = vmul.f32 0.01, %v2235_v5  ;;  %v2452_v35 = vpop.permute.xlu0 %2451 }
 0x839   : > { %vm2244_vm13 = vcmp.gt.f32.partialorder %v2230_v61, 0.0  ;;  %v2252_v29 = vmul.f32 0.01, %v2230_v61  ;;  %2901 = vperm.xlu0 %4412, %v2380_v18  }
 0x83a   : > { %v2261_v36 = vsel %vm2245_vm12, %v2235_v5, %v2253_v53  ;;  %4157 = vmatpush3.bf16.msra.mxu1 %v4156_v49  ;;  %v5466_v19 = vpop.permute.xlu1 %2441 }
 0x83b   : > { %v2260_v7 = vsel %vm2244_vm13, %v2230_v61, %v2252_v29  ;;  %4158 = vmatprep.subr.bf16.mxu1 %v4604_v41  ;;  %2810 = vperm.xlu1 %4411, %v2370_v4  }
 0x83c   : > { %v4159_v34 = vpack.c.bf16 %v2261_v36, %v2260_v7  ;;  %v2467_v54 = vpop.permute.xlu0 %2466 }
 0x83d   : > { %4419 = vset.pattern.permute.xlu0 %v4598_v6 }
 0x83e   : > { %4160 = vmatpush3.bf16.msra.mxu1 %v4159_v34  ;;  %v5468_v32 = vpop.permute.xlu1 %2446 }
 0x83f   : > { %4177 = vmatprep.subr.bf16.mxu1 %v4604_v41  ;;  %4413 = vset.pattern.permute.xlu1 %v4597_v1 }
 0x840   : > { %v2395_v24 = vpop.permute.xlu0 %2394 }
 0x841   : > { %3953 = vmatmul.mubr.msk.f32.vlgmr.msra.gmra.mrb[6].mxu1 %vm477_vm6, %v2272_v8 }
 0x842   : > { %3999 = vmatprep.mubr.msk.f32.mxu1 %vm4605_vm9, %v4606_v46  ;;  %v5470_v57 = vpop.permute.xlu1 %2492 }
 0x844   : > { %v2405_v23 = vpop.permute.xlu0 %2404 }
 0x846   : > { %v5472_v62 = vpop.permute.xlu1 %2399 }
 0x848   : > { %v2420_v40 = vpop.permute.xlu0 %2419 }
 0x84a   : > { %v5474_v60 = vpop.permute.xlu1 %2540 }
 0x84c   : > { %v2489_v52 = vpop.permute.xlu0 %2488 }
 0x84e   : > { %v5476_v48 = vpop.permute.xlu1 %2544 }
 0x850   : > { %v2501_v30 = vpop.permute.xlu0 %2500 }
 0x852   : > { %v5478_v17 = vpop.permute.xlu1 %2456 }
 0x854   : > { %v2513_v36 = vpop.permute.xlu0 %2512 }
 0x856   : > { %v5480_v55 = vpop.permute.xlu1 %2496 }
 0x858   : > { %v2549_v34 = vpop.permute.xlu0 %2548 }
 0x85a   : > { %v2410_v42 = vpop.permute.xlu1 %2409 }
 0x85e   : > { %v2415_v39 = vpop.permute.xlu1 %2414 }
 0x862   : > { %v2553_v51 = vpop.permute.xlu1 %2552 }
 0x866   : > { %v2462_v43 = vpop.permute.xlu1 %2461 }
 0x86a   : > { %v2505_v15 = vpop.permute.xlu1 %2504 }
 0x86e   : > { %v2509_v28 = vpop.permute.xlu1 %2508 }
 0x872   : > { %v2425_v56 = vpop.permute.xlu1 %2424 }
 0x876   : > { %v5482_v3 = vpop.permute.xlu1 %2556 }
 0x87a   : > { %v5484_v50 = vpop.permute.xlu1 %2471 }
 0x87e   : > { %v5486_v27 = vpop.permute.xlu1 %2476 }
 0x882   : > { %v5488_v45 = vpop.permute.xlu1 %2516 }
 0x886   : > { %v5490_v13 = vpop.permute.xlu1 %2564 }
 0x88a   : > { %v2648_v16 = vpop.permute.xlu1 %2647 }
 0x88b   : > { %3971 = vmatprep.mubr.msk.f32.mxu0 %vm477_vm6, %v2648_v16 }
 0x914   : > { %v2341_v63 = vpop.f32.mrb[6].mxu1 }
 0x915   : > { %v2342_v21 = vadd.f32 %v2341_v63, %v2265_v11  ;;  %v3954_v9 = vpop.f32.mrb[7].mxu1 }
 0x916   : > { %v2561_v9 = vpop.permute.xlu0 %2560 }
 0x917   : > { %4450 = vtanh.f32 %v2342_v21  ;;  %v2350_v53 = vrot.slane %v2342_v21, 3 }
 0x921   : > { %v4451_v26 = vpop.eup %4450 }
 0x922   : > { %v2346_v5 = vmul.f32 1.442695, %v4451_v26 }
 0x924   : > { %4452 = vpow2.f32 %v2346_v5 }
 0x92e   : > { %v4453_v61 = vpop.eup %4452 }
 0x92f   : > { %v2348_v49 = vmul.f32 %v4453_v61, %v5345_v25 }
 0x931   : > { %v2352_v29 = vadd.f32 %v2350_v53, %v2348_v49 }
 0x933   : > { %v2358_v7 = vmul.f32 %v2356_v20, %v2352_v29 }
 0x935   : > { %v5500_v58 = vadd.f32 %v2358_v7, %v5348_v33 }
 0x937   : > { %v5503_v12 = vmul.f32 %v2384_v59, %v5500_v58 }
 0x939   : > { %v2430_v8 = vrot.slane %v5503_v12, %v4844_v37  ;;  %v2522_v11 = vrot.slane %v5503_v12, %v4846_v38  ;;  %v2574_v25 = vrot.slane %v5503_v12, %v4860_v44 }
 0x93b   : > { %v2436_v16 = vmul.f32 %v2430_v8, %v2415_v39  ;;  %v2432_v4 = vmul.f32 %v2430_v8, %v2395_v24  ;;  %v2578_v31 = vmul.f32 %v2574_v25, %v2553_v51  ;;  %v2435_v18 = vmul.f32 %v2430_v8, %v2410_v42 }
 0x93c   : > { %v2434_v20 = vmul.f32 %v2430_v8, %v2405_v23  ;;  %v2524_v59 = vmul.f32 %v2522_v11, %v5470_v57  ;;  %v2437_v21 = vmul.f32 %v2430_v8, %v2420_v40  ;;  %v2527_v61 = vmul.f32 %v2522_v11, %v2505_v15 }
 0x93d   : > { %v2484_v33 = vadd.f32 %v2467_v54, %v2436_v16  ;;  %v2480_v63 = vadd.f32 %v5468_v32, %v2432_v4  ;;  %v2483_v26 = vadd.f32 %v2462_v43, %v2435_v18  ;;  %v2431_v49 = vmul.f32 %v2430_v8, %v5464_v2 }
 0x93e   : > { %v2482_v5 = vadd.f32 %v5478_v17, %v2434_v20  ;;  %v2576_v39 = vmul.f32 %v2574_v25, %v5476_v48  ;;  %v2528_v24 = vmul.f32 %v2522_v11, %v2509_v28  ;;  %v2438_v51 = vmul.f32 %v2430_v8, %v2425_v56 }
 0x93f   : > { %v2532_v53 = vadd.f32 %v2524_v59, %v2480_v63  ;;  %v2535_v42 = vadd.f32 %v2527_v61, %v2483_v26  ;;  %v2479_v54 = vadd.f32 %v5466_v19, %v2431_v49  ;;  %v2523_v23 = vmul.f32 %v2522_v11, %v2489_v52  ;;  %v2569_v52 = vpop.permute.xlu0 %2568 }
 0x940   : > { %v2526_v32 = vmul.f32 %v2522_v11, %v2501_v30  ;;  %v2536_v29 = vadd.f32 %v2528_v24, %v2484_v33  ;;  %v2575_v57 = vmul.f32 %v2574_v25, %v5474_v60  ;;  %v2485_v43 = vadd.f32 %v5484_v50, %v2437_v21 }
 0x941   : > { %v2433_v17 = vmul.f32 %v2430_v8, %v5472_v62  ;;  %v2531_v15 = vadd.f32 %v2523_v23, %v2479_v54  ;;  %v2579_v2 = vmul.f32 %v2574_v25, %v5482_v3  ;;  %v2529_v7 = vmul.f32 %v2522_v11, %v2513_v36  ;;  %v2650_v54 = vpop.permute.xlu1 %2649 }
 0x942   : > { %v2534_v40 = vadd.f32 %v2526_v32, %v2482_v5  ;;  %v2584_v48 = vadd.f32 %v2576_v39, %v2532_v53  ;;  %v2525_v56 = vmul.f32 %v2522_v11, %v5480_v55  ;;  %v2486_v19 = vadd.f32 %v5486_v27, %v2438_v51 }
 0x943   : > { %v2481_v28 = vadd.f32 %v2452_v35, %v2433_v17  ;;  %v2583_v30 = vadd.f32 %v2575_v57, %v2531_v15  ;;  %v2587_v4 = vadd.f32 %v2579_v2, %v2535_v42  ;;  %v2537_v60 = vadd.f32 %v2529_v7, %v2485_v43  ;;  %v2652_v32 = vpop.permute.xlu0 %2651  ;;  %v5536_v2 = vld [vmem:[#allocation2 + $0x280] sm:$0xff]  ;;  %v5538_v7 = vld [vmem:[#allocation2 + $0x2a8] sm:$0xff] }
 0x944   : > { %v2586_v16 = vadd.f32 %v2578_v31, %v2534_v40  ;;  %v2577_v50 = vmul.f32 %v2574_v25, %v2549_v34  ;;  %v2580_v20 = vmul.f32 %v2574_v25, %v2561_v9  ;;  %v2530_v62 = vmul.f32 %v2522_v11, %v5488_v45  ;;  %v5533_v40 = vld [vmem:[#allocation2 + $0x288] sm:$0x7]  ;;  %2997 = vperm.xlu0 %4419, %v5538_v7  }
 0x945   : > { %v2533_v18 = vadd.f32 %v2525_v56, %v2481_v28  ;;  %v2599_v8 = vmul.f32 0.01, %v2583_v30  ;;  %v2582_v3 = vmul.f32 %v2574_v25, %v2569_v52  ;;  %vm2591_vm14 = vcmp.gt.f32.partialorder %v2583_v30, 0.0  ;;  %2929 = vperm.xlu1 %4413, %v5533_v40   ;;  %v2917_v28 = vld [vmem:[#allocation2 + $0x288] sm:$0xff]  ;;  %v5544_v56 = vld [vmem:[#allocation2 + $0x298] sm:$0xff]  ;;  %v5551_v52 = vld [vmem:[#allocation2 + $0x2b0] sm:$0xff] }
 0x946   : > { %v2602_v33 = vmul.f32 0.01, %v2586_v16  ;;  %v2588_v35 = vadd.f32 %v2580_v20, %v2536_v29  ;;  %v2538_v63 = vadd.f32 %v2530_v62, %v2486_v19  ;;  %vm2592_vm15 = vcmp.gt.f32.partialorder %v2584_v48, 0.0  ;;  %v2654_v29 = vpop.permute.xlu1 %2653  ;;  %v5546_v19 = vld [vmem:[#allocation2 + $0x290] sm:$0xff]  ;;  %v5580_v20 = vld [vmem:[#allocation2 + $0x2c8] sm:$0xff]  ;;  %v2924_v62 = vld [vmem:[#allocation2 + $0x2f8] sm:$0xff] }
 0x947   : > { %v2585_v36 = vadd.f32 %v2577_v50, %v2533_v18  ;;  %v2581_v55 = vmul.f32 %v2574_v25, %v5490_v13  ;;  %v2600_v27 = vmul.f32 0.01, %v2584_v48  ;;  %v2607_v59 = vsel %vm2591_vm14, %v2583_v30, %v2599_v8  ;;  %v2656_v57 = vpop.permute.xlu0 %2655  ;;  %v2913_v30 = vld [vmem:[#allocation2 + $0x2e0] sm:$0xff]  ;;  %v5569_v50 = vld [vmem:[#allocation2 + $0x2f0] sm:$0xff]  ;;  %v5590_v8 = vld [vmem:[#allocation2 + $0x2e8] sm:$0xff] }
 0x948   : > { %vm2594_vm0 = vcmp.gt.f32.partialorder %v2586_v16, 0.0  ;;  %vm2595_vm1 = vcmp.gt.f32.partialorder %v2587_v4, 0.0  ;;  %v2603_v31 = vmul.f32 0.01, %v2587_v4  ;;  %v2604_v21 = vmul.f32 0.01, %v2588_v35 }
 0x949   : > { %vm2593_vm3 = vcmp.gt.f32.partialorder %v2585_v36, 0.0  ;;  %v2601_v34 = vmul.f32 0.01, %v2585_v36  ;;  %v2590_v9 = vadd.f32 %v2582_v3, %v2538_v63  ;;  %v2589_v45 = vadd.f32 %v2581_v55, %v2537_v60  ;;  %4414 = vset.pattern.permute.xlu1 %v4596_v0  ;;  %v5565_v60 = vld [vmem:[#allocation2 + $0x2d0] sm:$0xff]  ;;  %v2911_v18 = vld [vmem:[#allocation2 + $0x2c0] sm:$0xff] }
 0x94a   : > { %v2608_v11 = vsel %vm2592_vm15, %v2584_v48, %v2600_v27  ;;  %vm2596_vm4 = vcmp.gt.f32.partialorder %v2588_v35, 0.0  ;;  %v2610_v61 = vsel %vm2594_vm0, %v2586_v16, %v2602_v33  ;;  %v2611_v13 = vsel %vm2595_vm1, %v2587_v4, %v2603_v31  ;;  %v2658_v43 = vpop.permute.xlu1 %2657  ;;  %v2922_v48 = vld [vmem:[#allocation2 + $0x2d8] sm:$0xff]  ;;  %2935 = vperm.xlu1 %4414, %v5536_v2   ;;  %v2909_v16 = vld [vmem:[#allocation2 + $0x2a0] sm:$0xff] }
 0x94b   : > { %v4161_v26 = vpack.c.bf16 %v2608_v11, %v2607_v59  ;;  %v2609_v5 = vsel %vm2593_vm3, %v2585_v36, %v2601_v34  ;;  %v2606_v53 = vmul.f32 0.01, %v2590_v9  ;;  %v2605_v39 = vmul.f32 0.01, %v2589_v45  ;;  %v2660_v17 = vpop.permute.xlu0 %2659  ;;  %3012 = vperm.xlu0 %4419, %v2922_v48   ;;  %v2920_v4 = vld [vmem:[#allocation2 + $0x2b8] sm:$0xff] }
 0x94c   : > { %v4165_v49 = vpack.c.bf16 %v2610_v61, %v2609_v5  ;;  %v2612_v25 = vsel %vm2596_vm4, %v2588_v35, %v2604_v21  ;;  %vm2598_vm5 = vcmp.gt.f32.partialorder %v2590_v9, 0.0  ;;  %vm2597_vm7 = vcmp.gt.f32.partialorder %v2589_v45, 0.0 }
 0x94d   : > { %4162 = vmatprep.subr.bf16.mxu0 %v4161_v26  ;;  %v4169_v24 = vpack.c.bf16 %v2612_v25, %v2611_v13  ;;  %v2613_v51 = vsel %vm2597_vm7, %v2589_v45, %v2605_v39  ;;  %v2614_v42 = vsel %vm2598_vm5, %v2590_v9, %v2606_v53 }
 0x94e   : > { %4164 = vmatpush3.bf16.msra.mxu0 %v4161_v26  ;;  %v4173_v23 = vpack.c.bf16 %v2614_v42, %v2613_v51  ;;  %v2662_v15 = vpop.permute.xlu1 %2661  ;;  %4415 = vset.pattern.permute.xlu1 %v4598_v6 }
 0x94f   : > { %4166 = vmatprep.subr.bf16.mxu0 %v4165_v49  ;;  %2987 = vperm.xlu1 %4415, %v2917_v28   ;;  %v2617_v33 = vpop.permute.xlu0 %2616 }
 0x950   : > { %4425 = vset.pattern.permute.xlu0 %v4596_v0 }
 0x951   : > { %2940 = vperm.xlu0 %4425, %v5546_v19  }
 0x952   : > { %4168 = vmatpush3.bf16.msra.mxu0 %v4165_v49 }
 0x953   : > { %4170 = vmatprep.subr.bf16.mxu0 %v4169_v24  ;;  %2992 = vperm.xlu1 %4415, %v5544_v56  }
 0x955   : > { %2950 = vperm.xlu0 %4425, %v5551_v52  }
 0x956   : > { %4172 = vmatpush3.bf16.msra.mxu0 %v4169_v24 }
 0x957   : > { %4174 = vmatprep.subr.bf16.mxu0 %v4173_v23  ;;  %4416 = vset.pattern.permute.xlu1 %v4599_v10 }
 0x958   : > { %3038 = vperm.xlu1 %4416, %v5546_v19  }
 0x959   : > { %2965 = vperm.xlu0 %4425, %v2913_v30  }
 0x95a   : > { %4176 = vmatpush3.bf16.msra.mxu0 %v4173_v23 }
 0x95c   : > { %4417 = vset.pattern.permute.xlu1 %v4596_v0 }
 0x95d   : > { %3972 = vmatmul.mubr.msk.f32.vlgmr.msra.gmra.mrb[32].mxu0 %vm477_vm6, %v2650_v54  ;;  %2945 = vperm.xlu1 %4417, %v2909_v16  }
 0x95e   : > { %3974 = vmatprep.mubr.msk.f32.mxu0 %vm477_vm6, %v2652_v32  ;;  %4427 = vset.pattern.permute.xlu0 %v4599_v10 }
 0x95f   : > { %3034 = vperm.xlu0 %4427, %v5536_v2  }
 0x961   : > { %3975 = vmatmul.mubr.msk.f32.gmra.mrb[34].mxu0 %vm477_vm6, %v2654_v29  ;;  %4418 = vset.pattern.permute.xlu1 %v4600_v14 }
 0x962   : > { %3977 = vmatprep.mubr.msk.f32.mxu0 %vm477_vm6, %v2656_v57  ;;  %3086 = vperm.xlu1 %4418, %v5536_v2  }
 0x963   : > { %3046 = vperm.xlu0 %4427, %v5551_v52  }
 0x965   : > { %3978 = vmatmul.mubr.msk.f32.gmra.mrb[36].mxu0 %vm477_vm6, %v2658_v43 }
 0x966   : > { %3980 = vmatprep.mubr.msk.f32.mxu0 %vm477_vm6, %v2660_v17  ;;  %3090 = vperm.xlu1 %4418, %v5546_v19  }
 0x967   : > { %3058 = vperm.xlu0 %4427, %v2913_v30  }
 0x969   : > { %3981 = vmatmul.mubr.msk.f32.gmra.mrb[38].mxu0 %vm477_vm6, %v2662_v15 }
 0x96a   : > { %4420 = vset.pattern.permute.xlu1 %v4598_v6 }
 0x96b   : > { %4431 = vset.pattern.permute.xlu0 %v4600_v14  ;;  %3002 = vperm.xlu1 %4420, %v2920_v4  }
 0x96c   : > { %3094 = vperm.xlu0 %4431, %v2909_v16  }
 0x96f   : > { %4421 = vset.pattern.permute.xlu1 %v4599_v10 }
 0x970   : > { %3106 = vperm.xlu0 %4431, %v5565_v60   ;;  %3042 = vperm.xlu1 %4421, %v2909_v16  }
 0x974   : > { %3114 = vperm.xlu0 %4431, %v5569_v50   ;;  %4422 = vset.pattern.permute.xlu1 %v4596_v0 }
 0x975   : > { %2955 = vperm.xlu1 %4422, %v2911_v18  }
 0x978   : > { %3197 = vrot.lane.b32.xlu0 %v2909_v16, %s4601_s15 }
 0x979   : > { %4434 = vset.pattern.permute.xlu0 %v4602_v22  ;;  %2960 = vperm.xlu1 %4422, %v5565_v60  }
 0x97c   : > { %3201 = vrot.lane.b32.xlu0 %v2911_v18, %s4601_s15 }
 0x97d   : > { %4423 = vset.pattern.permute.xlu1 %v4600_v14 }
 0x97e   : > { %3098 = vperm.xlu1 %4423, %v5551_v52  }
 0x980   : > { %3205 = vrot.lane.b32.xlu0 %v2913_v30, %s4601_s15 }
 0x982   : > { %4424 = vset.pattern.permute.xlu1 %v4598_v6 }
 0x983   : > { %3007 = vperm.xlu1 %4424, %v5580_v20  }
 0x984   : > { %3162 = vperm.xlu0 %4434, %v2917_v28  }
 0x987   : > { %4426 = vset.pattern.permute.xlu1 %v4599_v10 }
 0x988   : > { %3174 = vperm.xlu0 %4434, %v2920_v4   ;;  %3050 = vperm.xlu1 %4426, %v2911_v18  }
 0x98c   : > { %3182 = vperm.xlu0 %4434, %v2922_v48   ;;  %3054 = vperm.xlu1 %4426, %v5565_v60  }
 0x990   : > { %3190 = vperm.xlu0 %4434, %v2924_v62   ;;  %4428 = vset.pattern.permute.xlu1 %v4596_v0  ;;  %v2621_v0 = vpop.permute.xlu1 %2620 }
 0x991   : > { %2970 = vperm.xlu1 %4428, %v5569_v50  }
 0x994   : > { %4437 = vset.pattern.permute.xlu0 %v4597_v1  ;;  %v2629_v1 = vpop.permute.xlu0 %2628  ;;  %v2625_v36 = vpop.permute.xlu1 %2624 }
 0x995   : > { %4429 = vset.pattern.permute.xlu1 %v4600_v14 }
 0x996   : > { %3102 = vperm.xlu1 %4429, %v2911_v18  }
 0x998   : > { %v2637_v34 = vpop.permute.xlu0 %2636  ;;  %v2633_v45 = vpop.permute.xlu1 %2632 }
 0x99a   : > { %4430 = vset.pattern.permute.xlu1 %v4598_v6 }
 0x99b   : > { %3017 = vperm.xlu1 %4430, %v5590_v8  }
 0x99c   : > { %v2645_v51 = vpop.permute.xlu0 %2644  ;;  %v2641_v23 = vpop.permute.xlu1 %2640 }
 0x99f   : > { %3022 = vperm.xlu1 %4430, %v2924_v62  }
 0x9a3   : > { %4432 = vset.pattern.permute.xlu1 %v4599_v10 }
 0x9a4   : > { %3062 = vperm.xlu1 %4432, %v5569_v50  }
 0x9a8   : > { %4433 = vset.pattern.permute.xlu1 %v4600_v14 }
 0x9a9   : > { %3110 = vperm.xlu1 %4433, %v2913_v30   ;;  %v2815_v30 = vpop.permute.xlu1 %2814 }
 0x9ad   : > { %3193 = vrot.lane.b32.xlu1 %v5536_v2, %s4601_s15 }
 0x9ae   : > { %4435 = vset.pattern.permute.xlu1 %v4602_v22 }
 0x9b1   : > { %3195 = vrot.lane.b32.xlu1 %v5546_v19, %s4601_s15 }
 0x9b5   : > { %3199 = vrot.lane.b32.xlu1 %v5551_v52, %s4601_s15  ;;  %v2817_v52 = vpop.permute.xlu0 %2816 }
 0x9b6   : > { %v2818_v4 = vsel %vm633_vm2, %v2815_v30, %v2817_v52 }
 0x9b9   : > { %3203 = vrot.lane.b32.xlu1 %v5565_v60, %s4601_s15  ;;  %v2811_v60 = vpop.permute.xlu1 %2810 }
 0x9bd   : > { %3207 = vrot.lane.b32.xlu1 %v5569_v50, %s4601_s15 }
 0x9c1   : > { %3166 = vperm.xlu1 %4435, %v5544_v56  }
 0x9c4   : > { %v2930_v18 = vpop.permute.xlu1 %2929 }
 0x9c5   : > { %3170 = vperm.xlu1 %4435, %v5538_v7  }
 0x9c9   : > { %3178 = vperm.xlu1 %4435, %v5580_v20   ;;  %v5621_v50 = vpop.permute.xlu1 %2935 }
 0x9cd   : > { %3186 = vperm.xlu1 %4435, %v5590_v8  }
 0x9ce   : > { %v5623_v56 = vpop.permute.xlu1 %2987 }
 0x9d1   : > { %4436 = vset.pattern.permute.xlu1 %v4607_v47 }
 0x9d2   : > { %v2993_v62 = vpop.permute.xlu1 %2992 }
 0xa30   : > { %v3973_v3 = vpop.f32.mrb[32].mxu0 }
 0xa31   : > { %v2751_v35 = vadd.f32 %v3973_v3, %v2621_v0  ;;  %v2745_v63 = vpop.f32.mrb[33].mxu0 }
 0xa32   : > { %v2746_v6 = vadd.f32 %v2745_v63, %v2617_v33  ;;  %v3039_v33 = vpop.permute.xlu1 %3038 }
 0xa33   : > { %vm2785_vm8 = vcmp.gt.f32.partialorder %v2751_v35, 0.0  ;;  %v2793_v10 = vmul.f32 0.01, %v2751_v35 }
 0xa34   : > { %vm2784_vm10 = vcmp.gt.f32.partialorder %v2746_v6, 0.0  ;;  %v2792_v55 = vmul.f32 0.01, %v2746_v6  ;;  %v3976_v27 = vpop.f32.mrb[34].mxu0 }
 0xa35   : > { %v2801_v59 = vsel %vm2785_vm8, %v2751_v35, %v2793_v10  ;;  %v2761_v31 = vadd.f32 %v3976_v27, %v2629_v1  ;;  %v2755_v14 = vpop.f32.mrb[35].mxu0 }
 0xa36   : > { %v2800_v21 = vsel %vm2784_vm10, %v2746_v6, %v2792_v55  ;;  %v2756_v9 = vadd.f32 %v2755_v14, %v2625_v36  ;;  %v5625_v0 = vpop.permute.xlu1 %2945 }
 0xa37   : > { %v4178_v11 = vpack.c.bf16 %v2801_v59, %v2800_v21  ;;  %vm2787_vm11 = vcmp.gt.f32.partialorder %v2761_v31, 0.0  ;;  %v2795_v26 = vmul.f32 0.01, %v2761_v31  ;;  %v2915_v21 = vld [vmem:[#allocation2 + $0x280] sm:$0x3f] }
 0xa38   : > { %vm2786_vm12 = vcmp.gt.f32.partialorder %v2756_v9, 0.0  ;;  %v2794_v22 = vmul.f32 0.01, %v2756_v9  ;;  %v3979_v5 = vpop.f32.mrb[36].mxu0  ;;  %3360 = vrot.lane.b32.xlu1 %v2915_v21, %s4603_s17 }
 0xa39   : > { %v2803_v61 = vsel %vm2787_vm11, %v2761_v31, %v2795_v26  ;;  %v2771_v49 = vadd.f32 %v3979_v5, %v2637_v34  ;;  %v2765_v53 = vpop.f32.mrb[37].mxu0  ;;  %4179 = vmatpush3.bf16.msra.mxu1 %v4178_v11  ;;  %v2916_v34 = vld [vmem:[#allocation2 + $0x288] sm:$0x3f] }
 0xa3a   : > { %v2802_v39 = vsel %vm2786_vm12, %v2756_v9, %v2794_v22  ;;  %v2766_v13 = vadd.f32 %v2765_v53, %v2633_v45  ;;  %4180 = vmatprep.subr.bf16.mxu1 %v4604_v41  ;;  %v5627_v7 = vpop.permute.xlu1 %3086  ;;  %v2926_v9 = vsub.f32 1.0, %v5533_v40  ;;  %3362 = vrot.lane.b32.xlu0 %v2916_v34, %s4603_s17  ;;  %v2902_v45 = vpop.permute.xlu0 %2901 }
 0xa3b   : > { %v4181_v25 = vpack.c.bf16 %v2803_v61, %v2802_v39  ;;  %vm2789_vm13 = vcmp.gt.f32.partialorder %v2771_v49, 0.0  ;;  %v2797_v24 = vmul.f32 0.01, %v2771_v49 }
 0xa3c   : > { %vm2788_vm14 = vcmp.gt.f32.partialorder %v2766_v13, 0.0  ;;  %v2796_v42 = vmul.f32 0.01, %v2766_v13  ;;  %v3982_v54 = vpop.f32.mrb[38].mxu0  ;;  %3356 = vperm.xlu1 %4436, %v2916_v34  }
 0xa3d   : > { %v2805_v32 = vsel %vm2789_vm13, %v2771_v49, %v2797_v24  ;;  %v2781_v29 = vadd.f32 %v3982_v54, %v2645_v51  ;;  %v2775_v57 = vpop.f32.mrb[39].mxu0  ;;  %4182 = vmatpush3.bf16.msra.mxu1 %v4181_v25 }
 0xa3e   : > { %v2804_v43 = vsel %vm2788_vm14, %v2766_v13, %v2796_v42  ;;  %v2776_v17 = vadd.f32 %v2775_v57, %v2641_v23  ;;  %4183 = vmatprep.subr.bf16.mxu1 %v4604_v41  ;;  %v5629_v1 = vpop.permute.xlu1 %3090  ;;  %3447 = vperm.xlu0 %4437, %v2926_v9   ;;  %v2998_v11 = vpop.permute.xlu0 %2997 }
 0xa3f   : > { %v4184_v15 = vpack.c.bf16 %v2805_v32, %v2804_v43  ;;  %vm2791_vm15 = vcmp.gt.f32.partialorder %v2781_v29, 0.0  ;;  %v2799_v2 = vmul.f32 0.01, %v2781_v29 }
 0xa40   : > { %vm2790_vm0 = vcmp.gt.f32.partialorder %v2776_v17, 0.0  ;;  %v2798_v48 = vmul.f32 0.01, %v2776_v17 }
 0xa41   : > { %v2807_v28 = vsel %vm2791_vm15, %v2781_v29, %v2799_v2  ;;  %4185 = vmatpush3.bf16.msra.mxu1 %v4184_v15 }
 0xa42   : > { %v2806_v19 = vsel %vm2790_vm0, %v2776_v17, %v2798_v48  ;;  %4186 = vmatprep.subr.bf16.mxu1 %v4604_v41  ;;  %v3013_v26 = vpop.permute.xlu0 %3012 }
 0xa43   : > { %v4187_v16 = vpack.c.bf16 %v2807_v28, %v2806_v19 }
 0xa45   : > { %4188 = vmatpush3.bf16.msra.mxu1 %v4187_v16 }
 0xa46   : > { %4205 = vmatprep.subr.bf16.mxu1 %v4604_v41  ;;  %v2941_v22 = vpop.permute.xlu0 %2940 }
 0xa48   : > { %4000 = vmatmul.mubr.msk.f32.vlgmr.msra.gmra.mrb[8].mxu1 %vm477_vm6, %v2818_v4 }
 0xa49   : > { %4046 = vmatprep.mubr.msk.f32.mxu1 %vm4605_vm9, %v4606_v46  ;;  %v3003_v46 = vpop.permute.xlu1 %3002 }
 0xa4a   : > { %v2951_v53 = vpop.permute.xlu0 %2950 }
 0xa4d   : > { %v5631_v20 = vpop.permute.xlu1 %3042 }
 0xa4e   : > { %v2966_v39 = vpop.permute.xlu0 %2965 }
 0xa51   : > { %v2956_v8 = vpop.permute.xlu1 %2955 }
 0xa52   : > { %v3035_v40 = vpop.permute.xlu0 %3034 }
 0xa55   : > { %v2961_v3 = vpop.permute.xlu1 %2960 }
 0xa56   : > { %v3047_v24 = vpop.permute.xlu0 %3046 }
 0xa59   : > { %v3099_v47 = vpop.permute.xlu1 %3098 }
 0xa5a   : > { %v3059_v32 = vpop.permute.xlu0 %3058 }
 0xa5d   : > { %v3008_v36 = vpop.permute.xlu1 %3007 }
 0xa5e   : > { %v3095_v17 = vpop.permute.xlu0 %3094 }
 0xa61   : > { %v3051_v35 = vpop.permute.xlu1 %3050 }
 0xa65   : > { %v3055_v63 = vpop.permute.xlu1 %3054 }
 0xa69   : > { %v2971_v6 = vpop.permute.xlu1 %2970 }
 0xa6d   : > { %v5633_v10 = vpop.permute.xlu1 %3102 }
 0xa71   : > { %v5635_v55 = vpop.permute.xlu1 %3017 }
 0xa75   : > { %v5637_v27 = vpop.permute.xlu1 %3022 }
 0xa79   : > { %v5639_v59 = vpop.permute.xlu1 %3062 }
 0xa7d   : > { %v5641_v31 = vpop.permute.xlu1 %3110 }
 0xa81   : > { %v3194_v14 = vpop.permute.xlu1 %3193 }
 0xa82   : > { %4018 = vmatprep.mubr.msk.f32.mxu0 %vm477_vm6, %v3194_v14 }
 0xb1b   : > { %v2887_v5 = vpop.f32.mrb[8].mxu1 }
 0xb1c   : > { %v2888_v61 = vadd.f32 %v2887_v5, %v2811_v60  ;;  %v4001_v49 = vpop.f32.mrb[9].mxu1 }
 0xb1e   : > { %4454 = vtanh.f32 %v2888_v61  ;;  %v2896_v54 = vrot.slane %v2888_v61, 3 }
 0xb28   : > { %v4455_v13 = vpop.eup %4454 }
 0xb29   : > { %v2892_v25 = vmul.f32 1.442695, %v4455_v13 }
 0xb2b   : > { %4456 = vpow2.f32 %v2892_v25 }
 0xb35   : > { %v4457_v51 = vpop.eup %4456 }
 0xb36   : > { %v2894_v42 = vmul.f32 %v4457_v51, %v5500_v58 }
 0xb38   : > { %v2898_v23 = vadd.f32 %v2896_v54, %v2894_v42 }
 0xb3a   : > { %v2904_v29 = vmul.f32 %v2902_v45, %v2898_v23 }
 0xb3c   : > { %v5649_v57 = vadd.f32 %v2904_v29, %v5503_v12 }
 0xb3e   : > { %v5652_v43 = vmul.f32 %v2930_v18, %v5649_v57  ;;  %v3107_v18 = vpop.permute.xlu0 %3106 }
 0xb40   : > { %v2976_v15 = vrot.slane %v5652_v43, %v4844_v37  ;;  %v3068_v2 = vrot.slane %v5652_v43, %v4846_v38  ;;  %v3120_v58 = vrot.slane %v5652_v43, %v4860_v44 }
 0xb42   : > { %v2982_v48 = vmul.f32 %v2976_v15, %v2961_v3  ;;  %v2978_v28 = vmul.f32 %v2976_v15, %v2941_v22  ;;  %v3124_v19 = vmul.f32 %v3120_v58, %v3099_v47  ;;  %v2981_v52 = vmul.f32 %v2976_v15, %v2956_v8  ;;  %v3115_v61 = vpop.permute.xlu0 %3114 }
 0xb43   : > { %v2980_v30 = vmul.f32 %v2976_v15, %v2951_v53  ;;  %v3070_v4 = vmul.f32 %v3068_v2, %v3039_v33  ;;  %v2983_v60 = vmul.f32 %v2976_v15, %v2966_v39  ;;  %v3073_v21 = vmul.f32 %v3068_v2, %v3051_v35 }
 0xb44   : > { %v3030_v12 = vadd.f32 %v3013_v26, %v2982_v48  ;;  %v3026_v16 = vadd.f32 %v2993_v62, %v2978_v28  ;;  %v3029_v14 = vadd.f32 %v3008_v36, %v2981_v52  ;;  %v2977_v37 = vmul.f32 %v2976_v15, %v5621_v50 }
 0xb45   : > { %v3028_v34 = vadd.f32 %v3003_v46, %v2980_v30  ;;  %v3122_v38 = vmul.f32 %v3120_v58, %v5629_v1  ;;  %v3074_v45 = vmul.f32 %v3068_v2, %v3055_v63  ;;  %v2984_v44 = vmul.f32 %v2976_v15, %v2971_v6 }
 0xb46   : > { %v3078_v9 = vadd.f32 %v3070_v4, %v3026_v16  ;;  %v3081_v3 = vadd.f32 %v3073_v21, %v3029_v14  ;;  %v3025_v47 = vadd.f32 %v5623_v56, %v2977_v37  ;;  %v3069_v8 = vmul.f32 %v3068_v2, %v3035_v40  ;;  %v3198_v14 = vpop.permute.xlu0 %3197 }
 0xb47   : > { %v3072_v22 = vmul.f32 %v3068_v2, %v3047_v24  ;;  %v3082_v26 = vadd.f32 %v3074_v45, %v3030_v12  ;;  %v3121_v62 = vmul.f32 %v3120_v58, %v5627_v7  ;;  %v3031_v33 = vadd.f32 %v5635_v55, %v2983_v60  ;;  %v3196_v60 = vpop.permute.xlu1 %3195 }
 0xb48   : > { %v2979_v46 = vmul.f32 %v2976_v15, %v5625_v0  ;;  %v3077_v36 = vadd.f32 %v3069_v8, %v3025_v47  ;;  %v3125_v50 = vmul.f32 %v3120_v58, %v5633_v10  ;;  %v3075_v5 = vmul.f32 %v3068_v2, %v3059_v32 }
 0xb49   : > { %v3080_v35 = vadd.f32 %v3072_v22, %v3028_v34  ;;  %v3130_v1 = vadd.f32 %v3122_v38, %v3078_v9  ;;  %v3071_v6 = vmul.f32 %v3068_v2, %v5631_v20  ;;  %v3032_v56 = vadd.f32 %v5637_v27, %v2984_v44 }
 0xb4a   : > { %v3027_v63 = vadd.f32 %v2998_v11, %v2979_v46  ;;  %v3129_v49 = vadd.f32 %v3121_v62, %v3077_v36  ;;  %v3133_v39 = vadd.f32 %v3125_v50, %v3081_v3  ;;  %v3083_v7 = vadd.f32 %v3075_v5, %v3031_v33  ;;  %v3202_v21 = vpop.permute.xlu0 %3201 }
 0xb4b   : > { %v3132_v53 = vadd.f32 %v3124_v19, %v3080_v35  ;;  %v3123_v55 = vmul.f32 %v3120_v58, %v3095_v17  ;;  %v3126_v25 = vmul.f32 %v3120_v58, %v3107_v18  ;;  %v3076_v0 = vmul.f32 %v3068_v2, %v5639_v59  ;;  %v3200_v34 = vpop.permute.xlu1 %3199 }
 0xb4c   : > { %v3079_v13 = vadd.f32 %v3071_v6, %v3027_v63  ;;  %v3145_v40 = vmul.f32 0.01, %v3129_v49  ;;  %v3128_v10 = vmul.f32 %v3120_v58, %v3115_v61  ;;  %vm3137_vm9 = vcmp.gt.f32.partialorder %v3129_v49, 0.0 }
 0xb4d   : > { %v3148_v24 = vmul.f32 0.01, %v3132_v53  ;;  %v3134_v11 = vadd.f32 %v3126_v25, %v3082_v26  ;;  %v3084_v42 = vadd.f32 %v3076_v0, %v3032_v56  ;;  %vm3138_vm1 = vcmp.gt.f32.partialorder %v3130_v1, 0.0 }
 0xb4e   : > { %v3131_v51 = vadd.f32 %v3123_v55, %v3079_v13  ;;  %v3127_v20 = vmul.f32 %v3120_v58, %v5641_v31  ;;  %v3146_v27 = vmul.f32 0.01, %v3130_v1  ;;  %v3153_v54 = vsel %vm3137_vm9, %v3129_v49, %v3145_v40  ;;  %v3206_v9 = vpop.permute.xlu0 %3205 }
 0xb4f   : > { %vm3140_vm3 = vcmp.gt.f32.partialorder %v3132_v53, 0.0  ;;  %vm3141_vm4 = vcmp.gt.f32.partialorder %v3133_v39, 0.0  ;;  %v3149_v23 = vmul.f32 0.01, %v3133_v39  ;;  %v3150_v29 = vmul.f32 0.01, %v3134_v11  ;;  %v3204_v37 = vpop.permute.xlu1 %3203 }
 0xb50   : > { %vm3139_vm5 = vcmp.gt.f32.partialorder %v3131_v51, 0.0  ;;  %v3147_v32 = vmul.f32 0.01, %v3131_v51  ;;  %v3136_v17 = vadd.f32 %v3128_v10, %v3084_v42  ;;  %v3135_v59 = vadd.f32 %v3127_v20, %v3083_v7 }
 0xb51   : > { %v3154_v15 = vsel %vm3138_vm1, %v3130_v1, %v3146_v27  ;;  %vm3142_vm7 = vcmp.gt.f32.partialorder %v3134_v11, 0.0  ;;  %v3156_v28 = vsel %vm3140_vm3, %v3132_v53, %v3148_v24  ;;  %v3157_v31 = vsel %vm3141_vm4, %v3133_v39, %v3149_v23 }
 0xb52   : > { %v4189_v2 = vpack.c.bf16 %v3154_v15, %v3153_v54  ;;  %v3155_v48 = vsel %vm3139_vm5, %v3131_v51, %v3147_v32  ;;  %v3152_v52 = vmul.f32 0.01, %v3136_v17  ;;  %v3151_v30 = vmul.f32 0.01, %v3135_v59  ;;  %v3163_v45 = vpop.permute.xlu0 %3162 }
 0xb53   : > { %v4193_v19 = vpack.c.bf16 %v3156_v28, %v3155_v48  ;;  %v3158_v58 = vsel %vm3142_vm7, %v3134_v11, %v3150_v29  ;;  %vm3144_vm8 = vcmp.gt.f32.partialorder %v3136_v17, 0.0  ;;  %vm3143_vm10 = vcmp.gt.f32.partialorder %v3135_v59, 0.0  ;;  %v3208_v38 = vpop.permute.xlu1 %3207 }
 0xb54   : > { %4190 = vmatprep.subr.bf16.mxu0 %v4189_v2  ;;  %v4197_v12 = vpack.c.bf16 %v3158_v58, %v3157_v31  ;;  %v3159_v16 = vsel %vm3143_vm10, %v3135_v59, %v3151_v30  ;;  %v3160_v4 = vsel %vm3144_vm8, %v3136_v17, %v3152_v52 }
 0xb55   : > { %4192 = vmatpush3.bf16.msra.mxu0 %v4189_v2  ;;  %v4201_v18 = vpack.c.bf16 %v3160_v4, %v3159_v16 }
 0xb56   : > { %4194 = vmatprep.subr.bf16.mxu0 %v4193_v19  ;;  %v3175_v3 = vpop.permute.xlu0 %3174 }
 0xb57   : > { %v3167_v44 = vpop.permute.xlu1 %3166 }
 0xb59   : > { %4196 = vmatpush3.bf16.msra.mxu0 %v4193_v19 }
 0xb5a   : > { %4198 = vmatprep.subr.bf16.mxu0 %v4197_v12  ;;  %v3183_v1 = vpop.permute.xlu0 %3182 }
 0xb5b   : > { %v3171_v8 = vpop.permute.xlu1 %3170 }
 0xb5d   : > { %4200 = vmatpush3.bf16.msra.mxu0 %v4197_v12 }
 0xb5e   : > { %4202 = vmatprep.subr.bf16.mxu0 %v4201_v18  ;;  %v3191_v10 = vpop.permute.xlu0 %3190 }
 0xb5f   : > { %v3179_v56 = vpop.permute.xlu1 %3178 }
 0xb61   : > { %4204 = vmatpush3.bf16.msra.mxu0 %v4201_v18 }
 0xb62   : > { %v3363_v48 = vpop.permute.xlu0 %3362 }
 0xb63   : > { %v3187_v42 = vpop.permute.xlu1 %3186 }
 0xb64   : > { %4019 = vmatmul.mubr.msk.f32.vlgmr.msra.gmra.mrb[40].mxu0 %vm477_vm6, %v3196_v60 }
 0xb65   : > { %4021 = vmatprep.mubr.msk.f32.mxu0 %vm477_vm6, %v3198_v14 }
 0xb66   : > { %v3448_v14 = vpop.permute.xlu0 %3447 }
 0xb67   : > { %v3361_v28 = vpop.permute.xlu1 %3360 }
 0xb68   : > { %4022 = vmatmul.mubr.msk.f32.gmra.mrb[42].mxu0 %vm477_vm6, %v3200_v34  ;;  %v3364_v52 = vsel %vm633_vm2, %v3361_v28, %v3363_v48 }
 0xb69   : > { %4024 = vmatprep.mubr.msk.f32.mxu0 %vm477_vm6, %v3202_v21 }
 0xb6b   : > { %v3357_v30 = vpop.permute.xlu1 %3356 }
 0xb6c   : > { %4025 = vmatmul.mubr.msk.f32.gmra.mrb[44].mxu0 %vm477_vm6, %v3204_v37 }
 0xb6d   : > { %4027 = vmatprep.mubr.msk.f32.mxu0 %vm477_vm6, %v3206_v9 }
 0xb70   : > { %4028 = vmatmul.mubr.msk.f32.gmra.mrb[46].mxu0 %vm477_vm6, %v3208_v38 }
 0xc37   : > { %v4020_v47 = vpop.f32.mrb[40].mxu0 }
 0xc38   : > { %v3297_v22 = vadd.f32 %v4020_v47, %v3167_v44  ;;  %v3291_v26 = vpop.f32.mrb[41].mxu0 }
 0xc39   : > { %v3292_v62 = vadd.f32 %v3291_v26, %v3163_v45 }
 0xc3a   : > { %vm3331_vm11 = vcmp.gt.f32.partialorder %v3297_v22, 0.0  ;;  %v3339_v33 = vmul.f32 0.01, %v3297_v22 }
 0xc3b   : > { %vm3330_vm12 = vcmp.gt.f32.partialorder %v3292_v62, 0.0  ;;  %v3338_v46 = vmul.f32 0.01, %v3292_v62  ;;  %v4023_v36 = vpop.f32.mrb[42].mxu0 }
 0xc3c   : > { %v3347_v35 = vsel %vm3331_vm11, %v3297_v22, %v3339_v33  ;;  %v3307_v50 = vadd.f32 %v4023_v36, %v3175_v3  ;;  %v3301_v5 = vpop.f32.mrb[43].mxu0 }
 0xc3d   : > { %v3346_v63 = vsel %vm3330_vm12, %v3292_v62, %v3338_v46  ;;  %v3302_v6 = vadd.f32 %v3301_v5, %v3171_v8 }
 0xc3e   : > { %v4206_v61 = vpack.c.bf16 %v3347_v35, %v3346_v63  ;;  %vm3333_vm13 = vcmp.gt.f32.partialorder %v3307_v50, 0.0  ;;  %v3341_v49 = vmul.f32 0.01, %v3307_v50 }
 0xc3f   : > { %vm3332_vm14 = vcmp.gt.f32.partialorder %v3302_v6, 0.0  ;;  %v3340_v53 = vmul.f32 0.01, %v3302_v6  ;;  %v4026_v39 = vpop.f32.mrb[44].mxu0 }
 0xc40   : > { %v3349_v7 = vsel %vm3333_vm13, %v3307_v50, %v3341_v49  ;;  %v3317_v13 = vadd.f32 %v4026_v39, %v3183_v1  ;;  %v3311_v55 = vpop.f32.mrb[45].mxu0  ;;  %4207 = vmatpush3.bf16.msra.mxu1 %v4206_v61 }
 0xc41   : > { %v3348_v25 = vsel %vm3332_vm14, %v3302_v6, %v3340_v53  ;;  %v3312_v0 = vadd.f32 %v3311_v55, %v3179_v56  ;;  %4208 = vmatprep.subr.bf16.mxu1 %v4604_v41 }
 0xc42   : > { %v4209_v40 = vpack.c.bf16 %v3349_v7, %v3348_v25  ;;  %vm3335_vm15 = vcmp.gt.f32.partialorder %v3317_v13, 0.0  ;;  %v3343_v24 = vmul.f32 0.01, %v3317_v13 }
 0xc43   : > { %vm3334_vm0 = vcmp.gt.f32.partialorder %v3312_v0, 0.0  ;;  %v3342_v51 = vmul.f32 0.01, %v3312_v0  ;;  %v4029_v11 = vpop.f32.mrb[46].mxu0 }
 0xc44   : > { %v3351_v20 = vsel %vm3335_vm15, %v3317_v13, %v3343_v24  ;;  %v3327_v27 = vadd.f32 %v4029_v11, %v3191_v10  ;;  %v3321_v54 = vpop.f32.mrb[47].mxu0  ;;  %4210 = vmatpush3.bf16.msra.mxu1 %v4209_v40 }
 0xc45   : > { %v3350_v23 = vsel %vm3334_vm0, %v3312_v0, %v3342_v51  ;;  %v3322_v32 = vadd.f32 %v3321_v54, %v3187_v42  ;;  %4211 = vmatprep.subr.bf16.mxu1 %v4604_v41 }
 0xc46   : > { %v4212_v29 = vpack.c.bf16 %v3351_v20, %v3350_v23  ;;  %vm3337_vm9 = vcmp.gt.f32.partialorder %v3327_v27, 0.0  ;;  %v3345_v17 = vmul.f32 0.01, %v3327_v27 }
 0xc47   : > { %vm3336_vm1 = vcmp.gt.f32.partialorder %v3322_v32, 0.0  ;;  %v3344_v59 = vmul.f32 0.01, %v3322_v32 }
 0xc48   : > { %v3353_v15 = vsel %vm3337_vm9, %v3327_v27, %v3345_v17  ;;  %4213 = vmatpush3.bf16.msra.mxu1 %v4212_v29 }
 0xc49   : > { %v3352_v2 = vsel %vm3336_vm1, %v3322_v32, %v3344_v59  ;;  %4214 = vmatprep.subr.bf16.mxu1 %v4604_v41 }
 0xc4a   : > { %v4215_v19 = vpack.c.bf16 %v3353_v15, %v3352_v2 }
 0xc4c   : > { %4216 = vmatpush3.bf16.msra.mxu1 %v4215_v19 }
 0xc4f   : > { %4047 = vmatmul.mubr.msk.f32.vlgmr.msra.gmra.mrb[10].mxu1 %vm477_vm6, %v3364_v52 }
 0xd22   : > { %v3433_v31 = vpop.f32.mrb[10].mxu1 }
 0xd23   : > { %v3434_v58 = vadd.f32 %v3433_v31, %v3357_v30  ;;  %v4048_v12 = vpop.f32.mrb[11].mxu1 }
 0xd25   : > { %4458 = vtanh.f32 %v3434_v58  ;;  %v3442_v60 = vrot.slane %v3434_v58, 3 }
 0xd2f   : > { %v4459_v16 = vpop.eup %4458 }
 0xd30   : > { %v3438_v4 = vmul.f32 1.442695, %v4459_v16 }
 0xd32   : > { %4460 = vpow2.f32 %v3438_v4 }
 0xd3c   : > { %v4461_v41 = vpop.eup %4460 }
 0xd3d   : > { %v3440_v18 = vmul.f32 %v4461_v41, %v5649_v57 }
 0xd3f   : > { %v3444_v34 = vadd.f32 %v3442_v60, %v3440_v18 }
 0xd41   : > { %v3450_v21 = vmul.f32 %v3448_v14, %v3444_v34 }
 0xd43   : > { %v3451_v37 = vadd.f32 %v3450_v21, %v5652_v43 }
 0xd45   : > { %3452 = vst [vmem:[%s173_s23] sm:$0x7] %v3451_v37 }
 0xd46   : > { %4533 = shalt.err (!%p4530_p7)
}
 0xd47   : > { %s4534_s18 = scalar_lea.hbm %s5692_s3, 64  ;;  %s4538_s20 = scalar_lea.hbm %s5738_s2, 128 }
 0xd48   : > { %p4535_p9 = scmp.ne.s32.totalorder %s5692_s3, %s4534_s18  ;;  %p4539_p0 = scmp.lt.u32.totalorder %s5692_s3, %s5738_s2 }
 0xd49   : > { %p4540_p1 = scmp.lt.u32.totalorder %s4538_s20, %s4534_s18  ;;  %p4542_p4 = scmp.lt.u32.totalorder %s4534_s18, %s5692_s3 }
 0xd4a   : > { %p4536_p2 = pnand %p4535_p9, %p4715_p12 }
 0xd4b   : > { %p4541_p11 = por %p4540_p1, %p4539_p0 }
 0xd4c   : > { %p4537_p5 = pneg %p4536_p2 }
 0xd4d   : > { %p4543_p6 = por %p4542_p4, %p4541_p11 }
 0xd4f   : > { %p4544_p8 = pnand %p4543_p6, %p4537_p5 }
 0xd51   : > { %4547 = shalt.err (!%p4544_p8)
}
 0xd52   : > { %4223 = dma.vmem_to_hbm [thread:$0]  (%p4715_p12), %s5694_s28, 64, %s5692_s3, %s3454_s4  }
 0xd53 PF: > { %s3479_s27 = sand.u32 1, %s4578_s9   ;;  %p5753_p10 = scmp.ne.s32.totalorder %s5743_s16, 0 }
 0xd54   : > { %p5754_p13 = scmp.ge.s32.totalorder %s4590_s12, 2  ;;  %s3480_s15 = scalar_lea.sflag [#allocation4], %s3479_s27 }
 0xd56   : > { %p4234_p3 = pnand %p5754_p13, %p5753_p10 }
 0xd58   : > { %4573 = dma.done.wait (!%p4234_p3), %s3480_s15, 64  }
 0xd59   : > { %4575 = vsyncadd (!%p4234_p3), %s3480_s15, 4294967232  ;;  %p16_p7 = scmp.ge.s32.totalorder %s4680_s21, 4   ;;  %s5755_s9 = smov %s4582_s10 }
 0xd5a   : > { %s5756_s10 = smov %s4586_s11  ;;  %s5757_s11 = smov %s4711_s8 }
 0xd5b   : > { %s5758_s12 = smov %s4680_s21  ;;  %18 = sbr.rel (!%p16_p7) target bundleno = 6 (0x6), region = 83 }
 0xd62   :  { %3485 = vsyncpa [#allocation3], 1 }
 0xd63   :  { %3487 = vsyncpa [#allocation3 + $0x1], 1 }
 0xd64   :  { %3488 = vsyncpa [#allocation6], 1 }
 0xd65   :  { %3490 = vsyncpa [#allocation6 + $0x1], 1 }
 0xd66   :  { %3491 = vsyncpa [#allocation4], 1 }
 0xd67   :  { %3493 = vsyncpa [#allocation4 + $0x1], 1 }

</bundles_post_ra>
